<compile_context>
chip_gen: v6e
topology: v6e:2x2x1
jax: 0.10.0
libtpu: 0.0.40
codegen_flags: <defaults>
</compile_context>

<pallas_src>
import math

import jax
import jax.numpy as jnp
from jax.experimental import pallas as pl
from jax.experimental.pallas import tpu as pltpu


# ----------------------------- fused Pallas kernel -----------------------------

def _bottleneck_kernel(x_ref, w1_ref, t1_ref, wc_ref, tc_ref, we_ref, te_ref,
                       o_ref, hp_ref, acc_ref):
    """One image per grid step: reduce(+down) -> 9-tap grouped 3x3 -> expand,
    with folded-BN affine, residual add and ReLUs, all in VMEM."""
    _, H, W, Cin = x_ref.shape
    D = wc_ref.shape[-1]
    Cout = we_ref.shape[-1]
    HW = H * W
    has_down = (w1_ref.shape[-1] == D + Cout)      # projection shortcut fused in w1

    xm = x_ref[...].reshape(HW, Cin)               # bf16 activations, lane-dense

    # ---- conv_reduce (1x1) [+ fused downsample 1x1]: one MXU matmul ----
    a = jnp.dot(xm, w1_ref[...], preferred_element_type=jnp.float32) + t1_ref[...]
    h = jnp.maximum(a[:, :D], 0.0)                 # bn_reduce + ReLU, (HW, D) f32
    if has_down:
        residual = a[:, D:]                        # downsample conv + BN (no ReLU)
    else:
        residual = xm.astype(jnp.float32)          # identity shortcut

    # ---- grouped 3x3 conv (padding=1) as 9-tap MXU accumulation ----
    # Padded slab layout: valid rows [1, H], valid cols [8, 8+W) (col offset 8
    # keeps the interior store sublane-aligned); zeros elsewhere are the halo.
    hp_ref[...] = jnp.zeros_like(hp_ref)
    hp_ref[1:H + 1, 8:8 + W, :] = h.reshape(H, W, D)
    acc_ref[...] = jnp.zeros_like(acc_ref)
    for kh in range(3):
        for kw in range(3):
            win = hp_ref[kh:kh + H, 7 + kw:7 + kw + W, :]
            win = win.reshape(HW, D).astype(jnp.bfloat16)
            acc_ref[...] += jnp.dot(win, wc_ref[3 * kh + kw],
                                    preferred_element_type=jnp.float32)
    bt = jnp.maximum(acc_ref[...] + tc_ref[...], 0.0).astype(jnp.bfloat16)

    # ---- conv_expand (1x1) + bn_expand + residual add + final ReLU ----
    c = jnp.dot(bt, we_ref[...], preferred_element_type=jnp.float32) + te_ref[...]
    y = jnp.maximum(c + residual, 0.0)
    o_ref[...] = y.reshape(o_ref.shape).astype(o_ref.dtype)


# ----------------------------- wrapper -----------------------------

def resnext_bottleneck_forward(x_nchw, fp, *, stride=1):
    """Matches ResNeXtBottleneck.forward (eval-mode BN).  fp = prepare_params(...)"""
    assert stride == 1, "TODO(synk): stride>1 not supported by the fused kernel"
    N, Cin, H, W = x_nchw.shape
    D = fp['wc'].shape[-1]
    Cout = fp['we'].shape[-1]
    has_down = fp['w1'].shape[-1] == D + Cout
    if not has_down:
        assert Cin == Cout, "identity shortcut requires inplanes == planes*4"

    # NCHW -> NHWC in bf16 (half the boundary-transpose HBM traffic).
    x = jnp.transpose(x_nchw.astype(jnp.bfloat16), (0, 2, 3, 1))

    out = pl.pallas_call(
        _bottleneck_kernel,
        out_shape=jax.ShapeDtypeStruct((N, H, W, Cout), jnp.float32),
        grid=(N,),
        in_specs=[
            pl.BlockSpec((1, H, W, Cin), lambda b: (b, 0, 0, 0)),   # one image / step
            pl.BlockSpec(fp['w1'].shape, lambda b: (0, 0)),         # reduce [+down] weight
            pl.BlockSpec(fp['t1'].shape, lambda b: (0, 0)),
            pl.BlockSpec(fp['wc'].shape, lambda b: (0, 0, 0)),      # 9 x (D, D) taps
            pl.BlockSpec(fp['tc'].shape, lambda b: (0, 0)),
            pl.BlockSpec(fp['we'].shape, lambda b: (0, 0)),
            pl.BlockSpec(fp['te'].shape, lambda b: (0, 0)),
        ],
        out_specs=pl.BlockSpec((1, H, W, Cout), lambda b: (b, 0, 0, 0)),
        scratch_shapes=[
            pltpu.VMEM((H + 2, W + 16, D), jnp.float32),   # zero-padded h slab
            pltpu.VMEM((H * W, D), jnp.float32),           # 3x3 f32 accumulator
        ],
        compiler_params=pltpu.CompilerParams(dimension_semantics=("parallel",)),
    )(x, fp['w1'], fp['t1'], fp['wc'], fp['tc'], fp['we'], fp['te'])

    return jnp.transpose(out, (0, 3, 1, 2))                         # NHWC -> NCHW


# ----------------------------- parameters -----------------------------

def _fold_bn(gamma, beta, mean, var, eps=1e-5):
    scale = gamma / jnp.sqrt(var + eps)
    return scale, beta - mean * scale


def init_params(key, inplanes, planes, cardinality, base_width, downsample=False):
    """Raw (PyTorch-equivalent) parameters; 1x1 convs as (Cin,Cout) matrices, 3x3 as HWIO."""
    dim = int(math.floor(planes * (base_width / 64.0)))
    D = dim * cardinality
    Cout = planes * 4
    keys = iter(jax.random.split(key, 32))

    def conv_w(shape, fan_in):
        return jax.random.normal(next(keys), shape, jnp.float32) * math.sqrt(2.0 / fan_in)

    def bn(c):
        return dict(gamma=1.0 + 0.1 * jax.random.normal(next(keys), (c,), jnp.float32),
                    beta=0.1 * jax.random.normal(next(keys), (c,), jnp.float32),
                    mean=0.1 * jax.random.normal(next(keys), (c,), jnp.float32),
                    var=jnp.abs(1.0 + 0.1 * jax.random.normal(next(keys), (c,), jnp.float32)))

    p = {}
    p['w_reduce'] = conv_w((inplanes, D), inplanes)            # 1x1: (Cin, D)
    p['bn_reduce'] = bn(D)

    w3 = jnp.zeros((3, 3, D, D), jnp.float32)                  # grouped 3x3, block-diagonal HWIO
    for g in range(cardinality):
        sl = slice(g * dim, (g + 1) * dim)
        w3 = w3.at[:, :, sl, sl].set(conv_w((3, 3, dim, dim), 9 * dim))
    p['w_conv'] = w3
    p['bn_conv'] = bn(D)

    p['w_expand'] = conv_w((D, Cout), D)                       # 1x1: (D, Cout)
    p['bn_expand'] = bn(Cout)

    if downsample:
        p['down_w'] = conv_w((inplanes, Cout), inplanes)       # 1x1: (Cin, Cout)
        p['down_bn'] = bn(Cout)
    return p


def prepare_params(p):
    """Fold BN scales into bf16 weight columns; build the fused-kernel operands."""
    D = p['w_conv'].shape[-1]
    sr, tr = _fold_bn(**p['bn_reduce'])
    sc, tc = _fold_bn(**p['bn_conv'])
    se, te = _fold_bn(**p['bn_expand'])

    w1 = p['w_reduce'] * sr[None, :]
    t1 = tr
    if 'down_w' in p:                                         # fuse projection shortcut
        sd, td = _fold_bn(**p['down_bn'])
        w1 = jnp.concatenate([w1, p['down_w'] * sd[None, :]], axis=1)
        t1 = jnp.concatenate([t1, td])

    return dict(
        w1=w1.astype(jnp.bfloat16),
        t1=t1.reshape(1, -1).astype(jnp.float32),
        wc=(p['w_conv'] * sc[None, None, None, :]).reshape(9, D, D).astype(jnp.bfloat16),
        tc=tc.reshape(1, -1).astype(jnp.float32),
        we=(p['w_expand'] * se[None, :]).astype(jnp.bfloat16),
        te=te.reshape(1, -1).astype(jnp.float32),
    )


# ----------------------------- pure-JAX reference -----------------------------

def reference_forward(x_nchw, fp):
    """XLA reference with the same dtype roundings as the kernel."""
    D = fp['wc'].shape[-1]
    Cout = fp['we'].shape[-1]
    has_down = fp['w1'].shape[-1] == D + Cout
    x = jnp.transpose(x_nchw.astype(jnp.bfloat16), (0, 2, 3, 1)).astype(jnp.float32)
    N, H, W, Cin = x.shape
    xm = x.reshape(-1, Cin)

    a = xm @ fp['w1'].astype(jnp.float32) + fp['t1']
    h = jnp.maximum(a[:, :D], 0.0)
    residual = a[:, D:] if has_down else xm

    hp = jnp.pad(h.reshape(N, H, W, D), ((0, 0), (1, 1), (1, 1), (0, 0)))
    acc = jnp.zeros((N * H * W, D), jnp.float32)
    wc = fp['wc'].astype(jnp.float32)
    for kh in range(3):
        for kw in range(3):
            win = hp[:, kh:kh + H, kw:kw + W, :].reshape(-1, D)
            acc = acc + win.astype(jnp.bfloat16).astype(jnp.float32) @ wc[3 * kh + kw]
    bt = jnp.maximum(acc + fp['tc'], 0.0).astype(jnp.bfloat16).astype(jnp.float32)

    c = bt @ fp['we'].astype(jnp.float32) + fp['te']
    y = jnp.maximum(c + residual, 0.0)
    return jnp.transpose(y.reshape(N, H, W, Cout), (0, 3, 1, 2))


# ----------------------------- main -----------------------------

if __name__ == "__main__":
    key = jax.random.PRNGKey(0)
    k_p1, k_p2, k_x1, k_x2 = jax.random.split(key, 4)

    planes, cardinality, base_width = 32, 4, 64          # dim*cardinality = 128, Cout = 128

    # Case 1: identity shortcut (inplanes == planes*4 == 128, downsample=None, stride=1).
    inplanes = 128
    params = init_params(k_p1, inplanes, planes, cardinality, base_width, downsample=False)
    fp = prepare_params(params)
    x = jax.random.normal(k_x1, (2, inplanes, 16, 16), dtype=jnp.float32)
    out = jax.block_until_ready(resnext_bottleneck_forward(x, fp))
    ref = reference_forward(x, fp)
    assert out.shape == (2, planes * 4, 16, 16) and out.dtype == jnp.float32
    assert bool(jnp.all(out >= 0.0)) and bool(jnp.all(jnp.isfinite(out)))
    assert bool(jnp.allclose(out, ref, atol=5e-2, rtol=5e-2))

    # Case 2: projection shortcut (inplanes=64 != planes*4) fused into the first matmul.
    inplanes2 = 64
    params2 = init_params(k_p2, inplanes2, planes, cardinality, base_width, downsample=True)
    fp2 = prepare_params(params2)
    x2 = jax.random.normal(k_x2, (2, inplanes2, 16, 16), dtype=jnp.float32)
    out2 = jax.block_until_ready(resnext_bottleneck_forward(x2, fp2))
    ref2 = reference_forward(x2, fp2)
    assert out2.shape == (2, planes * 4, 16, 16)
    assert bool(jnp.all(out2 >= 0.0)) and bool(jnp.all(jnp.isfinite(out2)))
    assert bool(jnp.allclose(out2, ref2, atol=5e-2, rtol=5e-2))

    print("KERNEL_OK")
</pallas_src>

<mosaic_0001>
module attributes {stable_mosaic.version = 11 : i64} {
  func.func @_bottleneck_kernel(%arg0: i32, %arg1: memref<1x16x16x128xbf16, #tpu.memory_space<vmem>>, %arg2: memref<128x128xbf16, #tpu.memory_space<vmem>>, %arg3: memref<1x128xf32, #tpu.memory_space<vmem>>, %arg4: memref<9x128x128xbf16, #tpu.memory_space<vmem>>, %arg5: memref<1x128xf32, #tpu.memory_space<vmem>>, %arg6: memref<128x128xbf16, #tpu.memory_space<vmem>>, %arg7: memref<1x128xf32, #tpu.memory_space<vmem>>, %arg8: memref<1x16x16x128xf32, #tpu.memory_space<vmem>>, %arg9: memref<18x32x128xf32, #tpu.memory_space<vmem>>, %arg10: memref<256x128xf32, #tpu.memory_space<vmem>>) attributes {dimension_semantics = [#tpu.dimension_semantics<parallel>], iteration_bounds = array<i64: 2>, scalar_prefetch = 0 : i64, scratch_operands = 2 : i64, tpu.core_type = #tpu.core_type<tc>, window_params = [{transform_indices = @transform_0, window_bounds = array<i64: 1, 16, 16, 128>}, {pipeline_mode = #tpu.pipeline_mode<synchronous>, transform_indices = @transform_1, window_bounds = array<i64: 128, 128>}, {pipeline_mode = #tpu.pipeline_mode<synchronous>, transform_indices = @transform_2, window_bounds = array<i64: 1, 128>}, {pipeline_mode = #tpu.pipeline_mode<synchronous>, transform_indices = @transform_3, window_bounds = array<i64: 9, 128, 128>}, {pipeline_mode = #tpu.pipeline_mode<synchronous>, transform_indices = @transform_4, window_bounds = array<i64: 1, 128>}, {pipeline_mode = #tpu.pipeline_mode<synchronous>, transform_indices = @transform_5, window_bounds = array<i64: 128, 128>}, {pipeline_mode = #tpu.pipeline_mode<synchronous>, transform_indices = @transform_6, window_bounds = array<i64: 1, 128>}, {transform_indices = @transform_7, window_bounds = array<i64: 1, 16, 16, 128>}]} {
    %c0 = arith.constant 0 : index
    %c0_0 = arith.constant 0 : index
    %c0_1 = arith.constant 0 : index
    %c0_2 = arith.constant 0 : index
    %0 = vector.load %arg1[%c0, %c0_0, %c0_1, %c0_2] : memref<1x16x16x128xbf16, #tpu.memory_space<vmem>>, vector<1x16x16x128xbf16>
    %1 = vector.shape_cast %0 : vector<1x16x16x128xbf16> to vector<256x128xbf16>
    %c0_3 = arith.constant 0 : index
    %c0_4 = arith.constant 0 : index
    %2 = vector.load %arg2[%c0_3, %c0_4] : memref<128x128xbf16, #tpu.memory_space<vmem>>, vector<128x128xbf16>
    %cst = arith.constant dense<0.000000e+00> : vector<256x128xf32>
    %3 = tpu.matmul %1, %2, %cst {dimension_numbers = #tpu.dot_dimension_numbers<[1], [0], [0], [1], [0, 0, 1, 1], [], []>} : vector<256x128xbf16>, vector<128x128xbf16>, vector<256x128xf32> -> vector<256x128xf32>
    %c0_5 = arith.constant 0 : index
    %c0_6 = arith.constant 0 : index
    %4 = vector.load %arg3[%c0_5, %c0_6] : memref<1x128xf32, #tpu.memory_space<vmem>>, vector<1x128xf32>
    %5 = vector.broadcast %4 : vector<1x128xf32> to vector<256x128xf32>
    %6 = arith.addf %3, %5 : vector<256x128xf32>
    %cst_7 = arith.constant 0.000000e+00 : f32
    %7 = vector.broadcast %cst_7 : f32 to vector<256x128xf32>
    %8 = arith.maximumf %6, %7 : vector<256x128xf32>
    %9 = arith.extf %1 : vector<256x128xbf16> to vector<256x128xf32>
    %cst_8 = arith.constant 0.000000e+00 : f32
    %10 = vector.broadcast %cst_8 : f32 to vector<18x32x128xf32>
    %c0_9 = arith.constant 0 : index
    %c0_10 = arith.constant 0 : index
    %c0_11 = arith.constant 0 : index
    %11 = vector.load %arg9[%c0_9, %c0_10, %c0_11] : memref<18x32x128xf32, #tpu.memory_space<vmem>>, vector<18x32x128xf32>
    tpu.vector_store %arg9[%c0_9, %c0_10, %c0_11], %10 {strides = array<i32>} : memref<18x32x128xf32, #tpu.memory_space<vmem>>, vector<18x32x128xf32>,
    %12 = vector.shape_cast %8 : vector<256x128xf32> to vector<16x16x128xf32>
    %c1 = arith.constant 1 : index
    %c8 = arith.constant 8 : index
    %c0_12 = arith.constant 0 : index
    %13 = vector.load %arg9[%c1, %c8, %c0_12] : memref<18x32x128xf32, #tpu.memory_space<vmem>>, vector<16x16x128xf32>
    tpu.vector_store %arg9[%c1, %c8, %c0_12], %12 {strides = array<i32>} : memref<18x32x128xf32, #tpu.memory_space<vmem>>, vector<16x16x128xf32>,
    %cst_13 = arith.constant 0.000000e+00 : f32
    %14 = vector.broadcast %cst_13 : f32 to vector<256x128xf32>
    %c0_14 = arith.constant 0 : index
    %c0_15 = arith.constant 0 : index
    %15 = vector.load %arg10[%c0_14, %c0_15] : memref<256x128xf32, #tpu.memory_space<vmem>>, vector<256x128xf32>
    tpu.vector_store %arg10[%c0_14, %c0_15], %14 {strides = array<i32>} : memref<256x128xf32, #tpu.memory_space<vmem>>, vector<256x128xf32>,
    %c0_16 = arith.constant 0 : index
    %c7 = arith.constant 7 : index
    %c0_17 = arith.constant 0 : index
    %16 = vector.load %arg9[%c0_16, %c7, %c0_17] : memref<18x32x128xf32, #tpu.memory_space<vmem>>, vector<16x16x128xf32>
    %17 = vector.shape_cast %16 : vector<16x16x128xf32> to vector<256x128xf32>
    %18 = arith.truncf %17 : vector<256x128xf32> to vector<256x128xbf16>
    %c0_18 = arith.constant 0 : index
    %c0_19 = arith.constant 0 : index
    %19 = vector.load %arg10[%c0_18, %c0_19] : memref<256x128xf32, #tpu.memory_space<vmem>>, vector<256x128xf32>
    %c0_20 = arith.constant 0 : index
    %c0_21 = arith.constant 0 : index
    %c0_22 = arith.constant 0 : index
    %20 = vector.load %arg4[%c0_20, %c0_21, %c0_22] : memref<9x128x128xbf16, #tpu.memory_space<vmem>>, vector<1x128x128xbf16>
    %21 = vector.shape_cast %20 : vector<1x128x128xbf16> to vector<128x128xbf16>
    %cst_23 = arith.constant dense<0.000000e+00> : vector<256x128xf32>
    %22 = tpu.matmul %18, %21, %cst_23 {dimension_numbers = #tpu.dot_dimension_numbers<[1], [0], [0], [1], [0, 0, 1, 1], [], []>} : vector<256x128xbf16>, vector<128x128xbf16>, vector<256x128xf32> -> vector<256x128xf32>
    %23 = arith.addf %19, %22 : vector<256x128xf32>
    %c0_24 = arith.constant 0 : index
    %c0_25 = arith.constant 0 : index
    %24 = vector.load %arg10[%c0_24, %c0_25] : memref<256x128xf32, #tpu.memory_space<vmem>>, vector<256x128xf32>
    tpu.vector_store %arg10[%c0_24, %c0_25], %23 {strides = array<i32>} : memref<256x128xf32, #tpu.memory_space<vmem>>, vector<256x128xf32>,
    %c0_26 = arith.constant 0 : index
    %c8_27 = arith.constant 8 : index
    %c0_28 = arith.constant 0 : index
    %25 = vector.load %arg9[%c0_26, %c8_27, %c0_28] : memref<18x32x128xf32, #tpu.memory_space<vmem>>, vector<16x16x128xf32>
    %26 = vector.shape_cast %25 : vector<16x16x128xf32> to vector<256x128xf32>
    %27 = arith.truncf %26 : vector<256x128xf32> to vector<256x128xbf16>
    %c0_29 = arith.constant 0 : index
    %c0_30 = arith.constant 0 : index
    %28 = vector.load %arg10[%c0_29, %c0_30] : memref<256x128xf32, #tpu.memory_space<vmem>>, vector<256x128xf32>
    %c1_31 = arith.constant 1 : index
    %c0_32 = arith.constant 0 : index
    %c0_33 = arith.constant 0 : index
    %29 = vector.load %arg4[%c1_31, %c0_32, %c0_33] : memref<9x128x128xbf16, #tpu.memory_space<vmem>>, vector<1x128x128xbf16>
    %30 = vector.shape_cast %29 : vector<1x128x128xbf16> to vector<128x128xbf16>
    %cst_34 = arith.constant dense<0.000000e+00> : vector<256x128xf32>
    %31 = tpu.matmul %27, %30, %cst_34 {dimension_numbers = #tpu.dot_dimension_numbers<[1], [0], [0], [1], [0, 0, 1, 1], [], []>} : vector<256x128xbf16>, vector<128x128xbf16>, vector<256x128xf32> -> vector<256x128xf32>
    %32 = arith.addf %28, %31 : vector<256x128xf32>
    %c0_35 = arith.constant 0 : index
    %c0_36 = arith.constant 0 : index
    %33 = vector.load %arg10[%c0_35, %c0_36] : memref<256x128xf32, #tpu.memory_space<vmem>>, vector<256x128xf32>
    tpu.vector_store %arg10[%c0_35, %c0_36], %32 {strides = array<i32>} : memref<256x128xf32, #tpu.memory_space<vmem>>, vector<256x128xf32>,
    %c0_37 = arith.constant 0 : index
    %c9 = arith.constant 9 : index
    %c0_38 = arith.constant 0 : index
    %34 = vector.load %arg9[%c0_37, %c9, %c0_38] : memref<18x32x128xf32, #tpu.memory_space<vmem>>, vector<16x16x128xf32>
    %35 = vector.shape_cast %34 : vector<16x16x128xf32> to vector<256x128xf32>
    %36 = arith.truncf %35 : vector<256x128xf32> to vector<256x128xbf16>
    %c0_39 = arith.constant 0 : index
    %c0_40 = arith.constant 0 : index
    %37 = vector.load %arg10[%c0_39, %c0_40] : memref<256x128xf32, #tpu.memory_space<vmem>>, vector<256x128xf32>
    %c2 = arith.constant 2 : index
    %c0_41 = arith.constant 0 : index
    %c0_42 = arith.constant 0 : index
    %38 = vector.load %arg4[%c2, %c0_41, %c0_42] : memref<9x128x128xbf16, #tpu.memory_space<vmem>>, vector<1x128x128xbf16>
    %39 = vector.shape_cast %38 : vector<1x128x128xbf16> to vector<128x128xbf16>
    %cst_43 = arith.constant dense<0.000000e+00> : vector<256x128xf32>
    %40 = tpu.matmul %36, %39, %cst_43 {dimension_numbers = #tpu.dot_dimension_numbers<[1], [0], [0], [1], [0, 0, 1, 1], [], []>} : vector<256x128xbf16>, vector<128x128xbf16>, vector<256x128xf32> -> vector<256x128xf32>
    %41 = arith.addf %37, %40 : vector<256x128xf32>
    %c0_44 = arith.constant 0 : index
    %c0_45 = arith.constant 0 : index
    %42 = vector.load %arg10[%c0_44, %c0_45] : memref<256x128xf32, #tpu.memory_space<vmem>>, vector<256x128xf32>
    tpu.vector_store %arg10[%c0_44, %c0_45], %41 {strides = array<i32>} : memref<256x128xf32, #tpu.memory_space<vmem>>, vector<256x128xf32>,
    %c1_46 = arith.constant 1 : index
    %c7_47 = arith.constant 7 : index
    %c0_48 = arith.constant 0 : index
    %43 = vector.load %arg9[%c1_46, %c7_47, %c0_48] : memref<18x32x128xf32, #tpu.memory_space<vmem>>, vector<16x16x128xf32>
    %44 = vector.shape_cast %43 : vector<16x16x128xf32> to vector<256x128xf32>
    %45 = arith.truncf %44 : vector<256x128xf32> to vector<256x128xbf16>
    %c0_49 = arith.constant 0 : index
    %c0_50 = arith.constant 0 : index
    %46 = vector.load %arg10[%c0_49, %c0_50] : memref<256x128xf32, #tpu.memory_space<vmem>>, vector<256x128xf32>
    %c3 = arith.constant 3 : index
    %c0_51 = arith.constant 0 : index
    %c0_52 = arith.constant 0 : index
    %47 = vector.load %arg4[%c3, %c0_51, %c0_52] : memref<9x128x128xbf16, #tpu.memory_space<vmem>>, vector<1x128x128xbf16>
    %48 = vector.shape_cast %47 : vector<1x128x128xbf16> to vector<128x128xbf16>
    %cst_53 = arith.constant dense<0.000000e+00> : vector<256x128xf32>
    %49 = tpu.matmul %45, %48, %cst_53 {dimension_numbers = #tpu.dot_dimension_numbers<[1], [0], [0], [1], [0, 0, 1, 1], [], []>} : vector<256x128xbf16>, vector<128x128xbf16>, vector<256x128xf32> -> vector<256x128xf32>
    %50 = arith.addf %46, %49 : vector<256x128xf32>
    %c0_54 = arith.constant 0 : index
    %c0_55 = arith.constant 0 : index
    %51 = vector.load %arg10[%c0_54, %c0_55] : memref<256x128xf32, #tpu.memory_space<vmem>>, vector<256x128xf32>
    tpu.vector_store %arg10[%c0_54, %c0_55], %50 {strides = array<i32>} : memref<256x128xf32, #tpu.memory_space<vmem>>, vector<256x128xf32>,
    %c1_56 = arith.constant 1 : index
    %c8_57 = arith.constant 8 : index
    %c0_58 = arith.constant 0 : index
    %52 = vector.load %arg9[%c1_56, %c8_57, %c0_58] : memref<18x32x128xf32, #tpu.memory_space<vmem>>, vector<16x16x128xf32>
    %53 = vector.shape_cast %52 : vector<16x16x128xf32> to vector<256x128xf32>
    %54 = arith.truncf %53 : vector<256x128xf32> to vector<256x128xbf16>
    %c0_59 = arith.constant 0 : index
    %c0_60 = arith.constant 0 : index
    %55 = vector.load %arg10[%c0_59, %c0_60] : memref<256x128xf32, #tpu.memory_space<vmem>>, vector<256x128xf32>
    %c4 = arith.constant 4 : index
    %c0_61 = arith.constant 0 : index
    %c0_62 = arith.constant 0 : index
    %56 = vector.load %arg4[%c4, %c0_61, %c0_62] : memref<9x128x128xbf16, #tpu.memory_space<vmem>>, vector<1x128x128xbf16>
    %57 = vector.shape_cast %56 : vector<1x128x128xbf16> to vector<128x128xbf16>
    %cst_63 = arith.constant dense<0.000000e+00> : vector<256x128xf32>
    %58 = tpu.matmul %54, %57, %cst_63 {dimension_numbers = #tpu.dot_dimension_numbers<[1], [0], [0], [1], [0, 0, 1, 1], [], []>} : vector<256x128xbf16>, vector<128x128xbf16>, vector<256x128xf32> -> vector<256x128xf32>
    %59 = arith.addf %55, %58 : vector<256x128xf32>
    %c0_64 = arith.constant 0 : index
    %c0_65 = arith.constant 0 : index
    %60 = vector.load %arg10[%c0_64, %c0_65] : memref<256x128xf32, #tpu.memory_space<vmem>>, vector<256x128xf32>
    tpu.vector_store %arg10[%c0_64, %c0_65], %59 {strides = array<i32>} : memref<256x128xf32, #tpu.memory_space<vmem>>, vector<256x128xf32>,
    %c1_66 = arith.constant 1 : index
    %c9_67 = arith.constant 9 : index
    %c0_68 = arith.constant 0 : index
    %61 = vector.load %arg9[%c1_66, %c9_67, %c0_68] : memref<18x32x128xf32, #tpu.memory_space<vmem>>, vector<16x16x128xf32>
    %62 = vector.shape_cast %61 : vector<16x16x128xf32> to vector<256x128xf32>
    %63 = arith.truncf %62 : vector<256x128xf32> to vector<256x128xbf16>
    %c0_69 = arith.constant 0 : index
    %c0_70 = arith.constant 0 : index
    %64 = vector.load %arg10[%c0_69, %c0_70] : memref<256x128xf32, #tpu.memory_space<vmem>>, vector<256x128xf32>
    %c5 = arith.constant 5 : index
    %c0_71 = arith.constant 0 : index
    %c0_72 = arith.constant 0 : index
    %65 = vector.load %arg4[%c5, %c0_71, %c0_72] : memref<9x128x128xbf16, #tpu.memory_space<vmem>>, vector<1x128x128xbf16>
    %66 = vector.shape_cast %65 : vector<1x128x128xbf16> to vector<128x128xbf16>
    %cst_73 = arith.constant dense<0.000000e+00> : vector<256x128xf32>
    %67 = tpu.matmul %63, %66, %cst_73 {dimension_numbers = #tpu.dot_dimension_numbers<[1], [0], [0], [1], [0, 0, 1, 1], [], []>} : vector<256x128xbf16>, vector<128x128xbf16>, vector<256x128xf32> -> vector<256x128xf32>
    %68 = arith.addf %64, %67 : vector<256x128xf32>
    %c0_74 = arith.constant 0 : index
    %c0_75 = arith.constant 0 : index
    %69 = vector.load %arg10[%c0_74, %c0_75] : memref<256x128xf32, #tpu.memory_space<vmem>>, vector<256x128xf32>
    tpu.vector_store %arg10[%c0_74, %c0_75], %68 {strides = array<i32>} : memref<256x128xf32, #tpu.memory_space<vmem>>, vector<256x128xf32>,
    %c2_76 = arith.constant 2 : index
    %c7_77 = arith.constant 7 : index
    %c0_78 = arith.constant 0 : index
    %70 = vector.load %arg9[%c2_76, %c7_77, %c0_78] : memref<18x32x128xf32, #tpu.memory_space<vmem>>, vector<16x16x128xf32>
    %71 = vector.shape_cast %70 : vector<16x16x128xf32> to vector<256x128xf32>
    %72 = arith.truncf %71 : vector<256x128xf32> to vector<256x128xbf16>
    %c0_79 = arith.constant 0 : index
    %c0_80 = arith.constant 0 : index
    %73 = vector.load %arg10[%c0_79, %c0_80] : memref<256x128xf32, #tpu.memory_space<vmem>>, vector<256x128xf32>
    %c6 = arith.constant 6 : index
    %c0_81 = arith.constant 0 : index
    %c0_82 = arith.constant 0 : index
    %74 = vector.load %arg4[%c6, %c0_81, %c0_82] : memref<9x128x128xbf16, #tpu.memory_space<vmem>>, vector<1x128x128xbf16>
    %75 = vector.shape_cast %74 : vector<1x128x128xbf16> to vector<128x128xbf16>
    %cst_83 = arith.constant dense<0.000000e+00> : vector<256x128xf32>
    %76 = tpu.matmul %72, %75, %cst_83 {dimension_numbers = #tpu.dot_dimension_numbers<[1], [0], [0], [1], [0, 0, 1, 1], [], []>} : vector<256x128xbf16>, vector<128x128xbf16>, vector<256x128xf32> -> vector<256x128xf32>
    %77 = arith.addf %73, %76 : vector<256x128xf32>
    %c0_84 = arith.constant 0 : index
    %c0_85 = arith.constant 0 : index
    %78 = vector.load %arg10[%c0_84, %c0_85] : memref<256x128xf32, #tpu.memory_space<vmem>>, vector<256x128xf32>
    tpu.vector_store %arg10[%c0_84, %c0_85], %77 {strides = array<i32>} : memref<256x128xf32, #tpu.memory_space<vmem>>, vector<256x128xf32>,
    %c2_86 = arith.constant 2 : index
    %c8_87 = arith.constant 8 : index
    %c0_88 = arith.constant 0 : index
    %79 = vector.load %arg9[%c2_86, %c8_87, %c0_88] : memref<18x32x128xf32, #tpu.memory_space<vmem>>, vector<16x16x128xf32>
    %80 = vector.shape_cast %79 : vector<16x16x128xf32> to vector<256x128xf32>
    %81 = arith.truncf %80 : vector<256x128xf32> to vector<256x128xbf16>
    %c0_89 = arith.constant 0 : index
    %c0_90 = arith.constant 0 : index
    %82 = vector.load %arg10[%c0_89, %c0_90] : memref<256x128xf32, #tpu.memory_space<vmem>>, vector<256x128xf32>
    %c7_91 = arith.constant 7 : index
    %c0_92 = arith.constant 0 : index
    %c0_93 = arith.constant 0 : index
    %83 = vector.load %arg4[%c7_91, %c0_92, %c0_93] : memref<9x128x128xbf16, #tpu.memory_space<vmem>>, vector<1x128x128xbf16>
    %84 = vector.shape_cast %83 : vector<1x128x128xbf16> to vector<128x128xbf16>
    %cst_94 = arith.constant dense<0.000000e+00> : vector<256x128xf32>
    %85 = tpu.matmul %81, %84, %cst_94 {dimension_numbers = #tpu.dot_dimension_numbers<[1], [0], [0], [1], [0, 0, 1, 1], [], []>} : vector<256x128xbf16>, vector<128x128xbf16>, vector<256x128xf32> -> vector<256x128xf32>
    %86 = arith.addf %82, %85 : vector<256x128xf32>
    %c0_95 = arith.constant 0 : index
    %c0_96 = arith.constant 0 : index
    %87 = vector.load %arg10[%c0_95, %c0_96] : memref<256x128xf32, #tpu.memory_space<vmem>>, vector<256x128xf32>
    tpu.vector_store %arg10[%c0_95, %c0_96], %86 {strides = array<i32>} : memref<256x128xf32, #tpu.memory_space<vmem>>, vector<256x128xf32>,
    %c2_97 = arith.constant 2 : index
    %c9_98 = arith.constant 9 : index
    %c0_99 = arith.constant 0 : index
    %88 = vector.load %arg9[%c2_97, %c9_98, %c0_99] : memref<18x32x128xf32, #tpu.memory_space<vmem>>, vector<16x16x128xf32>
    %89 = vector.shape_cast %88 : vector<16x16x128xf32> to vector<256x128xf32>
    %90 = arith.truncf %89 : vector<256x128xf32> to vector<256x128xbf16>
    %c0_100 = arith.constant 0 : index
    %c0_101 = arith.constant 0 : index
    %91 = vector.load %arg10[%c0_100, %c0_101] : memref<256x128xf32, #tpu.memory_space<vmem>>, vector<256x128xf32>
    %c8_102 = arith.constant 8 : index
    %c0_103 = arith.constant 0 : index
    %c0_104 = arith.constant 0 : index
    %92 = vector.load %arg4[%c8_102, %c0_103, %c0_104] : memref<9x128x128xbf16, #tpu.memory_space<vmem>>, vector<1x128x128xbf16>
    %93 = vector.shape_cast %92 : vector<1x128x128xbf16> to vector<128x128xbf16>
    %cst_105 = arith.constant dense<0.000000e+00> : vector<256x128xf32>
    %94 = tpu.matmul %90, %93, %cst_105 {dimension_numbers = #tpu.dot_dimension_numbers<[1], [0], [0], [1], [0, 0, 1, 1], [], []>} : vector<256x128xbf16>, vector<128x128xbf16>, vector<256x128xf32> -> vector<256x128xf32>
    %95 = arith.addf %91, %94 : vector<256x128xf32>
    %c0_106 = arith.constant 0 : index
    %c0_107 = arith.constant 0 : index
    %96 = vector.load %arg10[%c0_106, %c0_107] : memref<256x128xf32, #tpu.memory_space<vmem>>, vector<256x128xf32>
    tpu.vector_store %arg10[%c0_106, %c0_107], %95 {strides = array<i32>} : memref<256x128xf32, #tpu.memory_space<vmem>>, vector<256x128xf32>,
    %c0_108 = arith.constant 0 : index
    %c0_109 = arith.constant 0 : index
    %97 = vector.load %arg10[%c0_108, %c0_109] : memref<256x128xf32, #tpu.memory_space<vmem>>, vector<256x128xf32>
    %c0_110 = arith.constant 0 : index
    %c0_111 = arith.constant 0 : index
    %98 = vector.load %arg5[%c0_110, %c0_111] : memref<1x128xf32, #tpu.memory_space<vmem>>, vector<1x128xf32>
    %99 = vector.broadcast %98 : vector<1x128xf32> to vector<256x128xf32>
    %100 = arith.addf %97, %99 : vector<256x128xf32>
    %cst_112 = arith.constant 0.000000e+00 : f32
    %101 = vector.broadcast %cst_112 : f32 to vector<256x128xf32>
    %102 = arith.maximumf %100, %101 : vector<256x128xf32>
    %103 = arith.truncf %102 : vector<256x128xf32> to vector<256x128xbf16>
    %c0_113 = arith.constant 0 : index
    %c0_114 = arith.constant 0 : index
    %104 = vector.load %arg6[%c0_113, %c0_114] : memref<128x128xbf16, #tpu.memory_space<vmem>>, vector<128x128xbf16>
    %cst_115 = arith.constant dense<0.000000e+00> : vector<256x128xf32>
    %105 = tpu.matmul %103, %104, %cst_115 {dimension_numbers = #tpu.dot_dimension_numbers<[1], [0], [0], [1], [0, 0, 1, 1], [], []>} : vector<256x128xbf16>, vector<128x128xbf16>, vector<256x128xf32> -> vector<256x128xf32>
    %c0_116 = arith.constant 0 : index
    %c0_117 = arith.constant 0 : index
    %106 = vector.load %arg7[%c0_116, %c0_117] : memref<1x128xf32, #tpu.memory_space<vmem>>, vector<1x128xf32>
    %107 = vector.broadcast %106 : vector<1x128xf32> to vector<256x128xf32>
    %108 = arith.addf %105, %107 : vector<256x128xf32>
    %109 = arith.addf %108, %9 : vector<256x128xf32>
    %cst_118 = arith.constant 0.000000e+00 : f32
    %110 = vector.broadcast %cst_118 : f32 to vector<256x128xf32>
    %111 = arith.maximumf %109, %110 : vector<256x128xf32>
    %112 = vector.shape_cast %111 : vector<256x128xf32> to vector<1x16x16x128xf32>
    %c0_119 = arith.constant 0 : index
    %c0_120 = arith.constant 0 : index
    %c0_121 = arith.constant 0 : index
    %c0_122 = arith.constant 0 : index
    %113 = vector.load %arg8[%c0_119, %c0_120, %c0_121, %c0_122] : memref<1x16x16x128xf32, #tpu.memory_space<vmem>>, vector<1x16x16x128xf32>
    tpu.vector_store %arg8[%c0_119, %c0_120, %c0_121, %c0_122], %112 {strides = array<i32>} : memref<1x16x16x128xf32, #tpu.memory_space<vmem>>, vector<1x16x16x128xf32>,
    return
  }
  func.func @transform_0(%arg0: i32) -> (i32, i32, i32, i32) {
    %c0_i32 = arith.constant 0 : i32
    %c0_i32_0 = arith.constant 0 : i32
    %c0_i32_1 = arith.constant 0 : i32
    %c0_i32_2 = arith.constant 0 : i32
    return %arg0, %c0_i32, %c0_i32_0, %c0_i32_1 : i32, i32, i32, i32
  }
  func.func @transform_1(%arg0: i32) -> (i32, i32) {
    %c0_i32 = arith.constant 0 : i32
    %c0_i32_0 = arith.constant 0 : i32
    %c0_i32_1 = arith.constant 0 : i32
    return %c0_i32, %c0_i32_0 : i32, i32
  }
  func.func @transform_2(%arg0: i32) -> (i32, i32) {
    %c0_i32 = arith.constant 0 : i32
    %c0_i32_0 = arith.constant 0 : i32
    %c0_i32_1 = arith.constant 0 : i32
    return %c0_i32, %c0_i32_0 : i32, i32
  }
  func.func @transform_3(%arg0: i32) -> (i32, i32, i32) {
    %c0_i32 = arith.constant 0 : i32
    %c0_i32_0 = arith.constant 0 : i32
    %c0_i32_1 = arith.constant 0 : i32
    %c0_i32_2 = arith.constant 0 : i32
    return %c0_i32, %c0_i32_0, %c0_i32_1 : i32, i32, i32
  }
  func.func @transform_4(%arg0: i32) -> (i32, i32) {
    %c0_i32 = arith.constant 0 : i32
    %c0_i32_0 = arith.constant 0 : i32
    %c0_i32_1 = arith.constant 0 : i32
    return %c0_i32, %c0_i32_0 : i32, i32
  }
  func.func @transform_5(%arg0: i32) -> (i32, i32) {
    %c0_i32 = arith.constant 0 : i32
    %c0_i32_0 = arith.constant 0 : i32
    %c0_i32_1 = arith.constant 0 : i32
    return %c0_i32, %c0_i32_0 : i32, i32
  }
  func.func @transform_6(%arg0: i32) -> (i32, i32) {
    %c0_i32 = arith.constant 0 : i32
    %c0_i32_0 = arith.constant 0 : i32
    %c0_i32_1 = arith.constant 0 : i32
    return %c0_i32, %c0_i32_0 : i32, i32
  }
  func.func @transform_7(%arg0: i32) -> (i32, i32, i32, i32) {
    %c0_i32 = arith.constant 0 : i32
    %c0_i32_0 = arith.constant 0 : i32
    %c0_i32_1 = arith.constant 0 : i32
    %c0_i32_2 = arith.constant 0 : i32
    return %arg0, %c0_i32, %c0_i32_0, %c0_i32_1 : i32, i32, i32, i32
  }
}

</mosaic_0001>

<bundles_post_ra>
// kernel: tpu_custom_call.1
= control target key start
LH: loop header
LB: loop body
LE: loop exit
PB: predicated region body
PF: predicated region fallthrough
CT: control target
= control target key end

     0   :  { %s7407_s0 = inlined_call_operand.hbm [shape: bf16[2,16,16,128], index: 0, kind: input, shape index: {}]   ;;  %s7408_s1 = inlined_call_operand.hbm [shape: bf16[128,128], index: 1, kind: input, shape index: {}]   ;;  %s7409_s2 = inlined_call_operand.vmem [shape: f32[1,128], index: 2, kind: input, shape index: {}]   ;;  %s7410_s3 = inlined_call_operand.hbm [shape: bf16[9,128,128], index: 3, kind: input, shape index: {}]   ;;  %s7411_s4 = inlined_call_operand.vmem [shape: f32[1,128], index: 4, kind: input, shape index: {}]   ;;  %s7412_s5 = inlined_call_operand.hbm [shape: bf16[128,128], index: 5, kind: input, shape index: {}]   ;;  %s7413_s6 = inlined_call_operand.vmem [shape: f32[1,128], index: 6, kind: input, shape index: {}]   ;;  %s7414_s7 = inlined_call_operand.hbm [shape: f32[2,16,16,128], index: 7, kind: output, shape index: {}]  }
   0x1   :  { %7421 = sst [smem:[#allocation42_spill]] %s7408_s1 }
   0x2   :  { %12 = vsyncpa [#allocation5], 0 }
   0x3   :  { %14 = vsyncpa [#allocation5 + $0x1], 0 }
   0x4   :  { %15 = vsyncpa [#allocation8], 0 }
   0x5   :  { %16 = vsyncpa [#allocation11], 0 }
   0x6   :  { %17 = vsyncpa [#allocation6], 0 }
   0x7   :  { %19 = vsyncpa [#allocation6 + $0x1], 0  ;;  %s6183_s24 = smov 0   ;;  %s6185_s25 = smov 0  }
   0x8   :  { %s6187_s26 = smov 0   ;;  %s6189_s27 = smov 0  }
   0x9 LB: > { %s6204_s28 = sadd.s32 4294967295, %s6130_s27   ;;  %s4796_s29 = sadd.s32 4294967294, %s6130_s27   ;;  %s6130_s27 = sphi %s6189_s27, %s7495_s27   ;;  %s6126_s26 = sphi %s6187_s26, %s7494_s26   ;;  %s6122_s25 = sphi %s6185_s25, %s7493_s25   ;;  %s6118_s24 = sphi %s6183_s24, %s7492_s24  }
   0xa   : > { %p45_p0 = scmp.ne.s32.totalorder %s6122_s25, %s6118_s24  ;;  %p7415_p1 = scmp.eq.s32.totalorder %s6204_s28, 0 }
   0xb   : > { %p195_p2 = scmp.eq.s32.totalorder %s6204_s28, 1  ;;  %p201_p3 = scmp.eq.s32.totalorder %s4796_s29, 1 }
   0xc   : > { %p6213_p4 = por %p7415_p1, %p45_p0  ;;  %p4797_p5 = scmp.ge.s32.totalorder %s6130_s27, 1 }
   0xd   : > { %p6218_p6 = por %p201_p3, %p45_p0  ;;  %p208_p7 = scmp.lt.s32.totalorder %s6130_s27, 3 }
   0xe   : > { %s7422_s30 = scalar_select %p6213_p4, 1, 0 }
   0xf   : > { %s7423_s8 = scalar_select %p6218_p6, 1, 0 }
  0x10   : > { %p6223_p8 = pnand %p4797_p5, %p208_p7  ;;  %s6132_s10 = smov [#allocation7]  }
  0x11   : > { %s220_s11 = sshll.u32 %s6132_s10, 4  ;;  %s6133_s13 = smov [#allocation9]   ;;  %s221_s11 = int_to_ptr.vmem [resolvable:$true] %s220_s11 }
  0x12   : > { %s7424_s9 = scalar_select %p6223_p8, 1, 0 }
  0x13   : > { %p5749_p9 = pneg %p6223_p8  ;;  %s236_s14 = sshll.u32 %s6133_s13, 4  ;;  %s237_s14 = int_to_ptr.vmem [resolvable:$true] %s236_s14 }
  0x14   : > { %s6134_s15 = smov [#allocation10]   ;;  %s5963_s17 = scalar_lea.vmem %s221_s11, 1024 }
  0x15   : > { %p6232_p11 = pnand %p5749_p9, %p7415_p1  ;;  %s252_s16 = sshll.u32 %s6134_s15, 4  ;;  %s253_s16 = int_to_ptr.vmem [resolvable:$true] %s252_s16 }
  0x16   : > { %p5964_p13 = scmp.ne.s32.totalorder %s221_s11, %s5963_s17  ;;  %p5971_p5 = scmp.lt.s32.totalorder %s221_s11, %s221_s11 }
  0x17   : > { %p5954_p12 = pneg %p6232_p11  ;;  %p5972_p7 = scmp.lt.s32.totalorder %s5963_s17, %s5963_s17 }
  0x19   : > { %p5966_p0 = pnand %p5964_p13, %p5954_p12  ;;  %p5973_p9 = por %p5972_p7, %p5971_p5 }
  0x1b   : > { %p5967_p3 = pneg %p5966_p0 }
  0x1d   : > { %p5974_p10 = pnand %p5973_p9, %p5967_p3 }
  0x1f   : > { %5977 = shalt.err (!%p5974_p10)
}
  0x20   : > { %s7416_s18 = smov 64   ;;  %s7417_s19 = smov 4  }
  0x21   : > { %s7426_s1 = sld [smem:[#allocation42_spill]]  ;;  %s5989_s22 = scalar_lea.vmem %s237_s14, 9216 }
  0x22   : > { %p5990_p13 = scmp.ne.s32.totalorder %s237_s14, %s5989_s22  ;;  %p5997_p3 = scmp.lt.s32.totalorder %s237_s14, %s237_s14 }
  0x23   : > { %p5998_p10 = scmp.lt.s32.totalorder %s5989_s22, %s5989_s22 }
  0x24   : > { %p5992_p0 = pnand %p5990_p13, %p5954_p12 }
  0x25   : > { %p5999_p7 = por %p5998_p10, %p5997_p3 }
  0x26   : > { %p5993_p5 = pneg %p5992_p0 }
  0x27   : > { %5752 = dma.hbm_to_vmem [thread:$0]  (!%p6232_p11), %s7426_s1, 1024, %s221_s11, [#allocation8], %s7416_s18, %s7416_s18, %s7417_s19  }
  0x28   : > { %p6000_p9 = pnand %p5999_p7, %p5993_p5 }
  0x2a   : > { %6003 = shalt.err (!%p6000_p9)
}
  0x2b   : > { %5755 = dma.hbm_to_vmem [thread:$0]  (!%p6232_p11), %s7410_s3, 9216, %s237_s14, [#allocation8], %s7416_s18, %s7416_s18, %s7417_s19  }
  0x2c   : > { %s6015_s10 = scalar_lea.vmem %s253_s16, 1024  ;;  %p6023_p3 = scmp.lt.s32.totalorder %s253_s16, %s253_s16 }
  0x2d   : > { %p6016_p1 = scmp.ne.s32.totalorder %s253_s16, %s6015_s10  ;;  %p6024_p5 = scmp.lt.s32.totalorder %s6015_s10, %s6015_s10 }
  0x2f   : > { %p6018_p13 = pnand %p6016_p1, %p5954_p12  ;;  %p6025_p10 = por %p6024_p5, %p6023_p3 }
  0x31   : > { %p6019_p0 = pneg %p6018_p13 }
  0x33   : > { %p6026_p7 = pnand %p6025_p10, %p6019_p0 }
  0x35   : > { %6029 = shalt.err (!%p6026_p7)
}
  0x36   : > { %5758 = dma.hbm_to_vmem [thread:$0]  (!%p6232_p11), %s7412_s5, 1024, %s253_s16, [#allocation11], %s7416_s18, %s7416_s18, %s7417_s19  }
  0x37   : > { %s6272_s14 = sadd.s32 1, %s6130_s27   ;;  %s32_s15 = sadd.s32 1, %s6126_s26 }
  0x38   : > { %s29_s12 = ssub.s32 %s6130_s27, %s6272_s14  ;;  %p39_p12 = scmp.ne.s32.totalorder %s6126_s26, %s6122_s25 }
  0x39   : > { %p30_p1 = scmp.eq.s32.totalorder %s29_s12, 0  ;;  %p40_p9 = scmp.eq.s32.totalorder %s6130_s27, 0 }
  0x3a   : > { %p5770_p13 = scmp.lt.s32.totalorder %s6130_s27, 2  ;;  %p6286_p3 = por %p195_p2, %p39_p12 }
  0x3b   : > { %s6282_s17 = scalar_select %p30_p1, %s6126_s26, %s32_s15  }
  0x3c   : > { %p41_p0 = por %p40_p9, %p39_p12  ;;  %s269_s21 = sand.u32 1, %s6126_s26  }
  0x3d   : > { %s7427_s20 = scalar_select %p6286_p3, 1, 0 }
  0x3e   : > { %s4923_s22 = sshll.u32 %s6130_s27, 11  ;;  %s4802_s16 = sshll.u32 %s269_s21, 7 }
  0x3f   : > { %s6295_s10 = scalar_lea.hbm %s7407_s0, %s4923_s22  ;;  %s273_s11 = scalar_lea.vmem [#allocation4], %s4802_s16 }
  0x40   : > { %s280_s13 = sshll.u32 %s273_s11, 4  ;;  %p6297_p11 = pnand %p5770_p13, %p41_p0  ;;  %s6301_s13 = int_to_ptr.vmem [resolvable:$true] %s280_s13 }
  0x41   : > { %s6303_s15 = scalar_lea.sflag [#allocation5], %s269_s21  ;;  %s6030_s18 = scalar_lea.hbm %s6295_s10, 2048 }
  0x42   : > { %p6031_p2 = scmp.ne.s32.totalorder %s6295_s10, %s6030_s18  ;;  %p6032_p5 = pneg %p6297_p11 }
  0x43   : > { %s6035_s16 = scalar_lea.hbm %s7407_s0, 4096  ;;  %p6036_p1 = scmp.lt.s32.totalorder %s6295_s10, %s7407_s0 }
  0x44   : > { %p6033_p10 = pnand %p6032_p5, %p6031_p2  ;;  %p6037_p12 = scmp.lt.s32.totalorder %s6035_s16, %s6030_s18 }
  0x46   : > { %p6034_p7 = pneg %p6033_p10  ;;  %p6038_p9 = por %p6037_p12, %p6036_p1 }
  0x48   : > { %p6039_p13 = pnand %p6038_p9, %p6034_p7 }
  0x4a   : > { %6042 = shalt.err (!%p6039_p13)
}
  0x4b   : > { %s6043_s21 = scalar_lea.vmem %s6301_s13, 2048  ;;  %s6137_s19 = smov [#allocation4]  }
  0x4c   : > { %p6044_p0 = scmp.ne.s32.totalorder %s6301_s13, %s6043_s21  ;;  %s6048_s1 = sshll.u32 %s6137_s19, 4  ;;  %s6049_s1 = int_to_ptr.vmem [resolvable:$false] %s6048_s1 }
  0x4d   : > { %s6050_s22 = scalar_lea.vmem %s6049_s1, 4096  ;;  %p6051_p10 = scmp.lt.s32.totalorder %s6301_s13, %s6049_s1 }
  0x4e   : > { %p6046_p6 = pnand %p6044_p0, %p6032_p5  ;;  %p6052_p3 = scmp.lt.s32.totalorder %s6050_s22, %s6043_s21 }
  0x50   : > { %p6047_p2 = pneg %p6046_p6  ;;  %p6053_p4 = por %p6052_p3, %p6051_p10 }
  0x52   : > { %p6054_p8 = pnand %p6053_p4, %p6047_p2 }
  0x54   : > { %6057 = shalt.err (!%p6054_p8)
}
  0x55   : > { %s7429_s18 = smov 4   ;;  %s7430_s23 = smov 64  }
  0x56   : > { %5762 = dma.hbm_to_vmem [thread:$0]  (!%p6297_p11), %s6295_s10, 2048, %s6301_s13, %s6303_s15, %s7430_s23, %s7430_s23, %s7429_s18  }
  0x57   : > { %p7431_p6 = scmp.ne.s32.totalorder %s7424_s9, 0 }
  0x59   : > { %292 = sbr.rel (%p7431_p6) target bundleno = 1090 (0x442), region = 48 }
  0x5e   : > { %s6330_s19 = sand.u32 1, %s6122_s25   ;;  %p7432_p4 = scmp.ne.s32.totalorder %s7422_s30, 0 }
  0x5f   : > { %s4806_s1 = sshll.u32 %s6330_s19, 7  ;;  %s295_s16 = scalar_lea.sflag [#allocation5], %s6330_s19 }
  0x60   : > { %s6334_s29 = scalar_lea.vmem [#allocation4], %s4806_s1 }
  0x61   : > { %6101 = dma.done.wait (%p7432_p4), %s295_s16, 2048  }
  0x62   : > { %6103 = vsyncadd (%p7432_p4), %s295_s16, 4294965248  ;;  %p7433_p8 = scmp.eq.s32.totalorder %s6204_s28, 0 }
  0x64   : > { %6105 = dma.done.wait (%p7433_p8), [#allocation8], 10240   ;;  %p7434_p3 = pmov %p7433_p8 }
  0x66   : > { %6107 = vsyncadd (%p7434_p3), [#allocation8], 4294957056  ;;  %p7435_p11 = pmov %p7434_p3 }
  0x67   : > { %p7436_p5 = pmov %p7434_p3 }
  0x68   : > { %6109 = dma.done.wait (%p7435_p11), [#allocation11], 1024  }
  0x69   : > { %6111 = vsyncadd (%p7436_p5), [#allocation11], 4294966272  ;;  %v5815_v0 = vld [vmem:[#allocation7 + $0x38] sm:$0xff]   ;;  %v5816_v1 = vld [vmem:[#allocation7 + $0x30] sm:$0xff]   ;;  %v6138_v36 = vmov 0.0   ;;  %v6139_v40 = vmov 0.0|0.0  }
  0x6a   : > { %5189 = vmatprep.subr.bf16.mxu0 %v5815_v0  ;;  %5717 = vmatprep.subr.bf16.mxu1 %v5815_v0  ;;  %v5817_v2 = vld [vmem:[#allocation7 + $0x28] sm:$0xff]   ;;  %v5818_v3 = vld [vmem:[#allocation7 + $0x20] sm:$0xff]   ;;  %v5819_v6 = vld [vmem:[#allocation7 + $0x18] sm:$0xff]   ;;  %766 = vst [vmem:[#allocation2] sm:$0xff] %v6138_v36  ;;  %s4810_s11 = sshll.u32 %s6330_s19, 8  ;;  %s4924_s22 = sshll.u32 %s6204_s28, 12 }
  0x6b   : > { %5190 = vmatpush3.bf16.msra.mxu0 %v5815_v0  ;;  %5725 = vmatpush3.bf16.msra.mxu1 %v5815_v0  ;;  %v342_v4 = vld [vmem:[%s6334_s29] sm:$0xff]   ;;  %v5820_v7 = vld [vmem:[#allocation7 + $0x10] sm:$0xff]   ;;  %v5821_v8 = vld [vmem:[#allocation7 + $0x8] sm:$0xff]   ;;  %767 = vst [vmem:[#allocation2 + $0x8] sm:$0xff] %v6138_v36  ;;  %s7280_s21 = scalar_lea.vmem [#allocation12], %s4810_s11  ;;  %s7360_s16 = scalar_lea.hbm %s7414_s7, %s4924_s22 }
  0x6c   : > { %5191 = vmatprep.subr.bf16.mxu0 %v5816_v1  ;;  %5718 = vmatprep.subr.bf16.mxu1 %v5816_v1  ;;  %v358_v5 = vld [vmem:[%s6334_s29 + $0x40] sm:$0xff]   ;;  %v344_v10 = vld [vmem:[%s6334_s29 + $0x8] sm:$0xff]   ;;  %v346_v11 = vld [vmem:[%s6334_s29 + $0x10] sm:$0xff]   ;;  %768 = vst [vmem:[#allocation2 + $0x10] sm:$0xff] %v6138_v36  ;;  %s4694_s18 = sshll.u32 %s7280_s21, 4  ;;  %p7489_p1 = scmp.ne.s32.totalorder %s7427_s20, 0  ;;  %s7362_s18 = int_to_ptr.vmem [resolvable:$true] %s4694_s18 }
  0x6d   : > { %5205 = vmatprep.mubr.bf16.mxu0 %v342_v4  ;;  %5221 = vmatprep.mubr.bf16.mxu1 %v358_v5  ;;  %v5822_v9 = vld [vmem:[#allocation7] sm:$0xff]   ;;  %v360_v12 = vld [vmem:[%s6334_s29 + $0x48] sm:$0xff]   ;;  %v5840_v13 = vld [vmem:[#allocation9 + $0x78] sm:$0xff]   ;;  %769 = vst [vmem:[#allocation2 + $0x18] sm:$0xff] %v6138_v36  ;;  %s6058_s30 = scalar_lea.vmem %s7362_s18, 4096  ;;  %s6140_s28 = smov [#allocation12]  }
  0x6e   : > { %v362_v14 = vld [vmem:[%s6334_s29 + $0x50] sm:$0xff]   ;;  %v5839_v15 = vld [vmem:[#allocation9 + $0x38] sm:$0xff]   ;;  %v350_v19 = vld [vmem:[%s6334_s29 + $0x20] sm:$0xff]   ;;  %770 = vst [vmem:[#allocation2 + $0x20] sm:$0xff] %v6138_v36  ;;  %p6059_p7 = scmp.ne.s32.totalorder %s7362_s18, %s6058_s30  ;;  %s6062_s9 = sshll.u32 %s6140_s28, 4  ;;  %s6063_s9 = int_to_ptr.vmem [resolvable:$false] %s6062_s9 }
  0x6f   : > { %5192 = vmatpush3.bf16.msra.mxu0 %v5816_v1  ;;  %5726 = vmatpush3.bf16.msra.mxu1 %v5816_v1  ;;  %v5841_v16 = vld [vmem:[#allocation9 + $0x30] sm:$0xff]   ;;  %v348_v18 = vld [vmem:[%s6334_s29 + $0x18] sm:$0xff]   ;;  %v366_v21 = vld [vmem:[%s6334_s29 + $0x60] sm:$0xff]   ;;  %773 = vst [vmem:[#allocation2 + $0x38] sm:$0xff] %v6138_v36  ;;  %s6064_s10 = scalar_lea.vmem %s6063_s9, 8192  ;;  %p6065_p13 = scmp.lt.s32.totalorder %s7362_s18, %s6063_s9 }
  0x70   : > { %5193 = vmatprep.subr.bf16.mxu0 %v5817_v2  ;;  %5719 = vmatprep.subr.bf16.mxu1 %v5817_v2  ;;  %v5842_v17 = vld [vmem:[#allocation9 + $0x70] sm:$0xff]   ;;  %v364_v20 = vld [vmem:[%s6334_s29 + $0x58] sm:$0xff]   ;;  %v5843_v22 = vld [vmem:[#allocation9 + $0x28] sm:$0xff]   ;;  %774 = vst [vmem:[#allocation2 + $0x40] sm:$0xff] %v6138_v36  ;;  %p6060_p12 = pnand %p6059_p7, %p7489_p1  ;;  %p6066_p0 = scmp.lt.s32.totalorder %s6064_s10, %s6058_s30 }
  0x71   : > { %v5844_v23 = vld [vmem:[#allocation9 + $0x68] sm:$0xff]   ;;  %v354_v25 = vld [vmem:[%s6334_s29 + $0x30] sm:$0xff]   ;;  %v356_v28 = vld [vmem:[%s6334_s29 + $0x38] sm:$0xff]   ;;  %777 = vst [vmem:[#allocation2 + $0x58] sm:$0xff] %v6138_v36 }
  0x72   : > { %v352_v24 = vld [vmem:[%s6334_s29 + $0x28] sm:$0xff]   ;;  %v370_v27 = vld [vmem:[%s6334_s29 + $0x70] sm:$0xff]   ;;  %v372_v29 = vld [vmem:[%s6334_s29 + $0x78] sm:$0xff]   ;;  %778 = vst [vmem:[#allocation2 + $0x60] sm:$0xff] %v6138_v36  ;;  %p6061_p9 = pneg %p6060_p12  ;;  %p6067_p2 = por %p6066_p0, %p6065_p13 }
  0x73   : > { %5194 = vmatpush3.bf16.msra.mxu0 %v5817_v2  ;;  %5727 = vmatpush3.bf16.msra.mxu1 %v5817_v2  ;;  %v368_v26 = vld [vmem:[%s6334_s29 + $0x68] sm:$0xff]   ;;  %v5846_v30 = vld [vmem:[#allocation9 + $0x60] sm:$0xff]   ;;  %v5848_v31 = vld [vmem:[#allocation9 + $0x58] sm:$0xff]   ;;  %781 = vst [vmem:[#allocation2 + $0x78] sm:$0xff] %v6138_v36 }
  0x74   : > { %5195 = vmatprep.subr.bf16.mxu0 %v5818_v3  ;;  %5720 = vmatprep.subr.bf16.mxu1 %v5818_v3  ;;  %v5845_v32 = vld [vmem:[#allocation9 + $0x20] sm:$0xff]   ;;  %v5850_v33 = vld [vmem:[#allocation9 + $0x50] sm:$0xff]   ;;  %v5847_v34 = vld [vmem:[#allocation9 + $0x18] sm:$0xff]   ;;  %782 = vst [vmem:[#allocation2 + $0x80] sm:$0xff] %v6138_v36  ;;  %p6068_p10 = pnand %p6067_p2, %p6061_p9 }
  0x75   : > { %v5852_v35 = vld [vmem:[#allocation9 + $0x48] sm:$0xff]   ;;  %785 = vst [vmem:[#allocation2 + $0x98] sm:$0xff] %v6138_v36  ;;  %786 = vst [vmem:[#allocation2 + $0xa0] sm:$0xff] %v6138_v36  ;;  %v5849_v37 = vld [vmem:[#allocation9 + $0x10] sm:$0xff]  }
  0x76   : > { %789 = vst [vmem:[#allocation2 + $0xb8] sm:$0xff] %v6138_v36  ;;  %790 = vst [vmem:[#allocation2 + $0xc0] sm:$0xff] %v6138_v36  ;;  %v5854_v38 = vld [vmem:[#allocation9 + $0x40] sm:$0xff]   ;;  %v5851_v39 = vld [vmem:[#allocation9 + $0x8] sm:$0xff]  }
  0x77   : > { %5196 = vmatpush3.bf16.msra.mxu0 %v5818_v3  ;;  %5728 = vmatpush3.bf16.msra.mxu1 %v5818_v3  ;;  %793 = vst [vmem:[#allocation2 + $0xd8] sm:$0xff] %v6138_v36  ;;  %794 = vst [vmem:[#allocation2 + $0xe0] sm:$0xff] %v6138_v36  ;;  %v5853_v41 = vld [vmem:[#allocation9] sm:$0xff]   ;;  %v904_v43 = vld [vmem:[#allocation2 + $0xf] sm:$0xff] }
  0x78   : > { %5197 = vmatprep.subr.bf16.mxu0 %v5819_v6  ;;  %5721 = vmatprep.subr.bf16.mxu1 %v5819_v6  ;;  %797 = vst [vmem:[#allocation2 + $0xf8] sm:$0xff] %v6138_v36  ;;  %798 = vst [vmem:[#allocation2 + $0x100] sm:$0xff] %v6138_v36  ;;  %v903_v42 = vld [vmem:[#allocation2 + $0x7] sm:$0xff]  ;;  %v6364_v45 = vld [vmem:[#allocation9 + $0xb8] sm:$0xff]  }
  0x79   : > { %801 = vst [vmem:[#allocation2 + $0x118] sm:$0xff] %v6138_v36  ;;  %802 = vst [vmem:[#allocation2 + $0x120] sm:$0xff] %v6138_v36  ;;  %v935_v44 = vpack.c.bf16 %v904_v43, %v903_v42  ;;  %v5860_v46 = vld [vmem:[#allocation9 + $0xf8] sm:$0xff]   ;;  %v6370_v47 = vld [vmem:[%s7409_s2] ss:$0 sm:$0xff] }
  0x7a   : > { %805 = vst [vmem:[#allocation2 + $0x138] sm:$0xff] %v6138_v36  ;;  %806 = vst [vmem:[#allocation2 + $0x140] sm:$0xff] %v6138_v36 }
  0x7b   : > { %5198 = vmatpush3.bf16.msra.mxu0 %v5819_v6  ;;  %5729 = vmatpush3.bf16.msra.mxu1 %v5819_v6  ;;  %809 = vst [vmem:[#allocation2 + $0x158] sm:$0xff] %v6138_v36  ;;  %810 = vst [vmem:[#allocation2 + $0x160] sm:$0xff] %v6138_v36 }
  0x7c   : > { %5199 = vmatprep.subr.bf16.mxu0 %v5820_v7  ;;  %5722 = vmatprep.subr.bf16.mxu1 %v5820_v7  ;;  %813 = vst [vmem:[#allocation2 + $0x178] sm:$0xff] %v6138_v36  ;;  %814 = vst [vmem:[#allocation2 + $0x180] sm:$0xff] %v6138_v36 }
  0x7d   : > { %817 = vst [vmem:[#allocation2 + $0x198] sm:$0xff] %v6138_v36  ;;  %818 = vst [vmem:[#allocation2 + $0x1a0] sm:$0xff] %v6138_v36 }
  0x7e   : > { %821 = vst [vmem:[#allocation2 + $0x1b8] sm:$0xff] %v6138_v36  ;;  %822 = vst [vmem:[#allocation2 + $0x1c0] sm:$0xff] %v6138_v36 }
  0x7f   : > { %5200 = vmatpush3.bf16.msra.mxu0 %v5820_v7  ;;  %5730 = vmatpush3.bf16.msra.mxu1 %v5820_v7  ;;  %825 = vst [vmem:[#allocation2 + $0x1d8] sm:$0xff] %v6138_v36  ;;  %826 = vst [vmem:[#allocation2 + $0x1e0] sm:$0xff] %v6138_v36 }
  0x80   : > { %5201 = vmatprep.subr.bf16.mxu0 %v5821_v8  ;;  %5723 = vmatprep.subr.bf16.mxu1 %v5821_v8  ;;  %829 = vst [vmem:[#allocation2 + $0x1f8] sm:$0xff] %v6138_v36  ;;  %830 = vst [vmem:[#allocation2 + $0x200] sm:$0xff] %v6138_v36 }
  0x81   : > { %833 = vst [vmem:[#allocation2 + $0x218] sm:$0xff] %v6138_v36  ;;  %834 = vst [vmem:[#allocation2 + $0x220] sm:$0xff] %v6138_v36 }
  0x82   : > { %835 = vst [vmem:[#allocation2 + $0x228] sm:$0xff] %v6138_v36  ;;  %836 = vst [vmem:[#allocation2 + $0x230] sm:$0xff] %v6138_v36 }
  0x83   : > { %5202 = vmatpush3.bf16.msra.mxu0 %v5821_v8  ;;  %5731 = vmatpush3.bf16.msra.mxu1 %v5821_v8  ;;  %837 = vst [vmem:[#allocation2 + $0x238] sm:$0xff] %v6138_v36 }
  0x84   : > { %5203 = vmatprep.subr.bf16.mxu0 %v5822_v9  ;;  %5724 = vmatprep.subr.bf16.mxu1 %v5822_v9 }
  0x87   : > { %5204 = vmatpush3.bf16.msra.mxu0 %v5822_v9  ;;  %5732 = vmatpush3.bf16.msra.mxu1 %v5822_v9 }
  0x88   : > { %5285 = vmatprep.subr.bf16.mxu0 %v5840_v13  ;;  %5237 = vmatprep.subr.bf16.mxu1 %v5839_v15 }
  0x8a   : > { %5206 = vmatmul.mubr.bf16.vlgmr.msra.gmra.mxu0 %v344_v10  ;;  %5222 = vmatmul.mubr.bf16.vlgmr.msra.gmra.mxu1 %v360_v12 }
  0x8b   : > { %5209 = vmatprep.mubr.bf16.mxu0 %v346_v11  ;;  %5225 = vmatprep.mubr.bf16.mxu1 %v362_v14 }
  0x8c   : > { %5238 = vmatpush3.bf16.msra.mxu1 %v5839_v15  ;;  %5286 = vmatpush3.bf16.msra.mxu0 %v5840_v13 }
  0x8d   : > { %5239 = vmatprep.subr.bf16.mxu1 %v5841_v16  ;;  %5287 = vmatprep.subr.bf16.mxu0 %v5842_v17 }
  0x90   : > { %5240 = vmatpush3.bf16.msra.mxu1 %v5841_v16  ;;  %5288 = vmatpush3.bf16.msra.mxu0 %v5842_v17  ;;  %v5861_v17 = vld [vmem:[#allocation9 + $0xf0] sm:$0xff]  }
  0x91   : > { %5241 = vmatprep.subr.bf16.mxu1 %v5843_v22  ;;  %5289 = vmatprep.subr.bf16.mxu0 %v5844_v23 }
  0x92   : > { %5210 = vmatmul.mubr.bf16.gmra.mxu0 %v348_v18  ;;  %5226 = vmatmul.mubr.bf16.gmra.mxu1 %v364_v20 }
  0x93   : > { %5213 = vmatprep.mubr.bf16.mxu0 %v350_v19  ;;  %5229 = vmatprep.mubr.bf16.mxu1 %v366_v21 }
  0x94   : > { %5242 = vmatpush3.bf16.msra.mxu1 %v5843_v22  ;;  %5290 = vmatpush3.bf16.msra.mxu0 %v5844_v23 }
  0x95   : > { %5291 = vmatprep.subr.bf16.mxu0 %v5846_v30  ;;  %5243 = vmatprep.subr.bf16.mxu1 %v5845_v32 }
  0x98   : > { %5292 = vmatpush3.bf16.msra.mxu0 %v5846_v30  ;;  %5244 = vmatpush3.bf16.msra.mxu1 %v5845_v32 }
  0x99   : > { %5293 = vmatprep.subr.bf16.mxu0 %v5848_v31  ;;  %5245 = vmatprep.subr.bf16.mxu1 %v5847_v34 }
  0x9a   : > { %5214 = vmatmul.mubr.bf16.gmra.mxu0 %v352_v24  ;;  %5230 = vmatmul.mubr.bf16.gmra.mxu1 %v368_v26 }
  0x9b   : > { %5217 = vmatprep.mubr.bf16.mxu0 %v354_v25  ;;  %5233 = vmatprep.mubr.bf16.mxu1 %v370_v27 }
  0x9c   : > { %5294 = vmatpush3.bf16.msra.mxu0 %v5848_v31  ;;  %5246 = vmatpush3.bf16.msra.mxu1 %v5847_v34  ;;  %v5863_v31 = vld [vmem:[#allocation9 + $0xe8] sm:$0xff]  }
  0x9d   : > { %5295 = vmatprep.subr.bf16.mxu0 %v5850_v33  ;;  %5247 = vmatprep.subr.bf16.mxu1 %v5849_v37 }
  0xa0   : > { %5296 = vmatpush3.bf16.msra.mxu0 %v5850_v33  ;;  %5248 = vmatpush3.bf16.msra.mxu1 %v5849_v37 }
  0xa1   : > { %5297 = vmatprep.subr.bf16.mxu0 %v5852_v35  ;;  %5249 = vmatprep.subr.bf16.mxu1 %v5851_v39 }
  0xa2   : > { %5218 = vmatmul.mubr.bf16.gmra.mxu0 %v356_v28  ;;  %5234 = vmatmul.mubr.bf16.gmra.mxu1 %v372_v29 }
  0xa3   : > { %5301 = vmatprep.mubr.bf16.mxu0 %v6139_v40  ;;  %5253 = vmatprep.mubr.bf16.mxu1 %v935_v44 }
  0xa4   : > { %5298 = vmatpush3.bf16.msra.mxu0 %v5852_v35  ;;  %5250 = vmatpush3.bf16.msra.mxu1 %v5851_v39 }
  0xa5   : > { %5299 = vmatprep.subr.bf16.mxu0 %v5854_v38  ;;  %5251 = vmatprep.subr.bf16.mxu1 %v5853_v41 }
  0xa8   : > { %5300 = vmatpush3.bf16.msra.mxu0 %v5854_v38  ;;  %5252 = vmatpush3.bf16.msra.mxu1 %v5853_v41 }
  0xa9   : > { %5333 = vmatprep.subr.bf16.mxu1 %v6364_v45  ;;  %5381 = vmatprep.subr.bf16.mxu0 %v5860_v46 }
 0x14a   : > { %v5207_v48 = vpop.f32.mrf.mxu0  ;;  %v5223_v50 = vpop.f32.mrf.mxu1 }
 0x14b   : > { %v584_v49 = vadd.f32 %v5207_v48, %v6370_v47  ;;  %v6374_v52 = vadd.f32 %v5223_v50, %v6370_v47  ;;  %v5856_v50 = vld [vmem:[#allocation9 + $0xb0] sm:$0xff]  }
 0x14c   : > { %v575_v51 = vpop.f32.mrf.mxu0  ;;  %v639_v55 = vpop.f32.mrf.mxu1 }
 0x14d   : > { %v704_v53 = vmax.f32 %v584_v49, 0.0  ;;  %v576_v54 = vadd.f32 %v6370_v47, %v575_v51  ;;  %v720_v57 = vmax.f32 %v6374_v52, 0.0  ;;  %v6379_v58 = vadd.f32 %v6370_v47, %v639_v55 }
 0x14e   : > { %v5208_v56 = vpop.f32.mrf.mxu0  ;;  %v5224_v61 = vpop.f32.mrf.mxu1 }
 0x14f   : > { %841 = vst [vmem:[#allocation2 + $0x48] sm:$0xff] %v704_v53  ;;  %v702_v59 = vmax.f32 %v576_v54, 0.0  ;;  %v587_v60 = vadd.f32 %v5208_v56, %v6370_v47  ;;  %857 = vst [vmem:[#allocation2 + $0x148] sm:$0xff] %v720_v57  ;;  %v718_v63 = vmax.f32 %v6379_v58, 0.0  ;;  %v6386_v0 = vadd.f32 %v5224_v61, %v6370_v47 }
 0x150   : > { %v578_v62 = vpop.f32.mrf.mxu0  ;;  %v642_v3 = vpop.f32.mrf.mxu1 }
 0x151   : > { %839 = vst [vmem:[#allocation2 + $0x28] sm:$0xff] %v702_v59  ;;  %v705_v1 = vmax.f32 %v587_v60, 0.0  ;;  %v579_v2 = vadd.f32 %v6370_v47, %v578_v62  ;;  %855 = vst [vmem:[#allocation2 + $0x128] sm:$0xff] %v718_v63  ;;  %v721_v5 = vmax.f32 %v6386_v0, 0.0  ;;  %v643_v6 = vadd.f32 %v6370_v47, %v642_v3 }
 0x152   : > { %v5211_v4 = vpop.f32.mrf.mxu0  ;;  %v5227_v9 = vpop.f32.mrf.mxu1 }
 0x153   : > { %842 = vst [vmem:[#allocation2 + $0x50] sm:$0xff] %v705_v1  ;;  %v703_v7 = vmax.f32 %v579_v2, 0.0  ;;  %v6394_v8 = vadd.f32 %v5211_v4, %v6370_v47  ;;  %858 = vst [vmem:[#allocation2 + $0x150] sm:$0xff] %v721_v5  ;;  %v6398_v11 = vmax.f32 %v643_v6, 0.0  ;;  %v6401_v12 = vadd.f32 %v5227_v9, %v6370_v47  ;;  %v5864_v2 = vld [vmem:[#allocation9 + $0xe0] sm:$0xff]   ;;  %v5857_v9 = vld [vmem:[#allocation9 + $0xa8] sm:$0xff]  }
 0x154   : > { %v591_v10 = vpop.f32.mrf.mxu0  ;;  %v655_v16 = vpop.f32.mrf.mxu1  ;;  %v1306_v19 = vpack.c.bf16 %v705_v1, %v704_v53 }
 0x155   : > { %840 = vst [vmem:[#allocation2 + $0x30] sm:$0xff] %v703_v7  ;;  %v708_v13 = vmax.f32 %v6394_v8, 0.0  ;;  %v592_v14 = vadd.f32 %v6370_v47, %v591_v10  ;;  %v1305_v15 = vpack.c.bf16 %v703_v7, %v702_v59  ;;  %856 = vst [vmem:[#allocation2 + $0x130] sm:$0xff] %v6398_v11  ;;  %v724_v20 = vmax.f32 %v6401_v12, 0.0 }
 0x156   : > { %v5212_v18 = vpop.f32.mrf.mxu0  ;;  %v6408_v21 = vadd.f32 %v6370_v47, %v655_v16  ;;  %v5228_v24 = vpop.f32.mrf.mxu1  ;;  %v907_v49 = vld [vmem:[#allocation2 + $0x47] sm:$0xff] }
 0x157   : > { %845 = vst [vmem:[#allocation2 + $0x88] sm:$0xff] %v708_v13  ;;  %v706_v22 = vmax.f32 %v592_v14, 0.0  ;;  %v603_v23 = vadd.f32 %v5212_v18, %v6370_v47  ;;  %5302 = vmatmul.mubr.bf16.vlgmr.msra.gmra.mxu0 %v1305_v15  ;;  %861 = vst [vmem:[#allocation2 + $0x188] sm:$0xff] %v724_v20  ;;  %v6415_v27 = vadd.f32 %v5228_v24, %v6370_v47  ;;  %v923_v52 = vld [vmem:[#allocation2 + $0x147] sm:$0xff] }
 0x158   : > { %v594_v25 = vpop.f32.mrf.mxu0  ;;  %5305 = vmatprep.mubr.bf16.mxu0 %v1306_v19  ;;  %v722_v26 = vmax.f32 %v6408_v21, 0.0  ;;  %5382 = vmatpush3.bf16.msra.mxu0 %v5860_v46  ;;  %v658_v30 = vpop.f32.mrf.mxu1  ;;  %v905_v40 = vld [vmem:[#allocation2 + $0x27] sm:$0xff] }
 0x159   : > { %843 = vst [vmem:[#allocation2 + $0x68] sm:$0xff] %v706_v22  ;;  %v709_v28 = vmax.f32 %v603_v23, 0.0  ;;  %v595_v29 = vadd.f32 %v6370_v47, %v594_v25  ;;  %5383 = vmatprep.subr.bf16.mxu0 %v5861_v17  ;;  %v725_v33 = vmax.f32 %v6415_v27, 0.0  ;;  %v659_v34 = vadd.f32 %v6370_v47, %v658_v30  ;;  %v921_v58 = vld [vmem:[#allocation2 + $0x127] sm:$0xff] }
 0x15a   : > { %v5215_v32 = vpop.f32.mrf.mxu0  ;;  %859 = vst [vmem:[#allocation2 + $0x168] sm:$0xff] %v722_v26  ;;  %v908_v37 = vld [vmem:[#allocation2 + $0x4f] sm:$0xff]  ;;  %v5231_v38 = vpop.f32.mrf.mxu1 }
 0x15b   : > { %846 = vst [vmem:[#allocation2 + $0x90] sm:$0xff] %v709_v28  ;;  %v707_v35 = vmax.f32 %v595_v29, 0.0  ;;  %v6423_v36 = vadd.f32 %v5215_v32, %v6370_v47  ;;  %862 = vst [vmem:[#allocation2 + $0x190] sm:$0xff] %v725_v33  ;;  %v6427_v42 = vmax.f32 %v659_v34, 0.0  ;;  %v6430_v43 = vadd.f32 %v5231_v38, %v6370_v47  ;;  %v5858_v34 = vld [vmem:[#allocation9 + $0xa0] sm:$0xff]   ;;  %v924_v0 = vld [vmem:[#allocation2 + $0x14f] sm:$0xff] }
 0x15c   : > { %v607_v39 = vpop.f32.mrf.mxu0  ;;  %v906_v41 = vld [vmem:[#allocation2 + $0x2f] sm:$0xff]  ;;  %5384 = vmatpush3.bf16.msra.mxu0 %v5861_v17  ;;  %v671_v53 = vpop.f32.mrf.mxu1  ;;  %v6436_v55 = vpack.c.bf16 %v908_v37, %v907_v49  ;;  %v1308_v62 = vpack.c.bf16 %v709_v28, %v708_v13 }
 0x15d   : > { %844 = vst [vmem:[#allocation2 + $0x70] sm:$0xff] %v707_v35  ;;  %v712_v44 = vmax.f32 %v6423_v36, 0.0  ;;  %v608_v46 = vadd.f32 %v6370_v47, %v607_v39  ;;  %v6434_v48 = vpack.c.bf16 %v906_v41, %v905_v40  ;;  %v1307_v51 = vpack.c.bf16 %v707_v35, %v706_v22  ;;  %5385 = vmatprep.subr.bf16.mxu0 %v5863_v31  ;;  %v5866_v41 = vld [vmem:[#allocation9 + $0xd8] sm:$0xff]  }
 0x15e   : > { %v5216_v54 = vpop.f32.mrf.mxu0  ;;  %860 = vst [vmem:[#allocation2 + $0x170] sm:$0xff] %v6427_v42  ;;  %v728_v56 = vmax.f32 %v6430_v43, 0.0  ;;  %v6441_v59 = vadd.f32 %v6370_v47, %v671_v53  ;;  %v5232_v1 = vpop.f32.mrf.mxu1  ;;  %v5859_v36 = vld [vmem:[#allocation9 + $0x98] sm:$0xff]   ;;  %v927_v21 = vld [vmem:[#allocation2 + $0x187] sm:$0xff] }
 0x15f   : > { %849 = vst [vmem:[#allocation2 + $0xc8] sm:$0xff] %v712_v44  ;;  %v710_v60 = vmax.f32 %v608_v46, 0.0  ;;  %v619_v61 = vadd.f32 %v5216_v54, %v6370_v47  ;;  %5254 = vmatmul.mubr.bf16.vlgmr.msra.gmra.mxu1 %v6434_v48  ;;  %5306 = vmatmul.mubr.bf16.gmra.mxu0 %v1307_v51  ;;  %v683_v6 = vadd.f32 %v5232_v1, %v6370_v47 }
 0x160   : > { %5334 = vmatpush3.bf16.msra.mxu1 %v6364_v45  ;;  %v610_v3 = vpop.f32.mrf.mxu0  ;;  %5257 = vmatprep.mubr.bf16.mxu1 %v6436_v55  ;;  %865 = vst [vmem:[#allocation2 + $0x1c8] sm:$0xff] %v728_v56  ;;  %v726_v4 = vmax.f32 %v6441_v59, 0.0  ;;  %v674_v10 = vpop.f32.mrf.mxu1  ;;  %v909_v22 = vld [vmem:[#allocation2 + $0x67] sm:$0xff] }
 0x161   : > { %847 = vst [vmem:[#allocation2 + $0xa8] sm:$0xff] %v710_v60  ;;  %v713_v7 = vmax.f32 %v619_v61, 0.0  ;;  %v611_v8 = vadd.f32 %v6370_v47, %v610_v3  ;;  %5335 = vmatprep.subr.bf16.mxu1 %v5856_v50  ;;  %5309 = vmatprep.mubr.bf16.mxu0 %v1308_v62  ;;  %v6456_v45 = vmax.f32 %v683_v6, 0.0  ;;  %v6459_v14 = vadd.f32 %v6370_v47, %v674_v10  ;;  %v5867_v61 = vld [vmem:[#allocation9 + $0xd0] sm:$0xff]  }
 0x162   : > { %v5219_v13 = vpop.f32.mrf.mxu0  ;;  %863 = vst [vmem:[#allocation2 + $0x1a8] sm:$0xff] %v726_v4  ;;  %5386 = vmatpush3.bf16.msra.mxu0 %v5863_v31  ;;  %v912_v17 = vld [vmem:[#allocation2 + $0x8f] sm:$0xff]  ;;  %v5235_v18 = vpop.f32.mrf.mxu1  ;;  %v911_v31 = vld [vmem:[#allocation2 + $0x87] sm:$0xff] }
 0x163   : > { %850 = vst [vmem:[#allocation2 + $0xd0] sm:$0xff] %v713_v7  ;;  %v711_v15 = vmax.f32 %v611_v8, 0.0  ;;  %v6462_v16 = vadd.f32 %v5219_v13, %v6370_v47  ;;  %5387 = vmatprep.subr.bf16.mxu0 %v5864_v2  ;;  %866 = vst [vmem:[#allocation2 + $0x1d0] sm:$0xff] %v6456_v45  ;;  %v727_v24 = vmax.f32 %v6459_v14, 0.0  ;;  %v696_v25 = vadd.f32 %v5235_v18, %v6370_v47  ;;  %v5862_v18 = vld [vmem:[#allocation9 + $0x90] sm:$0xff]  }
 0x164   : > { %v623_v19 = vpop.f32.mrf.mxu0  ;;  %v910_v23 = vld [vmem:[#allocation2 + $0x6f] sm:$0xff]  ;;  %5336 = vmatpush3.bf16.msra.mxu1 %v5856_v50  ;;  %v687_v35 = vpop.f32.mrf.mxu1  ;;  %v6471_v38 = vpack.c.bf16 %v912_v17, %v911_v31  ;;  %v1310_v50 = vpack.c.bf16 %v713_v7, %v712_v44  ;;  %v1318_v27 = vpack.c.bf16 %v6456_v45, %v728_v56 }
 0x165   : > { %848 = vst [vmem:[#allocation2 + $0xb0] sm:$0xff] %v711_v15  ;;  %v716_v28 = vmax.f32 %v6462_v16, 0.0  ;;  %v624_v29 = vadd.f32 %v6370_v47, %v623_v19  ;;  %v6469_v30 = vpack.c.bf16 %v910_v23, %v909_v22  ;;  %5337 = vmatprep.subr.bf16.mxu1 %v5857_v9  ;;  %v1309_v32 = vpack.c.bf16 %v711_v15, %v710_v60  ;;  %v5869_v19 = vld [vmem:[#allocation9 + $0xc8] sm:$0xff]   ;;  %v5870_v23 = vld [vmem:[#allocation9 + $0xc0] sm:$0xff]  }
 0x166   : > { %v5220_v37 = vpop.f32.mrf.mxu0  ;;  %864 = vst [vmem:[#allocation2 + $0x1b0] sm:$0xff] %v727_v24  ;;  %v732_v39 = vmax.f32 %v696_v25, 0.0  ;;  %v6476_v40 = vadd.f32 %v6370_v47, %v687_v35  ;;  %5388 = vmatpush3.bf16.msra.mxu0 %v5864_v2  ;;  %v5236_v51 = vpop.f32.mrf.mxu1  ;;  %v5865_v22 = vld [vmem:[#allocation9 + $0x88] sm:$0xff]   ;;  %v6541_v12 = vpack.c.bf16 %v727_v24, %v726_v4  ;;  %v1643_v24 = vld [vmem:[#allocation2 + $0x11] sm:$0xff] }
 0x167   : > { %853 = vst [vmem:[#allocation2 + $0x108] sm:$0xff] %v716_v28  ;;  %v714_v46 = vmax.f32 %v624_v29, 0.0  ;;  %v635_v49 = vadd.f32 %v5220_v37, %v6370_v47  ;;  %5258 = vmatmul.mubr.bf16.gmra.mxu1 %v6469_v30  ;;  %5310 = vmatmul.mubr.bf16.gmra.mxu0 %v1309_v32  ;;  %v6485_v60 = vadd.f32 %v5236_v51, %v6370_v47  ;;  %v925_v51 = vld [vmem:[#allocation2 + $0x167] sm:$0xff] }
 0x168   : > { %v626_v53 = vpop.f32.mrf.mxu0  ;;  %5261 = vmatprep.mubr.bf16.mxu1 %v6471_v38  ;;  %5338 = vmatpush3.bf16.msra.mxu1 %v5857_v9  ;;  %869 = vst [vmem:[#allocation2 + $0x208] sm:$0xff] %v732_v39  ;;  %v730_v54 = vmax.f32 %v6476_v40, 0.0  ;;  %v690_v44 = vpop.f32.mrf.mxu1  ;;  %v913_v8 = vld [vmem:[#allocation2 + $0xa7] sm:$0xff]  ;;  %v1314_v37 = vpack.c.bf16 %v721_v5, %v720_v57  ;;  %v1315_v5 = vpack.c.bf16 %v6427_v42, %v722_v26 }
 0x169   : > { %851 = vst [vmem:[#allocation2 + $0xe8] sm:$0xff] %v714_v46  ;;  %v717_v62 = vmax.f32 %v635_v49, 0.0  ;;  %v627_v1 = vadd.f32 %v6370_v47, %v626_v53  ;;  %5313 = vmatprep.mubr.bf16.mxu0 %v1310_v50  ;;  %5339 = vmatprep.subr.bf16.mxu1 %v5858_v34  ;;  %v733_v2 = vmax.f32 %v6485_v60, 0.0  ;;  %v6492_v3 = vadd.f32 %v6370_v47, %v690_v44  ;;  %v915_v47 = vld [vmem:[#allocation2 + $0xc7] sm:$0xff]  ;;  %v926_v53 = vld [vmem:[#allocation2 + $0x16f] sm:$0xff] }
 0x16a   : > { %867 = vst [vmem:[#allocation2 + $0x1e8] sm:$0xff] %v730_v54  ;;  %5389 = vmatprep.subr.bf16.mxu0 %v5866_v41  ;;  %v916_v7 = vld [vmem:[#allocation2 + $0xcf] sm:$0xff]  ;;  %v5868_v39 = vld [vmem:[#allocation9 + $0x80] sm:$0xff]   ;;  %v6527_v49 = vpack.c.bf16 %v924_v0, %v923_v52  ;;  %v1316_v50 = vpack.c.bf16 %v725_v33, %v724_v20  ;;  %v6535_v26 = vpack.c.bf16 %v926_v53, %v925_v51 }
 0x16b   : > { %854 = vst [vmem:[#allocation2 + $0x110] sm:$0xff] %v717_v62  ;;  %v6494_v6 = vmax.f32 %v627_v1, 0.0  ;;  %5390 = vmatpush3.bf16.msra.mxu0 %v5866_v41  ;;  %870 = vst [vmem:[#allocation2 + $0x210] sm:$0xff] %v733_v2  ;;  %v731_v10 = vmax.f32 %v6492_v3, 0.0  ;;  %v6503_v16 = vpack.c.bf16 %v916_v7, %v915_v47  ;;  %v1312_v17 = vpack.c.bf16 %v717_v62, %v716_v28  ;;  %v5876_v41 = vld [vmem:[#allocation9 + $0x178] sm:$0xff]   ;;  %v929_v33 = vld [vmem:[#allocation2 + $0x1a7] sm:$0xff] }
 0x16c   : > { %v914_v9 = vld [vmem:[#allocation2 + $0xaf] sm:$0xff]  ;;  %5340 = vmatpush3.bf16.msra.mxu1 %v5858_v34  ;;  %5391 = vmatprep.subr.bf16.mxu0 %v5867_v61  ;;  %v1313_v34 = vpack.c.bf16 %v6398_v11, %v718_v63  ;;  %v931_v59 = vld [vmem:[#allocation2 + $0x1c7] sm:$0xff] }
 0x16d   : > { %852 = vst [vmem:[#allocation2 + $0xf0] sm:$0xff] %v6494_v6  ;;  %v6500_v13 = vpack.c.bf16 %v914_v9, %v913_v8  ;;  %v1311_v15 = vpack.c.bf16 %v6494_v6, %v714_v46  ;;  %5341 = vmatprep.subr.bf16.mxu1 %v5859_v36  ;;  %868 = vst [vmem:[#allocation2 + $0x1f0] sm:$0xff] %v731_v10  ;;  %v922_v63 = vld [vmem:[#allocation2 + $0x12f] sm:$0xff]  ;;  %v5871_v46 = vld [vmem:[#allocation9 + $0x138] sm:$0xff]   ;;  %v6557_v43 = vpack.c.bf16 %v731_v10, %v730_v54 }
 0x16e   : > { %v919_v32 = vld [vmem:[#allocation2 + $0x107] sm:$0xff]  ;;  %v6522_v57 = vpack.c.bf16 %v922_v63, %v921_v58  ;;  %v930_v62 = vld [vmem:[#allocation2 + $0x1af] sm:$0xff] }
 0x16f   : > { %5262 = vmatmul.mubr.bf16.gmra.mxu1 %v6500_v13  ;;  %5314 = vmatmul.mubr.bf16.gmra.mxu0 %v1311_v15  ;;  %v932_v1 = vld [vmem:[#allocation2 + $0x1cf] sm:$0xff]  ;;  %v6551_v14 = vpack.c.bf16 %v930_v62, %v929_v33  ;;  %v5887_v33 = vld [vmem:[#allocation9 + $0x1b8] sm:$0xff]  }
 0x170   : > { %5265 = vmatprep.mubr.bf16.mxu1 %v6503_v16  ;;  %5317 = vmatprep.mubr.bf16.mxu0 %v1312_v17  ;;  %v917_v29 = vld [vmem:[#allocation2 + $0xe7] sm:$0xff]  ;;  %v6559_v56 = vpack.c.bf16 %v932_v1, %v931_v59  ;;  %v5877_v3 = vld [vmem:[#allocation9 + $0x170] sm:$0xff]  }
 0x171   : > { %5342 = vmatpush3.bf16.msra.mxu1 %v5859_v36  ;;  %5392 = vmatpush3.bf16.msra.mxu0 %v5867_v61  ;;  %v928_v61 = vld [vmem:[#allocation2 + $0x18f] sm:$0xff]  ;;  %v933_v36 = vld [vmem:[#allocation2 + $0x1e7] sm:$0xff] }
 0x172   : > { %5343 = vmatprep.subr.bf16.mxu1 %v5862_v18  ;;  %5393 = vmatprep.subr.bf16.mxu0 %v5869_v19  ;;  %v920_v25 = vld [vmem:[#allocation2 + $0x10f] sm:$0xff]  ;;  %v6543_v20 = vpack.c.bf16 %v928_v61, %v927_v21 }
 0x173   : > { %v6514_v35 = vpack.c.bf16 %v920_v25, %v919_v32  ;;  %v1642_v4 = vld [vmem:[#allocation2 + $0x9] sm:$0xff]  ;;  %v1645_v8 = vld [vmem:[#allocation2 + $0x31] sm:$0xff] }
 0x174   : > { %v918_v28 = vld [vmem:[#allocation2 + $0xef] sm:$0xff]  ;;  %v1674_v7 = vpack.c.bf16 %v1643_v24, %v1642_v4  ;;  %v5875_v32 = vld [vmem:[#allocation9 + $0x118] sm:$0xff]  }
 0x175   : > { %v6509_v31 = vpack.c.bf16 %v918_v28, %v917_v29  ;;  %5344 = vmatpush3.bf16.msra.mxu1 %v5862_v18  ;;  %5394 = vmatpush3.bf16.msra.mxu0 %v5869_v19  ;;  %v934_v44 = vld [vmem:[#allocation2 + $0x1ef] sm:$0xff]  ;;  %v5874_v29 = vld [vmem:[#allocation9 + $0x120] sm:$0xff]   ;;  %v5882_v28 = vld [vmem:[#allocation9 + $0x158] sm:$0xff]  }
 0x176   : > { %5345 = vmatprep.subr.bf16.mxu1 %v5865_v22  ;;  %5395 = vmatprep.subr.bf16.mxu0 %v5870_v23  ;;  %v6565_v40 = vpack.c.bf16 %v934_v44, %v933_v36  ;;  %v1644_v54 = vld [vmem:[#allocation2 + $0x29] sm:$0xff]  ;;  %v1647_v10 = vld [vmem:[#allocation2 + $0x51] sm:$0xff] }
 0x177   : > { %5266 = vmatmul.mubr.bf16.gmra.mxu1 %v6509_v31  ;;  %5318 = vmatmul.mubr.bf16.gmra.mxu0 %v1313_v34  ;;  %v1646_v9 = vld [vmem:[#allocation2 + $0x49] sm:$0xff]  ;;  %v6570_v47 = vpack.c.bf16 %v1645_v8, %v1644_v54  ;;  %v1649_v19 = vld [vmem:[#allocation2 + $0x71] sm:$0xff] }
 0x178   : > { %5269 = vmatprep.mubr.bf16.mxu1 %v6514_v35  ;;  %5321 = vmatprep.mubr.bf16.mxu0 %v1314_v37  ;;  %v5872_v15 = vld [vmem:[#allocation9 + $0x130] sm:$0xff]   ;;  %v6572_v17 = vpack.c.bf16 %v1647_v10, %v1646_v9  ;;  %v2042_v54 = vld [vmem:[#allocation2 + $0x207] sm:$0xff] }
 0x179   : > { %5346 = vmatpush3.bf16.msra.mxu1 %v5865_v22  ;;  %5396 = vmatpush3.bf16.msra.mxu0 %v5870_v23  ;;  %v1648_v18 = vld [vmem:[#allocation2 + $0x69] sm:$0xff]  ;;  %v1651_v23 = vld [vmem:[#allocation2 + $0x91] sm:$0xff] }
 0x17a   : > { %5347 = vmatprep.subr.bf16.mxu1 %v5868_v39  ;;  %5477 = vmatprep.subr.bf16.mxu0 %v5876_v41  ;;  %v1650_v22 = vld [vmem:[#allocation2 + $0x89] sm:$0xff]  ;;  %v6578_v25 = vpack.c.bf16 %v1649_v19, %v1648_v18  ;;  %v1653_v37 = vld [vmem:[#allocation2 + $0xb1] sm:$0xff] }
 0x17b   : > { %v1652_v34 = vld [vmem:[#allocation2 + $0xa9] sm:$0xff]  ;;  %v1657_v0 = vld [vmem:[#allocation2 + $0xf1] sm:$0xff] }
 0x17c   : > { %v6586_v58 = vpack.c.bf16 %v1653_v37, %v1652_v34  ;;  %v5878_v63 = vld [vmem:[#allocation9 + $0x110] sm:$0xff]   ;;  %v2382_v18 = vld [vmem:[#allocation2 + $0x28] sm:$0xff] }
 0x17d   : > { %5348 = vmatpush3.bf16.msra.mxu1 %v5868_v39  ;;  %v1654_v39 = vld [vmem:[#allocation2 + $0xc9] sm:$0xff]  ;;  %v1659_v51 = vld [vmem:[#allocation2 + $0x111] sm:$0xff] }
 0x17e   : > { %5429 = vmatprep.subr.bf16.mxu1 %v5871_v46  ;;  %v1656_v52 = vld [vmem:[#allocation2 + $0xe9] sm:$0xff]  ;;  %v1663_v59 = vld [vmem:[#allocation2 + $0x151] sm:$0xff] }
 0x17f   : > { %5270 = vmatmul.mubr.bf16.gmra.mxu1 %v6522_v57  ;;  %5322 = vmatmul.mubr.bf16.gmra.mxu0 %v1315_v5  ;;  %v5886_v5 = vld [vmem:[#allocation9 + $0x140] sm:$0xff]   ;;  %v6594_v53 = vpack.c.bf16 %v1657_v0, %v1656_v52  ;;  %v1660_v61 = vld [vmem:[#allocation2 + $0x129] sm:$0xff]  ;;  %v1667_v36 = vld [vmem:[#allocation2 + $0x191] sm:$0xff] }
 0x180   : > { %5273 = vmatprep.mubr.bf16.mxu1 %v6527_v49  ;;  %5325 = vmatprep.mubr.bf16.mxu0 %v1316_v50  ;;  %v1658_v50 = vld [vmem:[#allocation2 + $0x109] sm:$0xff]  ;;  %v5890_v52 = vld [vmem:[#allocation9 + $0x1a0] sm:$0xff]   ;;  %v5898_v0 = vld [vmem:[#allocation9 + $0x1d8] sm:$0xff]  }
 0x181   : > { %v6596_v21 = vpack.c.bf16 %v1659_v51, %v1658_v50  ;;  %v1662_v62 = vld [vmem:[#allocation2 + $0x149] sm:$0xff] }
 0x182   : > { %v6604_v4 = vpack.c.bf16 %v1663_v59, %v1662_v62  ;;  %v1666_v24 = vld [vmem:[#allocation2 + $0x189] sm:$0xff]  ;;  %v5902_v62 = vld [vmem:[#allocation9 + $0x1c0] sm:$0xff]  }
 0x183   : > { %v1670_v8 = vld [vmem:[#allocation2 + $0x1c9] sm:$0xff] }
 0x184   : > { %v5888_v34 = vld [vmem:[#allocation9 + $0x1b0] sm:$0xff]   ;;  %v6649_v51 = vld [vmem:[#allocation2 + $0xe8] sm:$0xff] }
 0x185   : > { %v2393_v50 = vld [vmem:[#allocation2 + $0xd0] sm:$0xff]  ;;  %v6658_v59 = vld [vmem:[#allocation2 + $0x128] sm:$0xff] }
 0x187   : > { %5274 = vmatmul.mubr.bf16.gmra.mxu1 %v6535_v26  ;;  %5326 = vmatmul.mubr.bf16.gmra.mxu0 %v6541_v12 }
 0x188   : > { %5277 = vmatprep.mubr.bf16.mxu1 %v6543_v20  ;;  %5329 = vmatprep.mubr.bf16.mxu0 %v1318_v27  ;;  %v1661_v27 = vld [vmem:[#allocation2 + $0x131] sm:$0xff] }
 0x189   : > { %v6602_v1 = vpack.c.bf16 %v1661_v27, %v1660_v61  ;;  %v5894_v61 = vld [vmem:[#allocation9 + $0x190] sm:$0xff]   ;;  %v5901_v27 = vld [vmem:[#allocation9 + $0x1c8] sm:$0xff]  }
 0x18f   : > { %5278 = vmatmul.mubr.bf16.gmra.mxu1 %v6551_v14  ;;  %5330 = vmatmul.mubr.bf16.gmra.mxu0 %v6557_v43 }
 0x190   : > { %5281 = vmatprep.mubr.bf16.mxu1 %v6559_v56  ;;  %5397 = vmatprep.mubr.bf16.mxu0 %v6434_v48  ;;  %v5879_v48 = vld [vmem:[#allocation9 + $0x168] sm:$0xff]  }
 0x197   : > { %5282 = vmatmul.mubr.bf16.gmra.mxu1 %v6565_v40  ;;  %5398 = vmatmul.mubr.bf16.vlgmr.msra.gmra.mxu0 %v6436_v55  ;;  %v5880_v55 = vld [vmem:[#allocation9 + $0x160] sm:$0xff]  }
 0x198   : > { %5349 = vmatprep.mubr.bf16.mxu1 %v1674_v7  ;;  %5401 = vmatprep.mubr.bf16.mxu0 %v6469_v30  ;;  %v5873_v30 = vld [vmem:[#allocation9 + $0x128] sm:$0xff]   ;;  %v6612_v7 = vpack.c.bf16 %v1667_v36, %v1666_v24  ;;  %v2401_v24 = vld [vmem:[#allocation2 + $0x150] sm:$0xff]  ;;  %v5903_v36 = vld [vmem:[#allocation9 + $0x238] sm:$0xff]  }
 0x199   : > { %5478 = vmatpush3.bf16.msra.mxu0 %v5876_v41  ;;  %v1655_v41 = vld [vmem:[#allocation2 + $0xd1] sm:$0xff] }
 0x19a   : > { %5479 = vmatprep.subr.bf16.mxu0 %v5877_v3 }
 0x19d   : > { %5480 = vmatpush3.bf16.msra.mxu0 %v5877_v3  ;;  %v1669_v3 = vld [vmem:[#allocation2 + $0x1b1] sm:$0xff] }
 0x19e   : > { %5481 = vmatprep.subr.bf16.mxu0 %v5879_v48 }
 0x19f   : > { %5350 = vmatmul.mubr.bf16.vlgmr.msra.gmra.mxu1 %v6570_v47  ;;  %5402 = vmatmul.mubr.bf16.gmra.mxu0 %v6471_v38  ;;  %v6580_v38 = vpack.c.bf16 %v1651_v23, %v1650_v22  ;;  %v5893_v22 = vld [vmem:[#allocation9 + $0x1f0] sm:$0xff]  }
 0x1a0   : > { %5430 = vmatpush3.bf16.msra.mxu1 %v5871_v46  ;;  %5353 = vmatprep.mubr.bf16.mxu1 %v6572_v17  ;;  %v5885_v46 = vld [vmem:[#allocation9 + $0x148] sm:$0xff]   ;;  %v2385_v23 = vld [vmem:[#allocation2 + $0x50] sm:$0xff] }
 0x1a1   : > { %5431 = vmatprep.subr.bf16.mxu1 %v5872_v15  ;;  %5405 = vmatprep.mubr.bf16.mxu0 %v6500_v13  ;;  %v5883_v13 = vld [vmem:[#allocation9 + $0x150] sm:$0xff]  }
 0x1a2   : > { %5482 = vmatpush3.bf16.msra.mxu0 %v5879_v48  ;;  %v1671_v48 = vld [vmem:[#allocation2 + $0x1d1] sm:$0xff] }
 0x1a3   : > { %5483 = vmatprep.subr.bf16.mxu0 %v5880_v55 }
 0x1a4   : > { %5432 = vmatpush3.bf16.msra.mxu1 %v5872_v15  ;;  %v6622_v15 = vpack.c.bf16 %v1671_v48, %v1670_v8  ;;  %v2783_v8 = vld [vmem:[#allocation2 + $0x211] sm:$0xff] }
 0x1a5   : > { %5433 = vmatprep.subr.bf16.mxu1 %v5873_v30 }
 0x1a6   : > { %5484 = vmatpush3.bf16.msra.mxu0 %v5880_v55  ;;  %v2383_v55 = vld [vmem:[#allocation2 + $0x30] sm:$0xff] }
 0x1a7   : > { %5354 = vmatmul.mubr.bf16.gmra.mxu1 %v6578_v25  ;;  %5406 = vmatmul.mubr.bf16.gmra.mxu0 %v6503_v16  ;;  %v6588_v16 = vpack.c.bf16 %v1655_v41, %v1654_v39  ;;  %v2414_v19 = vpack.c.bf16 %v2383_v55, %v2382_v18  ;;  %v2389_v39 = vld [vmem:[#allocation2 + $0x90] sm:$0xff] }
 0x1a8   : > { %5357 = vmatprep.mubr.bf16.mxu1 %v6580_v38  ;;  %5434 = vmatpush3.bf16.msra.mxu1 %v5873_v30  ;;  %v2391_v41 = vld [vmem:[#allocation2 + $0xb0] sm:$0xff] }
 0x1a9   : > { %5409 = vmatprep.mubr.bf16.mxu0 %v6509_v31  ;;  %5435 = vmatprep.subr.bf16.mxu1 %v5874_v29  ;;  %v5881_v31 = vld [vmem:[#allocation9 + $0x108] sm:$0xff]  }
 0x1aa   : > { %5485 = vmatprep.subr.bf16.mxu0 %v5882_v28 }
 0x1ab   : > { %5486 = vmatpush3.bf16.msra.mxu0 %v5882_v28  ;;  %v2384_v28 = vld [vmem:[#allocation2 + $0x48] sm:$0xff] }
 0x1ac   : > { %5436 = vmatpush3.bf16.msra.mxu1 %v5874_v29  ;;  %5487 = vmatprep.subr.bf16.mxu0 %v5883_v13  ;;  %v5895_v29 = vld [vmem:[#allocation9 + $0x1e8] sm:$0xff]  }
 0x1ad   : > { %5437 = vmatprep.subr.bf16.mxu1 %v5875_v32 }
 0x1af   : > { %5358 = vmatmul.mubr.bf16.gmra.mxu1 %v6586_v58  ;;  %5410 = vmatmul.mubr.bf16.gmra.mxu0 %v6514_v35  ;;  %v5884_v35 = vld [vmem:[#allocation9 + $0x100] sm:$0xff]  }
 0x1b0   : > { %5361 = vmatprep.mubr.bf16.mxu1 %v6588_v16  ;;  %5413 = vmatprep.mubr.bf16.mxu0 %v6522_v57  ;;  %v5892_v57 = vld [vmem:[#allocation9 + $0x1f8] sm:$0xff]  }
 0x1b1   : > { %5438 = vmatpush3.bf16.msra.mxu1 %v5875_v32  ;;  %5488 = vmatpush3.bf16.msra.mxu0 %v5883_v13  ;;  %v6633_v13 = vpack.c.bf16 %v2385_v23, %v2384_v28  ;;  %v2386_v32 = vld [vmem:[#allocation2 + $0x68] sm:$0xff] }
 0x1b2   : > { %5439 = vmatprep.subr.bf16.mxu1 %v5878_v63  ;;  %5489 = vmatprep.subr.bf16.mxu0 %v5885_v46  ;;  %v3127_v23 = vld [vmem:[#allocation2 + $0x87] sm:$0xff] }
 0x1b5   : > { %5440 = vmatpush3.bf16.msra.mxu1 %v5878_v63  ;;  %5490 = vmatpush3.bf16.msra.mxu0 %v5885_v46  ;;  %v2388_v63 = vld [vmem:[#allocation2 + $0x88] sm:$0xff] }
 0x1b6   : > { %5441 = vmatprep.subr.bf16.mxu1 %v5881_v31  ;;  %5491 = vmatprep.subr.bf16.mxu0 %v5886_v5  ;;  %v6641_v46 = vpack.c.bf16 %v2389_v39, %v2388_v63  ;;  %v3504_v39 = vld [vmem:[#allocation2 + $0xf0] sm:$0xff] }
 0x1b7   : > { %5362 = vmatmul.mubr.bf16.gmra.mxu1 %v6594_v53  ;;  %5414 = vmatmul.mubr.bf16.gmra.mxu0 %v6527_v49  ;;  %v1664_v49 = vld [vmem:[#allocation2 + $0x169] sm:$0xff] }
 0x1b8   : > { %5365 = vmatprep.mubr.bf16.mxu1 %v6596_v21  ;;  %5417 = vmatprep.mubr.bf16.mxu0 %v6535_v26  ;;  %v1665_v26 = vld [vmem:[#allocation2 + $0x171] sm:$0xff] }
 0x1b9   : > { %5442 = vmatpush3.bf16.msra.mxu1 %v5881_v31  ;;  %5492 = vmatpush3.bf16.msra.mxu0 %v5886_v5  ;;  %v6610_v44 = vpack.c.bf16 %v1665_v26, %v1664_v49  ;;  %v2390_v31 = vld [vmem:[#allocation2 + $0xa8] sm:$0xff]  ;;  %v5891_v5 = vld [vmem:[#allocation9 + $0x198] sm:$0xff]   ;;  %v5900_v26 = vld [vmem:[#allocation9 + $0x180] sm:$0xff]  }
 0x1ba   : > { %5443 = vmatprep.subr.bf16.mxu1 %v5884_v35  ;;  %5573 = vmatprep.subr.bf16.mxu0 %v5892_v57  ;;  %v2396_v49 = vld [vmem:[#allocation2 + $0x108] sm:$0xff] }
 0x1bb   : > { %v3132_v63 = vld [vmem:[#allocation2 + $0xcf] sm:$0xff] }
 0x1bd   : > { %5444 = vmatpush3.bf16.msra.mxu1 %v5884_v35  ;;  %v2392_v35 = vld [vmem:[#allocation2 + $0xc8] sm:$0xff] }
 0x1be   : > { %5525 = vmatprep.subr.bf16.mxu1 %v5887_v33 }
 0x1bf   : > { %5366 = vmatmul.mubr.bf16.gmra.mxu1 %v6602_v1  ;;  %5418 = vmatmul.mubr.bf16.gmra.mxu0 %v6543_v20  ;;  %v1668_v20 = vld [vmem:[#allocation2 + $0x1a9] sm:$0xff] }
 0x1c0   : > { %5369 = vmatprep.mubr.bf16.mxu1 %v6604_v4  ;;  %5421 = vmatprep.mubr.bf16.mxu0 %v6551_v14  ;;  %v2043_v14 = vld [vmem:[#allocation2 + $0x20f] sm:$0xff]  ;;  %v6618_v9 = vpack.c.bf16 %v1669_v3, %v1668_v20 }
 0x1c1   : > { %v6620_v10 = vpack.c.bf16 %v2043_v14, %v2042_v54  ;;  %v6667_v20 = vld [vmem:[#allocation2 + $0x168] sm:$0xff] }
 0x1c2   : > { %v2782_v14 = vld [vmem:[#allocation2 + $0x209] sm:$0xff] }
 0x1c3   : > { %v6686_v48 = vpack.c.bf16 %v2783_v8, %v2782_v14  ;;  %v3135_v8 = vld [vmem:[#allocation2 + $0x107] sm:$0xff] }
 0x1c7   : > { %5370 = vmatmul.mubr.bf16.gmra.mxu1 %v6610_v44  ;;  %5422 = vmatmul.mubr.bf16.gmra.mxu0 %v6559_v56  ;;  %v1672_v56 = vld [vmem:[#allocation2 + $0x1e9] sm:$0xff] }
 0x1c8   : > { %5373 = vmatprep.mubr.bf16.mxu1 %v6612_v7  ;;  %5425 = vmatprep.mubr.bf16.mxu0 %v6565_v40  ;;  %v1673_v40 = vld [vmem:[#allocation2 + $0x1f1] sm:$0xff] }
 0x1c9   : > { %v6628_v30 = vpack.c.bf16 %v1673_v40, %v1672_v56  ;;  %v3123_v56 = vld [vmem:[#allocation2 + $0x47] sm:$0xff] }
 0x1cf   : > { %5374 = vmatmul.mubr.bf16.gmra.mxu1 %v6618_v9  ;;  %5426 = vmatmul.mubr.bf16.gmra.mxu0 %v6620_v10 }
 0x1d0   : > { %5377 = vmatprep.mubr.bf16.mxu1 %v6622_v15  ;;  %5493 = vmatprep.mubr.bf16.mxu0 %v6570_v47  ;;  %v2387_v47 = vld [vmem:[#allocation2 + $0x70] sm:$0xff] }
 0x1d1   : > { %v6635_v37 = vpack.c.bf16 %v2387_v47, %v2386_v32  ;;  %v5904_v47 = vld [vmem:[#allocation9 + $0x230] sm:$0xff]  }
 0x1d7   : > { %5378 = vmatmul.mubr.bf16.gmra.mxu1 %v6628_v30  ;;  %5494 = vmatmul.mubr.bf16.vlgmr.msra.gmra.mxu0 %v6572_v17  ;;  %v5896_v17 = vld [vmem:[#allocation9 + $0x1e0] sm:$0xff]  }
 0x1d8   : > { %5445 = vmatprep.mubr.bf16.mxu1 %v2414_v19  ;;  %5497 = vmatprep.mubr.bf16.mxu0 %v6578_v25  ;;  %v5889_v25 = vld [vmem:[#allocation9 + $0x1a8] sm:$0xff]  }
 0x1d9   : > { %5574 = vmatpush3.bf16.msra.mxu0 %v5892_v57  ;;  %v6651_v57 = vpack.c.bf16 %v2393_v50, %v2392_v35  ;;  %v3125_v19 = vld [vmem:[#allocation2 + $0x67] sm:$0xff]  ;;  %v3530_v50 = vpack.c.bf16 %v3504_v39, %v6649_v51 }
 0x1da   : > { %5575 = vmatprep.subr.bf16.mxu0 %v5893_v22  ;;  %v5906_v35 = vld [vmem:[#allocation9 + $0x220] sm:$0xff]  }
 0x1dd   : > { %5576 = vmatpush3.bf16.msra.mxu0 %v5893_v22 }
 0x1de   : > { %5577 = vmatprep.subr.bf16.mxu0 %v5895_v29 }
 0x1df   : > { %5446 = vmatmul.mubr.bf16.vlgmr.msra.gmra.mxu1 %v6633_v13  ;;  %5498 = vmatmul.mubr.bf16.gmra.mxu0 %v6580_v38  ;;  %v6643_v38 = vpack.c.bf16 %v2391_v41, %v2390_v31 }
 0x1e0   : > { %5526 = vmatpush3.bf16.msra.mxu1 %v5887_v33  ;;  %5449 = vmatprep.mubr.bf16.mxu1 %v6635_v37  ;;  %v5897_v33 = vld [vmem:[#allocation9 + $0x188] sm:$0xff]  }
 0x1e1   : > { %5527 = vmatprep.subr.bf16.mxu1 %v5888_v34  ;;  %5501 = vmatprep.mubr.bf16.mxu0 %v6586_v58  ;;  %v5899_v58 = vld [vmem:[#allocation9 + $0x1d0] sm:$0xff]  }
 0x1e2   : > { %5578 = vmatpush3.bf16.msra.mxu0 %v5895_v29 }
 0x1e3   : > { %5579 = vmatprep.subr.bf16.mxu0 %v5896_v17 }
 0x1e4   : > { %5528 = vmatpush3.bf16.msra.mxu1 %v5888_v34 }
 0x1e5   : > { %5529 = vmatprep.subr.bf16.mxu1 %v5889_v25 }
 0x1e6   : > { %5580 = vmatpush3.bf16.msra.mxu0 %v5896_v17 }
 0x1e7   : > { %5450 = vmatmul.mubr.bf16.gmra.mxu1 %v6641_v46  ;;  %5502 = vmatmul.mubr.bf16.gmra.mxu0 %v6588_v16  ;;  %v2420_v16 = vpack.c.bf16 %v6494_v6, %v6649_v51  ;;  %v3134_v51 = vld [vmem:[#allocation2 + $0xef] sm:$0xff] }
 0x1e8   : > { %5453 = vmatprep.mubr.bf16.mxu1 %v6643_v38  ;;  %5530 = vmatpush3.bf16.msra.mxu1 %v5889_v25  ;;  %v3130_v25 = vld [vmem:[#allocation2 + $0xaf] sm:$0xff] }
 0x1e9   : > { %5505 = vmatprep.mubr.bf16.mxu0 %v6594_v53  ;;  %5531 = vmatprep.subr.bf16.mxu1 %v5890_v52  ;;  %v2397_v53 = vld [vmem:[#allocation2 + $0x110] sm:$0xff] }
 0x1ea   : > { %5581 = vmatprep.subr.bf16.mxu0 %v5898_v0  ;;  %v6660_v6 = vpack.c.bf16 %v2397_v53, %v2396_v49  ;;  %v5907_v49 = vld [vmem:[#allocation9 + $0x218] sm:$0xff]  }
 0x1eb   : > { %5582 = vmatpush3.bf16.msra.mxu0 %v5898_v0 }
 0x1ec   : > { %5532 = vmatpush3.bf16.msra.mxu1 %v5890_v52  ;;  %5583 = vmatprep.subr.bf16.mxu0 %v5899_v58  ;;  %v3129_v52 = vld [vmem:[#allocation2 + $0xa7] sm:$0xff] }
 0x1ed   : > { %5533 = vmatprep.subr.bf16.mxu1 %v5891_v5  ;;  %v3158_v0 = vpack.c.bf16 %v3130_v25, %v3129_v52 }
 0x1ef   : > { %5454 = vmatmul.mubr.bf16.gmra.mxu1 %v6651_v57  ;;  %5506 = vmatmul.mubr.bf16.gmra.mxu0 %v6596_v21  ;;  %v2422_v21 = vpack.c.bf16 %v6398_v11, %v6658_v59  ;;  %v2424_v11 = vpack.c.bf16 %v6427_v42, %v6667_v20  ;;  %v6682_v42 = vld [vmem:[#allocation2 + $0x1c8] sm:$0xff] }
 0x1f0   : > { %5457 = vmatprep.mubr.bf16.mxu1 %v2420_v16  ;;  %5509 = vmatprep.mubr.bf16.mxu0 %v6602_v1  ;;  %v2400_v1 = vld [vmem:[#allocation2 + $0x148] sm:$0xff] }
 0x1f1   : > { %5534 = vmatpush3.bf16.msra.mxu1 %v5891_v5  ;;  %5584 = vmatpush3.bf16.msra.mxu0 %v5899_v58  ;;  %v6669_v3 = vpack.c.bf16 %v2401_v24, %v2400_v1  ;;  %v3131_v58 = vld [vmem:[#allocation2 + $0xc7] sm:$0xff]  ;;  %v3136_v24 = vld [vmem:[#allocation2 + $0x10f] sm:$0xff] }
 0x1f2   : > { %5535 = vmatprep.subr.bf16.mxu1 %v5894_v61  ;;  %5585 = vmatprep.subr.bf16.mxu0 %v5901_v27  ;;  %v3159_v16 = vpack.c.bf16 %v3132_v63, %v3131_v58 }
 0x1f5   : > { %5536 = vmatpush3.bf16.msra.mxu1 %v5894_v61  ;;  %5586 = vmatpush3.bf16.msra.mxu0 %v5901_v27 }
 0x1f6   : > { %5537 = vmatprep.subr.bf16.mxu1 %v5897_v33  ;;  %5587 = vmatprep.subr.bf16.mxu0 %v5902_v62 }
 0x1f7   : > { %5458 = vmatmul.mubr.bf16.gmra.mxu1 %v6660_v6  ;;  %5510 = vmatmul.mubr.bf16.gmra.mxu0 %v6604_v4  ;;  %v2404_v4 = vld [vmem:[#allocation2 + $0x188] sm:$0xff] }
 0x1f8   : > { %5461 = vmatprep.mubr.bf16.mxu1 %v2422_v21  ;;  %5513 = vmatprep.mubr.bf16.mxu0 %v6610_v44  ;;  %v2405_v44 = vld [vmem:[#allocation2 + $0x190] sm:$0xff] }
 0x1f9   : > { %5538 = vmatpush3.bf16.msra.mxu1 %v5897_v33  ;;  %5588 = vmatpush3.bf16.msra.mxu0 %v5902_v62  ;;  %v6676_v54 = vpack.c.bf16 %v2405_v44, %v2404_v4  ;;  %v3133_v4 = vld [vmem:[#allocation2 + $0xe7] sm:$0xff] }
 0x1fa   : > { %5539 = vmatprep.subr.bf16.mxu1 %v5900_v26  ;;  %v3160_v14 = vpack.c.bf16 %v3134_v51, %v3133_v4 }
 0x1fd   : > { %5540 = vmatpush3.bf16.msra.mxu1 %v5900_v26  ;;  %v3508_v26 = vld [vmem:[#allocation2 + $0x130] sm:$0xff] }
 0x1fe   : > { %5621 = vmatprep.subr.bf16.mxu1 %v5903_v36 }
 0x1ff   : > { %5462 = vmatmul.mubr.bf16.gmra.mxu1 %v6669_v3  ;;  %5514 = vmatmul.mubr.bf16.gmra.mxu0 %v6612_v7  ;;  %v2427_v7 = vpack.c.bf16 %v6456_v45, %v6682_v42 }
 0x200   : > { %5465 = vmatprep.mubr.bf16.mxu1 %v2424_v11  ;;  %5517 = vmatprep.mubr.bf16.mxu0 %v6618_v9  ;;  %v6691_v9 = vld [vmem:[#allocation2 + $0x208] sm:$0xff] }
 0x207   : > { %5466 = vmatmul.mubr.bf16.gmra.mxu1 %v6676_v54  ;;  %5518 = vmatmul.mubr.bf16.gmra.mxu0 %v6622_v15  ;;  %v2429_v15 = vpack.c.bf16 %v733_v2, %v6691_v9 }
 0x208   : > { %5469 = vmatprep.mubr.bf16.mxu1 %v6541_v12  ;;  %5521 = vmatprep.mubr.bf16.mxu0 %v6628_v30  ;;  %v3124_v12 = vld [vmem:[#allocation2 + $0x4f] sm:$0xff] }
 0x209   : > { %v3155_v40 = vpack.c.bf16 %v3124_v12, %v3123_v56  ;;  %v3128_v30 = vld [vmem:[#allocation2 + $0x8f] sm:$0xff] }
 0x20a   : > { %v3157_v60 = vpack.c.bf16 %v3128_v30, %v3127_v23  ;;  %v5908_v56 = vld [vmem:[#allocation9 + $0x210] sm:$0xff]   ;;  %v3137_v30 = vld [vmem:[#allocation2 + $0x127] sm:$0xff] }
 0x20b   : > { %v5909_v23 = vld [vmem:[#allocation9 + $0x208] sm:$0xff]  }
 0x20f   : > { %5470 = vmatmul.mubr.bf16.gmra.mxu1 %v2427_v7  ;;  %5522 = vmatmul.mubr.bf16.gmra.mxu0 %v6686_v48 }
 0x210   : > { %5473 = vmatprep.mubr.bf16.mxu1 %v6557_v43  ;;  %5589 = vmatprep.mubr.bf16.mxu0 %v6633_v13  ;;  %v3126_v43 = vld [vmem:[#allocation2 + $0x6f] sm:$0xff] }
 0x211   : > { %v3156_v22 = vpack.c.bf16 %v3126_v43, %v3125_v19 }
 0x217   : > { %5474 = vmatmul.mubr.bf16.gmra.mxu1 %v2429_v15  ;;  %v5303_v45 = vpop.f32.mrf.mxu0  ;;  %5590 = vmatmul.mubr.bf16.vlgmr.msra.gmra.mxu0 %v6635_v37  ;;  %v5905_v37 = vld [vmem:[#allocation9 + $0x228] sm:$0xff]   ;;  %v3161_v15 = vpack.c.bf16 %v3136_v24, %v3135_v8 }
 0x218   : > { %5541 = vmatprep.mubr.bf16.mxu1 %v3155_v40  ;;  %5593 = vmatprep.mubr.bf16.mxu0 %v6641_v46 }
 0x219   : > { %v1451_v55 = vpop.f32.mrf.mxu0 }
 0x21b   : > { %v5304_v18 = vpop.f32.mrf.mxu0 }
 0x21d   : > { %v1454_v29 = vpop.f32.mrf.mxu0 }
 0x21f   : > { %v5255_v2 = vpop.f32.mrf.mxu1  ;;  %5542 = vmatmul.mubr.bf16.vlgmr.msra.gmra.mxu1 %v3156_v22  ;;  %v5307_v28 = vpop.f32.mrf.mxu0  ;;  %5594 = vmatmul.mubr.bf16.gmra.mxu0 %v6643_v38  ;;  %v3512_v22 = vld [vmem:[#allocation2 + $0x170] sm:$0xff] }
 0x220   : > { %v6699_v13 = vadd.f32 %v5303_v45, %v5255_v2  ;;  %5622 = vmatpush3.bf16.msra.mxu1 %v5903_v36  ;;  %5545 = vmatprep.mubr.bf16.mxu1 %v3157_v60  ;;  %v3140_v60 = vld [vmem:[#allocation2 + $0x14f] sm:$0xff] }
 0x221   : > { %v1081_v32 = vpop.f32.mrf.mxu1  ;;  %5623 = vmatprep.subr.bf16.mxu1 %v5904_v47  ;;  %5597 = vmatprep.mubr.bf16.mxu0 %v6651_v57  ;;  %v1467_v34 = vpop.f32.mrf.mxu0 }
 0x222   : > { %v6702_v17 = vadd.f32 %v1451_v55, %v1081_v32 }
 0x223   : > { %v5256_v41 = vpop.f32.mrf.mxu1  ;;  %v5308_v46 = vpop.f32.mrf.mxu0 }
 0x224   : > { %v6704_v31 = vadd.f32 %v5304_v18, %v5256_v41  ;;  %5624 = vmatpush3.bf16.msra.mxu1 %v5904_v47  ;;  %v3139_v47 = vld [vmem:[#allocation2 + $0x147] sm:$0xff] }
 0x225   : > { %v1084_v38 = vpop.f32.mrf.mxu1  ;;  %v1470_v5 = vpop.f32.mrf.mxu0  ;;  %5625 = vmatprep.subr.bf16.mxu1 %v5905_v37  ;;  %v3163_v39 = vpack.c.bf16 %v3140_v60, %v3139_v47  ;;  %v5910_v41 = vld [vmem:[#allocation9 + $0x200] sm:$0xff]  }
 0x226   : > { %v6707_v57 = vadd.f32 %v1454_v29, %v1084_v38 }
 0x227   : > { %v5259_v61 = vpop.f32.mrf.mxu1  ;;  %5546 = vmatmul.mubr.bf16.gmra.mxu1 %v3158_v0  ;;  %v5311_v27 = vpop.f32.mrf.mxu0  ;;  %5598 = vmatmul.mubr.bf16.gmra.mxu0 %v3530_v50  ;;  %v3141_v0 = vld [vmem:[#allocation2 + $0x167] sm:$0xff] }
 0x228   : > { %v6709_v53 = vadd.f32 %v5307_v28, %v5259_v61  ;;  %5549 = vmatprep.mubr.bf16.mxu1 %v3159_v16  ;;  %5626 = vmatpush3.bf16.msra.mxu1 %v5905_v37  ;;  %v3515_v50 = vld [vmem:[#allocation2 + $0x1a8] sm:$0xff] }
 0x229   : > { %v1097_v33 = vpop.f32.mrf.mxu1  ;;  %5601 = vmatprep.mubr.bf16.mxu0 %v6660_v6  ;;  %v1483_v62 = vpop.f32.mrf.mxu0  ;;  %5627 = vmatprep.subr.bf16.mxu1 %v5906_v35  ;;  %v3532_v6 = vpack.c.bf16 %v3508_v26, %v6658_v59  ;;  %v3138_v59 = vld [vmem:[#allocation2 + $0x12f] sm:$0xff]  ;;  %v3143_v61 = vld [vmem:[#allocation2 + $0x187] sm:$0xff] }
 0x22a   : > { %v6712_v21 = vadd.f32 %v1467_v34, %v1097_v33  ;;  %v3162_v34 = vpack.c.bf16 %v3138_v59, %v3137_v30  ;;  %v3148_v59 = vld [vmem:[#allocation2 + $0x1cf] sm:$0xff] }
 0x22b   : > { %v5260_v1 = vpop.f32.mrf.mxu1  ;;  %v5312_v36 = vpop.f32.mrf.mxu0 }
 0x22c   : > { %v6714_v11 = vadd.f32 %v5308_v46, %v5260_v1  ;;  %5628 = vmatpush3.bf16.msra.mxu1 %v5906_v35  ;;  %v3516_v35 = vld [vmem:[#allocation2 + $0x1b0] sm:$0xff] }
 0x22d   : > { %v1100_v44 = vpop.f32.mrf.mxu1  ;;  %v1486_v7 = vpop.f32.mrf.mxu0  ;;  %5629 = vmatprep.subr.bf16.mxu1 %v5907_v49  ;;  %v3536_v1 = vpack.c.bf16 %v3516_v35, %v3515_v50  ;;  %v5935_v50 = vld [vmem:[#allocation2] sm:$0xff] }
 0x22e   : > { %v6717_v12 = vadd.f32 %v1470_v5, %v1100_v44  ;;  %v3142_v5 = vld [vmem:[#allocation2 + $0x16f] sm:$0xff]  ;;  %v3540_v35 = vpack.c.bf16 %v5935_v50, %v5935_v50 }
 0x22f   : > { %v5263_v40 = vpop.f32.mrf.mxu1  ;;  %5550 = vmatmul.mubr.bf16.gmra.mxu1 %v3160_v14  ;;  %v5315_v45 = vpop.f32.mrf.mxu0  ;;  %5602 = vmatmul.mubr.bf16.gmra.mxu0 %v3532_v6  ;;  %v3164_v26 = vpack.c.bf16 %v3142_v5, %v3141_v0  ;;  %v3145_v6 = vld [vmem:[#allocation2 + $0x1a7] sm:$0xff]  ;;  %v3150_v0 = vld [vmem:[#allocation2 + $0x1ef] sm:$0xff] }
 0x230   : > { %v6719_v55 = vadd.f32 %v5311_v27, %v5263_v40  ;;  %5553 = vmatprep.mubr.bf16.mxu1 %v3161_v15  ;;  %5605 = vmatprep.mubr.bf16.mxu0 %v6669_v3  ;;  %v3534_v3 = vpack.c.bf16 %v3512_v22, %v6667_v20  ;;  %v3144_v27 = vld [vmem:[#allocation2 + $0x18f] sm:$0xff] }
 0x231   : > { %v1113_v43 = vpop.f32.mrf.mxu1  ;;  %v1499_v18 = vpop.f32.mrf.mxu0  ;;  %5630 = vmatpush3.bf16.msra.mxu1 %v5907_v49  ;;  %v3146_v40 = vld [vmem:[#allocation2 + $0x1af] sm:$0xff] }
 0x232   : > { %v6722_v19 = vadd.f32 %v1483_v62, %v1113_v43  ;;  %5631 = vmatprep.subr.bf16.mxu1 %v5908_v56  ;;  %v3518_v62 = vld [vmem:[#allocation2 + $0x1d0] sm:$0xff]  ;;  %v3166_v47 = vpack.c.bf16 %v3146_v40, %v3145_v6 }
 0x233   : > { %v5264_v29 = vpop.f32.mrf.mxu1  ;;  %v5316_v2 = vpop.f32.mrf.mxu0  ;;  %v3537_v4 = vpack.c.bf16 %v3518_v62, %v6682_v42  ;;  %v3520_v43 = vld [vmem:[#allocation2 + $0x1f0] sm:$0xff] }
 0x234   : > { %v6724_v28 = vadd.f32 %v5312_v36, %v5264_v29  ;;  %v3165_v36 = vpack.c.bf16 %v3144_v27, %v3143_v61  ;;  %v3522_v22 = vld [vmem:[#allocation2 + $0x210] sm:$0xff] }
 0x235   : > { %v1116_v32 = vpop.f32.mrf.mxu1  ;;  %v1502_v37 = vpop.f32.mrf.mxu0  ;;  %5632 = vmatpush3.bf16.msra.mxu1 %v5908_v56  ;;  %v3863_v6 = vld [vmem:[#allocation2 + $0x49] sm:$0xff] }
 0x236   : > { %v6727_v25 = vadd.f32 %v1486_v7, %v1116_v32  ;;  %5633 = vmatprep.subr.bf16.mxu1 %v5909_v23 }
 0x237   : > { %v5267_v63 = vpop.f32.mrf.mxu1  ;;  %5554 = vmatmul.mubr.bf16.gmra.mxu1 %v3162_v34  ;;  %v5319_v46 = vpop.f32.mrf.mxu0  ;;  %5606 = vmatmul.mubr.bf16.gmra.mxu0 %v3534_v3  ;;  %v3539_v34 = vpack.c.bf16 %v3522_v22, %v6691_v9 }
 0x238   : > { %v6729_v52 = vadd.f32 %v5315_v45, %v5267_v63  ;;  %5557 = vmatprep.mubr.bf16.mxu1 %v3163_v39  ;;  %5609 = vmatprep.mubr.bf16.mxu0 %v6676_v54  ;;  %v3519_v45 = vld [vmem:[#allocation2 + $0x1e8] sm:$0xff] }
 0x239   : > { %v1129_v38 = vpop.f32.mrf.mxu1  ;;  %v1515_v58 = vpop.f32.mrf.mxu0  ;;  %5634 = vmatpush3.bf16.msra.mxu1 %v5909_v23 }
 0x23a   : > { %v6732_v20 = vadd.f32 %v1499_v18, %v1129_v38  ;;  %5635 = vmatprep.subr.bf16.mxu1 %v5910_v41  ;;  %v3147_v18 = vld [vmem:[#allocation2 + $0x1c7] sm:$0xff] }
 0x23b   : > { %v5268_v16 = vpop.f32.mrf.mxu1  ;;  %v5320_v33 = vpop.f32.mrf.mxu0  ;;  %v3167_v32 = vpack.c.bf16 %v3148_v59, %v3147_v18  ;;  %v3149_v38 = vld [vmem:[#allocation2 + $0x1e7] sm:$0xff] }
 0x23c   : > { %v6734_v49 = vadd.f32 %v5316_v2, %v5268_v16  ;;  %v3538_v2 = vpack.c.bf16 %v3520_v43, %v3519_v45  ;;  %v3168_v61 = vpack.c.bf16 %v3150_v0, %v3149_v38 }
 0x23d   : > { %v1132_v51 = vpop.f32.mrf.mxu1  ;;  %v6736_v54 = vpop.f32.mrf.mxu0  ;;  %5636 = vmatpush3.bf16.msra.mxu1 %v5910_v41 }
 0x23e   : > { %v6738_v24 = vadd.f32 %v1502_v37, %v1132_v51 }
 0x23f   : > { %v5271_v44 = vpop.f32.mrf.mxu1  ;;  %5558 = vmatmul.mubr.bf16.gmra.mxu1 %v3164_v26  ;;  %v5323_v14 = vpop.f32.mrf.mxu0  ;;  %5610 = vmatmul.mubr.bf16.gmra.mxu0 %v3536_v1  ;;  %v3153_v26 = vld [vmem:[#allocation2 + $0x227] sm:$0xff]  ;;  %v3154_v1 = vld [vmem:[#allocation2 + $0x22f] sm:$0xff] }
 0x240   : > { %v6741_v8 = vadd.f32 %v5319_v46, %v5271_v44  ;;  %5561 = vmatprep.mubr.bf16.mxu1 %v3165_v36  ;;  %5613 = vmatprep.mubr.bf16.mxu0 %v3537_v4 }
 0x241   : > { %v1145_v7 = vpop.f32.mrf.mxu1  ;;  %v1531_v15 = vpop.f32.mrf.mxu0 }
 0x242   : > { %v6743_v56 = vadd.f32 %v1515_v58, %v1145_v7  ;;  %v3170_v7 = vpack.c.bf16 %v3154_v1, %v3153_v26 }
 0x243   : > { %v5272_v30 = vpop.f32.mrf.mxu1  ;;  %v5324_v42 = vpop.f32.mrf.mxu0 }
 0x244   : > { %v6745_v23 = vadd.f32 %v5320_v33, %v5272_v30 }
 0x245   : > { %v6747_v29 = vpop.f32.mrf.mxu1  ;;  %v6749_v60 = vpop.f32.mrf.mxu0 }
 0x247   : > { %v5275_v37 = vpop.f32.mrf.mxu1  ;;  %5562 = vmatmul.mubr.bf16.gmra.mxu1 %v3166_v47  ;;  %v5327_v3 = vpop.f32.mrf.mxu0  ;;  %5614 = vmatmul.mubr.bf16.gmra.mxu0 %v3538_v2 }
 0x248   : > { %v6752_v39 = vadd.f32 %v5323_v14, %v5275_v37  ;;  %5565 = vmatprep.mubr.bf16.mxu1 %v3167_v32  ;;  %5617 = vmatprep.mubr.bf16.mxu0 %v3539_v34  ;;  %v3865_v32 = vld [vmem:[#allocation2 + $0x69] sm:$0xff]  ;;  %v3866_v34 = vld [vmem:[#allocation2 + $0x71] sm:$0xff] }
 0x249   : > { %v1161_v41 = vpop.f32.mrf.mxu1  ;;  %v1547_v63 = vpop.f32.mrf.mxu0 }
 0x24a   : > { %v6754_v46 = vadd.f32 %v1531_v15, %v1161_v41  ;;  %v3864_v15 = vld [vmem:[#allocation2 + $0x51] sm:$0xff] }
 0x24b   : > { %v5276_v58 = vpop.f32.mrf.mxu1  ;;  %v5328_v5 = vpop.f32.mrf.mxu0  ;;  %v3895_v18 = vpack.c.bf16 %v3864_v15, %v3863_v6  ;;  %v3868_v41 = vld [vmem:[#allocation2 + $0x91] sm:$0xff]  ;;  %v3871_v6 = vld [vmem:[#allocation2 + $0xc9] sm:$0xff] }
 0x24c   : > { %v6756_v16 = vadd.f32 %v5324_v42, %v5276_v58  ;;  %v3896_v58 = vpack.c.bf16 %v3866_v34, %v3865_v32  ;;  %v3872_v15 = vld [vmem:[#allocation2 + $0xd1] sm:$0xff] }
 0x24d   : > { %v6758_v9 = vpop.f32.mrf.mxu1  ;;  %v6760_v27 = vpop.f32.mrf.mxu0 }
 0x24f   : > { %v5279_v33 = vpop.f32.mrf.mxu1  ;;  %5566 = vmatmul.mubr.bf16.gmra.mxu1 %v3168_v61  ;;  %v5331_v62 = vpop.f32.mrf.mxu0  ;;  %5618 = vmatmul.mubr.bf16.gmra.mxu0 %v3540_v35 }
 0x250   : > { %v6762_v51 = vadd.f32 %v5327_v3, %v5279_v33  ;;  %5569 = vmatprep.mubr.bf16.mxu1 %v6620_v10  ;;  %v3867_v3 = vld [vmem:[#allocation2 + $0x89] sm:$0xff] }
 0x251   : > { %v1177_v36 = vpop.f32.mrf.mxu1  ;;  %v1563_v4 = vpop.f32.mrf.mxu0  ;;  %v3897_v50 = vpack.c.bf16 %v3868_v41, %v3867_v3 }
 0x252   : > { %v6765_v44 = vadd.f32 %v1547_v63, %v1177_v36 }
 0x253   : > { %v5280_v14 = vpop.f32.mrf.mxu1  ;;  %v5332_v40 = vpop.f32.mrf.mxu0 }
 0x254   : > { %v6767_v45 = vadd.f32 %v5328_v5, %v5280_v14  ;;  %v3870_v14 = vld [vmem:[#allocation2 + $0xb1] sm:$0xff] }
 0x255   : > { %v6769_v43 = vpop.f32.mrf.mxu1  ;;  %v6771_v30 = vpop.f32.mrf.mxu0 }
 0x257   : > { %v5283_v59 = vpop.f32.mrf.mxu1  ;;  %5570 = vmatmul.mubr.bf16.gmra.mxu1 %v3170_v7  ;;  %v5399_v10 = vpop.f32.mrf.mxu0 }
 0x258   : > { %v6773_v42 = vadd.f32 %v5331_v62, %v5283_v59  ;;  %5637 = vmatprep.mubr.bf16.mxu1 %v3895_v18 }
 0x259   : > { %v1193_v22 = vpop.f32.mrf.mxu1  ;;  %v2191_v47 = vpop.f32.mrf.mxu0 }
 0x25a   : > { %v6775_v2 = vadd.f32 %v1563_v4, %v1193_v22  ;;  %v3869_v4 = vld [vmem:[#allocation2 + $0xa9] sm:$0xff] }
 0x25b   : > { %v5284_v37 = vpop.f32.mrf.mxu1  ;;  %v5400_v63 = vpop.f32.mrf.mxu0  ;;  %v3898_v32 = vpack.c.bf16 %v3870_v14, %v3869_v4 }
 0x25c   : > { %v6777_v38 = vadd.f32 %v5332_v40, %v5284_v37 }
 0x25d   : > { %v6779_v0 = vpop.f32.mrf.mxu1  ;;  %v6781_v5 = vpop.f32.mrf.mxu0 }
 0x25f   : > { %v5351_v35 = vpop.f32.mrf.mxu1  ;;  %5638 = vmatmul.mubr.bf16.vlgmr.msra.gmra.mxu1 %v3896_v58  ;;  %v5403_v61 = vpop.f32.mrf.mxu0 }
 0x260   : > { %v1950_v33 = vadd.f32 %v5351_v35, %v6699_v13  ;;  %5641 = vmatprep.mubr.bf16.mxu1 %v3897_v50  ;;  %v3873_v35 = vld [vmem:[#allocation2 + $0xe9] sm:$0xff] }
 0x261   : > { %v1821_v62 = vpop.f32.mrf.mxu1  ;;  %v2207_v26 = vpop.f32.mrf.mxu0 }
 0x262   : > { %v6784_v1 = vadd.f32 %v5399_v10, %v1950_v33  ;;  %v1948_v36 = vadd.f32 %v1821_v62, %v6702_v17  ;;  %v3899_v17 = vpack.c.bf16 %v3872_v15, %v3871_v6  ;;  %v3874_v33 = vld [vmem:[#allocation2 + $0xf1] sm:$0xff]  ;;  %v3875_v62 = vld [vmem:[#allocation2 + $0x109] sm:$0xff] }
 0x263   : > { %v5352_v7 = vpop.f32.mrf.mxu1  ;;  %v5404_v40 = vpop.f32.mrf.mxu0  ;;  %v3900_v6 = vpack.c.bf16 %v3874_v33, %v3873_v35  ;;  %v3880_v35 = vld [vmem:[#allocation2 + $0x151] sm:$0xff] }
 0x264   : > { %v6787_v18 = vadd.f32 %v2191_v47, %v1948_v36  ;;  %v1951_v59 = vadd.f32 %v5352_v7, %v6704_v31  ;;  %v3876_v36 = vld [vmem:[#allocation2 + $0x111] sm:$0xff] }
 0x265   : > { %v1824_v22 = vpop.f32.mrf.mxu1  ;;  %v6790_v13 = vpop.f32.mrf.mxu0 }
 0x266   : > { %v6792_v34 = vadd.f32 %v5400_v63, %v1951_v59  ;;  %v6795_v10 = vadd.f32 %v1824_v22, %v6707_v57 }
 0x267   : > { %v5355_v37 = vpop.f32.mrf.mxu1  ;;  %5642 = vmatmul.mubr.bf16.gmra.mxu1 %v3898_v32  ;;  %v5407_v3 = vpop.f32.mrf.mxu0 }
 0x268   : > { %v1954_v41 = vadd.f32 %v5355_v37, %v6709_v53  ;;  %5645 = vmatprep.mubr.bf16.mxu1 %v3899_v17 }
 0x269   : > { %v1837_v47 = vpop.f32.mrf.mxu1  ;;  %v2223_v58 = vpop.f32.mrf.mxu0 }
 0x26a   : > { %v6798_v50 = vadd.f32 %v5403_v61, %v1954_v41  ;;  %v1952_v31 = vadd.f32 %v1837_v47, %v6712_v21  ;;  %v3901_v21 = vpack.c.bf16 %v3876_v36, %v3875_v62  ;;  %v3877_v47 = vld [vmem:[#allocation2 + $0x129] sm:$0xff] }
 0x26b   : > { %v5356_v63 = vpop.f32.mrf.mxu1  ;;  %v5408_v57 = vpop.f32.mrf.mxu0 }
 0x26c   : > { %v6801_v4 = vadd.f32 %v2207_v26, %v1952_v31  ;;  %v1955_v14 = vadd.f32 %v5356_v63, %v6714_v11  ;;  %v5911_v26 = vld [vmem:[#allocation10 + $0x38] sm:$0xff]  }
 0x26d   : > { %v1840_v7 = vpop.f32.mrf.mxu1  ;;  %v6804_v53 = vpop.f32.mrf.mxu0  ;;  %5669 = vmatprep.subr.bf16.mxu0 %v5911_v26 }
 0x26e   : > { %v6806_v15 = vadd.f32 %v5404_v40, %v1955_v14  ;;  %v6809_v61 = vadd.f32 %v1840_v7, %v6717_v12  ;;  %v3878_v40 = vld [vmem:[#allocation2 + $0x131] sm:$0xff]  ;;  %v3879_v12 = vld [vmem:[#allocation2 + $0x149] sm:$0xff]  ;;  %5670 = vmatpush3.bf16.msra.mxu0 %v5911_v26 }
 0x26f   : > { %v5359_v59 = vpop.f32.mrf.mxu1  ;;  %5646 = vmatmul.mubr.bf16.gmra.mxu1 %v3900_v6  ;;  %v5411_v22 = vpop.f32.mrf.mxu0  ;;  %v3902_v36 = vpack.c.bf16 %v3878_v40, %v3877_v47  ;;  %v3903_v7 = vpack.c.bf16 %v3880_v35, %v3879_v12  ;;  %v3884_v40 = vld [vmem:[#allocation2 + $0x191] sm:$0xff] }
 0x270   : > { %v1958_v32 = vadd.f32 %v5359_v59, %v6719_v55  ;;  %5649 = vmatprep.mubr.bf16.mxu1 %v3901_v21 }
 0x271   : > { %v1853_v17 = vpop.f32.mrf.mxu1  ;;  %v2239_v37 = vpop.f32.mrf.mxu0 }
 0x272   : > { %v6812_v11 = vadd.f32 %v5407_v3, %v1958_v32  ;;  %v1956_v41 = vadd.f32 %v1853_v17, %v6722_v19 }
 0x273   : > { %v5360_v31 = vpop.f32.mrf.mxu1  ;;  %v5412_v33 = vpop.f32.mrf.mxu0 }
 0x274   : > { %v6815_v63 = vadd.f32 %v2223_v58, %v1956_v41  ;;  %v1959_v55 = vadd.f32 %v5360_v31, %v6724_v28  ;;  %v5912_v58 = vld [vmem:[#allocation10 + $0x30] sm:$0xff]  }
 0x275   : > { %v1856_v62 = vpop.f32.mrf.mxu1  ;;  %v6818_v14 = vpop.f32.mrf.mxu0  ;;  %v3881_v41 = vld [vmem:[#allocation2 + $0x169] sm:$0xff]  ;;  %5671 = vmatprep.subr.bf16.mxu0 %v5912_v58 }
 0x276   : > { %v6820_v3 = vadd.f32 %v5408_v57, %v1959_v55  ;;  %v6823_v19 = vadd.f32 %v1856_v62, %v6727_v25  ;;  %v3882_v57 = vld [vmem:[#allocation2 + $0x171] sm:$0xff]  ;;  %v3883_v25 = vld [vmem:[#allocation2 + $0x189] sm:$0xff]  ;;  %5672 = vmatpush3.bf16.msra.mxu0 %v5912_v58 }
 0x277   : > { %v5363_v6 = vpop.f32.mrf.mxu1  ;;  %5650 = vmatmul.mubr.bf16.gmra.mxu1 %v3902_v36  ;;  %v5415_v21 = vpop.f32.mrf.mxu0  ;;  %v3904_v55 = vpack.c.bf16 %v3882_v57, %v3881_v41  ;;  %v5913_v58 = vld [vmem:[#allocation10 + $0x28] sm:$0xff]  }
 0x278   : > { %v1962_v59 = vadd.f32 %v5363_v6, %v6729_v52  ;;  %5653 = vmatprep.mubr.bf16.mxu1 %v3903_v7  ;;  %v3885_v41 = vld [vmem:[#allocation2 + $0x1a9] sm:$0xff]  ;;  %5673 = vmatprep.subr.bf16.mxu0 %v5913_v58 }
 0x279   : > { %v1869_v32 = vpop.f32.mrf.mxu1  ;;  %v2255_v26 = vpop.f32.mrf.mxu0 }
 0x27a   : > { %v6826_v28 = vadd.f32 %v5411_v22, %v1962_v59  ;;  %v1960_v17 = vadd.f32 %v1869_v32, %v6732_v20  ;;  %v3905_v20 = vpack.c.bf16 %v3884_v40, %v3883_v25  ;;  %5674 = vmatpush3.bf16.msra.mxu0 %v5913_v58  ;;  %v1595_v40 = vadd.f32 %v6736_v54, %v6747_v29  ;;  %v5914_v54 = vld [vmem:[#allocation10 + $0x20] sm:$0xff]  }
 0x27b   : > { %v5364_v47 = vpop.f32.mrf.mxu1  ;;  %v5416_v31 = vpop.f32.mrf.mxu0  ;;  %5675 = vmatprep.subr.bf16.mxu0 %v5914_v54 }
 0x27c   : > { %v6829_v12 = vadd.f32 %v2239_v37, %v1960_v17  ;;  %v1963_v52 = vadd.f32 %v5364_v47, %v6734_v49  ;;  %v3888_v47 = vld [vmem:[#allocation2 + $0x1d1] sm:$0xff] }
 0x27d   : > { %v1872_v35 = vpop.f32.mrf.mxu1  ;;  %v2258_v62 = vpop.f32.mrf.mxu0 }
 0x27e   : > { %v6832_v36 = vadd.f32 %v5412_v33, %v1963_v52  ;;  %v6835_v22 = vadd.f32 %v1872_v35, %v6738_v24  ;;  %v3886_v33 = vld [vmem:[#allocation2 + $0x1b1] sm:$0xff]  ;;  %v3887_v24 = vld [vmem:[#allocation2 + $0x1c9] sm:$0xff]  ;;  %5676 = vmatpush3.bf16.msra.mxu0 %v5914_v54 }
 0x27f   : > { %v5367_v7 = vpop.f32.mrf.mxu1  ;;  %5654 = vmatmul.mubr.bf16.gmra.mxu1 %v3904_v55  ;;  %v5419_v6 = vpop.f32.mrf.mxu0 }
 0x280   : > { %v1966_v59 = vadd.f32 %v5367_v7, %v6741_v8  ;;  %5657 = vmatprep.mubr.bf16.mxu1 %v3905_v20  ;;  %v3907_v7 = vpack.c.bf16 %v3888_v47, %v3887_v24 }
 0x281   : > { %v1885_v37 = vpop.f32.mrf.mxu1  ;;  %v2271_v32 = vpop.f32.mrf.mxu0 }
 0x282   : > { %v6838_v17 = vadd.f32 %v5415_v21, %v1966_v59  ;;  %v1964_v49 = vadd.f32 %v1885_v37, %v6743_v56  ;;  %v3906_v21 = vpack.c.bf16 %v3886_v33, %v3885_v41  ;;  %v3889_v41 = vld [vmem:[#allocation2 + $0x1e9] sm:$0xff] }
 0x283   : > { %v5368_v57 = vpop.f32.mrf.mxu1  ;;  %v5420_v25 = vpop.f32.mrf.mxu0 }
 0x284   : > { %7437 = vst [vmem:[#allocation17_spill] sm:$0xff] %v6838_v17  ;;  %v6843_v8 = vadd.f32 %v2255_v26, %v1964_v49  ;;  %v1967_v52 = vadd.f32 %v5368_v57, %v6745_v23 }
 0x285   : > { %v1888_v35 = vpop.f32.mrf.mxu1  ;;  %v2274_v55 = vpop.f32.mrf.mxu0 }
 0x286   : > { %v6846_v20 = vadd.f32 %v5416_v31, %v1967_v52  ;;  %v1965_v56 = vadd.f32 %v1888_v35, %v1595_v40  ;;  %v3890_v31 = vld [vmem:[#allocation2 + $0x1f1] sm:$0xff] }
 0x287   : > { %v5371_v59 = vpop.f32.mrf.mxu1  ;;  %5658 = vmatmul.mubr.bf16.gmra.mxu1 %v3906_v21  ;;  %v5423_v37 = vpop.f32.mrf.mxu0  ;;  %v3908_v40 = vpack.c.bf16 %v3890_v31, %v3889_v41 }
 0x288   : > { %v6848_v17 = vadd.f32 %v2258_v62, %v1965_v56  ;;  %v1970_v58 = vadd.f32 %v5371_v59, %v6752_v39  ;;  %5661 = vmatprep.mubr.bf16.mxu1 %v3907_v7  ;;  %v1599_v62 = vadd.f32 %v6749_v60, %v6758_v9  ;;  %v3893_v60 = vld [vmem:[#allocation2 + $0x229] sm:$0xff]  ;;  %v3894_v9 = vld [vmem:[#allocation2 + $0x231] sm:$0xff] }
 0x289   : > { %v1901_v29 = vpop.f32.mrf.mxu1  ;;  %v2287_v26 = vpop.f32.mrf.mxu0 }
 0x28a   : > { %v6851_v49 = vadd.f32 %v5419_v6, %v1970_v58  ;;  %v1968_v23 = vadd.f32 %v1901_v29, %v6754_v46  ;;  %v3910_v29 = vpack.c.bf16 %v3894_v9, %v3893_v60 }
 0x28b   : > { %v5372_v33 = vpop.f32.mrf.mxu1  ;;  %v5424_v57 = vpop.f32.mrf.mxu0 }
 0x28c   : > { %v6856_v24 = vadd.f32 %v2271_v32, %v1968_v23  ;;  %v1971_v39 = vadd.f32 %v5372_v33, %v6756_v16  ;;  %v5915_v32 = vld [vmem:[#allocation10 + $0x18] sm:$0xff]  }
 0x28d   : > { %v1904_v47 = vpop.f32.mrf.mxu1  ;;  %v2290_v52 = vpop.f32.mrf.mxu0  ;;  %5677 = vmatprep.subr.bf16.mxu0 %v5915_v32 }
 0x28e   : > { %v6859_v6 = vadd.f32 %v5420_v25, %v1971_v39  ;;  %v1969_v35 = vadd.f32 %v1904_v47, %v1599_v62  ;;  %5678 = vmatpush3.bf16.msra.mxu0 %v5915_v32  ;;  %v5917_v32 = vld [vmem:[#allocation10 + $0x8] sm:$0xff]  }
 0x28f   : > { %v5375_v46 = vpop.f32.mrf.mxu1  ;;  %5662 = vmatmul.mubr.bf16.gmra.mxu1 %v3908_v40  ;;  %v5427_v21 = vpop.f32.mrf.mxu0  ;;  %v5916_v40 = vld [vmem:[#allocation10 + $0x10] sm:$0xff]  }
 0x290   : > { %v6861_v56 = vadd.f32 %v2274_v55, %v1969_v35  ;;  %v1974_v7 = vadd.f32 %v5375_v46, %v6762_v51  ;;  %5665 = vmatprep.mubr.bf16.mxu1 %v6686_v48  ;;  %v1603_v55 = vadd.f32 %v6760_v27, %v6769_v43  ;;  %5679 = vmatprep.subr.bf16.mxu0 %v5916_v40 }
 0x291   : > { %v1917_v59 = vpop.f32.mrf.mxu1  ;;  %v2303_v16 = vpop.f32.mrf.mxu0 }
 0x292   : > { %v6865_v58 = vadd.f32 %v5423_v37, %v1974_v7  ;;  %v1972_v25 = vadd.f32 %v1917_v59, %v6765_v44  ;;  %5680 = vmatpush3.bf16.msra.mxu0 %v5916_v40 }
 0x293   : > { %v5376_v54 = vpop.f32.mrf.mxu1  ;;  %v5428_v23 = vpop.f32.mrf.mxu0  ;;  %5681 = vmatprep.subr.bf16.mxu0 %v5917_v32 }
 0x294   : > { %v6870_v51 = vadd.f32 %v2287_v26, %v1972_v25  ;;  %v1975_v48 = vadd.f32 %v5376_v54, %v6767_v45 }
 0x295   : > { %v1920_v41 = vpop.f32.mrf.mxu1  ;;  %v2306_v31 = vpop.f32.mrf.mxu0 }
 0x296   : > { %v6873_v33 = vadd.f32 %v5424_v57, %v1975_v48  ;;  %v1973_v37 = vadd.f32 %v1920_v41, %v1603_v55  ;;  %v1607_v57 = vadd.f32 %v6771_v30, %v6779_v0  ;;  %5682 = vmatpush3.bf16.msra.mxu0 %v5917_v32 }
 0x297   : > { %v5379_v62 = vpop.f32.mrf.mxu1  ;;  %5666 = vmatmul.mubr.bf16.gmra.mxu1 %v3910_v29  ;;  %v5495_v44 = vpop.f32.mrf.mxu0 }
 0x298   : > { %v6875_v39 = vadd.f32 %v2290_v52, %v1973_v37  ;;  %v1978_v47 = vadd.f32 %v5379_v62, %v6773_v42 }
 0x299   : > { %v1933_v35 = vpop.f32.mrf.mxu1  ;;  %v2931_v46 = vpop.f32.mrf.mxu0 }
 0x29a   : > { %v6878_v27 = vadd.f32 %v5427_v21, %v1978_v47  ;;  %v1976_v43 = vadd.f32 %v1933_v35, %v6775_v2 }
 0x29b   : > { %v5380_v45 = vpop.f32.mrf.mxu1  ;;  %v6881_v26 = vpop.f32.mrf.mxu0 }
 0x29c   : > { %v6885_v7 = vadd.f32 %v2303_v16, %v1976_v43  ;;  %v1979_v52 = vadd.f32 %v5380_v45, %v6777_v38 }
 0x29d   : > { %v1936_v42 = vpop.f32.mrf.mxu1  ;;  %v6888_v60 = vpop.f32.mrf.mxu0 }
 0x29e   : > { %v6890_v9 = vadd.f32 %v5428_v23, %v1979_v52  ;;  %v1977_v21 = vadd.f32 %v1936_v42, %v1607_v57  ;;  %v2319_v23 = vadd.f32 %v6781_v5, %v6795_v10  ;;  %v5918_v10 = vld [vmem:[#allocation10] sm:$0xff]  }
 0x29f   : > { %v5447_v2 = vpop.f32.mrf.mxu1  ;;  %v5499_v59 = vpop.f32.mrf.mxu0  ;;  %5683 = vmatprep.subr.bf16.mxu0 %v5918_v10 }
 0x2a0   : > { %v6892_v25 = vadd.f32 %v2306_v31, %v1977_v21  ;;  %v2690_v54 = vadd.f32 %v5447_v2, %v6784_v1  ;;  %5684 = vmatpush3.bf16.msra.mxu0 %v5918_v10 }
 0x2a1   : > { %v2561_v29 = vpop.f32.mrf.mxu1  ;;  %v2947_v30 = vpop.f32.mrf.mxu0 }
 0x2a2   : > { %v6895_v0 = vadd.f32 %v5495_v44, %v2690_v54  ;;  %v2688_v38 = vadd.f32 %v2561_v29, %v6787_v18  ;;  %v2327_v29 = vadd.f32 %v6804_v53, %v6823_v19 }
 0x2a3   : > { %v5448_v16 = vpop.f32.mrf.mxu1  ;;  %v6898_v55 = vpop.f32.mrf.mxu0 }
 0x2a4   : > { %v6902_v48 = vadd.f32 %v2931_v46, %v2688_v38  ;;  %v6905_v41 = vadd.f32 %v5448_v16, %v6792_v34  ;;  %v2323_v34 = vadd.f32 %v6790_v13, %v6809_v61 }
 0x2a5   : > { %v2564_v1 = vpop.f32.mrf.mxu1  ;;  %v6907_v31 = vpop.f32.mrf.mxu0 }
 0x2a6   : > { %v6909_v37 = vadd.f32 %v2564_v1, %v2319_v23 }
 0x2a7   : > { %v5451_v62 = vpop.f32.mrf.mxu1  ;;  %v5503_v44 = vpop.f32.mrf.mxu0 }
 0x2a8   : > { %v2694_v18 = vadd.f32 %v5451_v62, %v6798_v50 }
 0x2a9   : > { %v2577_v47 = vpop.f32.mrf.mxu1  ;;  %v2963_v40 = vpop.f32.mrf.mxu0 }
 0x2aa   : > { %v6912_v35 = vadd.f32 %v5499_v59, %v2694_v18  ;;  %v2692_v5 = vadd.f32 %v2577_v47, %v6801_v4 }
 0x2ab   : > { %v5452_v46 = vpop.f32.mrf.mxu1  ;;  %v6915_v43 = vpop.f32.mrf.mxu0 }
 0x2ac   : > { %v6919_v45 = vadd.f32 %v2947_v30, %v2692_v5  ;;  %v6922_v57 = vadd.f32 %v5452_v46, %v6806_v15 }
 0x2ad   : > { %v2580_v50 = vpop.f32.mrf.mxu1  ;;  %v6924_v52 = vpop.f32.mrf.mxu0 }
 0x2ae   : > { %v6926_v42 = vadd.f32 %v2580_v50, %v2323_v34 }
 0x2af   : > { %v5455_v4 = vpop.f32.mrf.mxu1  ;;  %v5507_v21 = vpop.f32.mrf.mxu0 }
 0x2b0   : > { %v2698_v32 = vadd.f32 %v5455_v4, %v6812_v11 }
 0x2b1   : > { %v2593_v2 = vpop.f32.mrf.mxu1  ;;  %v2979_v59 = vpop.f32.mrf.mxu0 }
 0x2b2   : > { %v6929_v54 = vadd.f32 %v5503_v44, %v2698_v32  ;;  %v2696_v13 = vadd.f32 %v2593_v2, %v6815_v63 }
 0x2b3   : > { %v5456_v61 = vpop.f32.mrf.mxu1  ;;  %v6932_v15 = vpop.f32.mrf.mxu0 }
 0x2b4   : > { %v6936_v30 = vadd.f32 %v2963_v40, %v2696_v13  ;;  %v6939_v38 = vadd.f32 %v5456_v61, %v6820_v3  ;;  %v2331_v3 = vadd.f32 %v6818_v14, %v6835_v22 }
 0x2b5   : > { %v2596_v16 = vpop.f32.mrf.mxu1  ;;  %v6941_v23 = vpop.f32.mrf.mxu0 }
 0x2b6   : > { %v6943_v11 = vadd.f32 %v2596_v16, %v2327_v29 }
 0x2b7   : > { %v5459_v1 = vpop.f32.mrf.mxu1  ;;  %v5511_v62 = vpop.f32.mrf.mxu0 }
 0x2b8   : > { %v2702_v63 = vadd.f32 %v5459_v1, %v6826_v28 }
 0x2b9   : > { %v2609_v44 = vpop.f32.mrf.mxu1  ;;  %v2995_v18 = vpop.f32.mrf.mxu0 }
 0x2ba   : > { %v6946_v47 = vadd.f32 %v5507_v21, %v2702_v63  ;;  %v2700_v53 = vadd.f32 %v2609_v44, %v6829_v12  ;;  %v7438_v21 = vld [vmem:[#allocation17_spill] sm:$0xff] }
 0x2bb   : > { %v5460_v19 = vpop.f32.mrf.mxu1  ;;  %v6949_v40 = vpop.f32.mrf.mxu0 }
 0x2bc   : > { %v6953_v5 = vadd.f32 %v2979_v59, %v2700_v53  ;;  %v6956_v10 = vadd.f32 %v5460_v19, %v6832_v36 }
 0x2bd   : > { %v2612_v46 = vpop.f32.mrf.mxu1  ;;  %v6958_v34 = vpop.f32.mrf.mxu0 }
 0x2be   : > { %v6960_v28 = vadd.f32 %v2612_v46, %v2331_v3 }
 0x2bf   : > { %v5463_v50 = vpop.f32.mrf.mxu1  ;;  %v5515_v4 = vpop.f32.mrf.mxu0 }
 0x2c0   : > { %v2706_v12 = vadd.f32 %v5463_v50, %v7438_v21 }
 0x2c1   : > { %v2625_v32 = vpop.f32.mrf.mxu1  ;;  %v3011_v2 = vpop.f32.mrf.mxu0 }
 0x2c2   : > { %v6963_v13 = vadd.f32 %v5511_v62, %v2706_v12  ;;  %v2704_v14 = vadd.f32 %v2625_v32, %v6843_v8 }
 0x2c3   : > { %v5464_v22 = vpop.f32.mrf.mxu1  ;;  %v6966_v59 = vpop.f32.mrf.mxu0 }
 0x2c4   : > { %7439 = vst [vmem:[#allocation17_spill] sm:$0xff] %v6966_v59  ;;  %v6968_v36 = vadd.f32 %v2995_v18, %v2704_v14  ;;  %v6971_v61 = vadd.f32 %v5464_v22, %v6846_v20 }
 0x2c5   : > { %v2628_v29 = vpop.f32.mrf.mxu1  ;;  %v6973_v16 = vpop.f32.mrf.mxu0 }
 0x2c6   : > { %7440 = vst [vmem:[#allocation18_spill] sm:$0xff] %v6973_v16  ;;  %v6976_v1 = vadd.f32 %v2628_v29, %v6848_v17 }
 0x2c7   : > { %v5467_v63 = vpop.f32.mrf.mxu1  ;;  %v5519_v44 = vpop.f32.mrf.mxu0 }
 0x2c8   : > { %v2710_v62 = vadd.f32 %v5467_v63, %v6851_v49 }
 0x2c9   : > { %v2641_v53 = vpop.f32.mrf.mxu1  ;;  %v3027_v8 = vpop.f32.mrf.mxu0 }
 0x2ca   : > { %v6979_v19 = vadd.f32 %v5515_v4, %v2710_v62  ;;  %v2708_v18 = vadd.f32 %v2641_v53, %v6856_v24 }
 0x2cb   : > { %v5468_v3 = vpop.f32.mrf.mxu1  ;;  %v6982_v46 = vpop.f32.mrf.mxu0 }
 0x2cc   : > { %7441 = vst [vmem:[#allocation19_spill] sm:$0xff] %v6982_v46  ;;  %v6984_v20 = vadd.f32 %v3011_v2, %v2708_v18  ;;  %v6987_v50 = vadd.f32 %v5468_v3, %v6859_v6 }
 0x2cd   : > { %v2644_v17 = vpop.f32.mrf.mxu1  ;;  %v6989_v21 = vpop.f32.mrf.mxu0 }
 0x2ce   : > { %7442 = vst [vmem:[#allocation20_spill] sm:$0xff] %v6987_v50  ;;  %7443 = vst [vmem:[#allocation21_spill] sm:$0xff] %v6989_v21  ;;  %v6992_v12 = vadd.f32 %v2644_v17, %v6861_v56 }
 0x2cf   : > { %v5471_v49 = vpop.f32.mrf.mxu1  ;;  %v5523_v32 = vpop.f32.mrf.mxu0 }
 0x2d0   : > { %7444 = vst [vmem:[#allocation22_spill] sm:$0xff] %v6992_v12  ;;  %v2714_v4 = vadd.f32 %v5471_v49, %v6865_v58 }
 0x2d1   : > { %v2657_v14 = vpop.f32.mrf.mxu1  ;;  %v3043_v29 = vpop.f32.mrf.mxu0 }
 0x2d2   : > { %v6995_v24 = vadd.f32 %v5519_v44, %v2714_v4  ;;  %v2712_v22 = vadd.f32 %v2657_v14, %v6870_v51 }
 0x2d3   : > { %v5472_v2 = vpop.f32.mrf.mxu1  ;;  %v7006_v18 = vpop.f32.mrf.mxu0 }
 0x2d4   : > { %v6998_v63 = vadd.f32 %v3027_v8, %v2712_v22  ;;  %v7001_v6 = vadd.f32 %v5472_v2, %v6873_v33  ;;  %7447 = vst [vmem:[#allocation25_spill] sm:$0xff] %v7006_v18 }
 0x2d5   : > { %v2660_v62 = vpop.f32.mrf.mxu1  ;;  %v7012_v8 = vpop.f32.mrf.mxu0 }
 0x2d6   : > { %7445 = vst [vmem:[#allocation23_spill] sm:$0xff] %v7001_v6  ;;  %v7004_v56 = vadd.f32 %v2660_v62, %v6875_v39  ;;  %7448 = vst [vmem:[#allocation26_spill] sm:$0xff] %v7012_v8 }
 0x2d7   : > { %v5475_v53 = vpop.f32.mrf.mxu1  ;;  %v7022_v22 = vpop.f32.mrf.mxu0 }
 0x2d8   : > { %7446 = vst [vmem:[#allocation24_spill] sm:$0xff] %v7004_v56  ;;  %v2718_v58 = vadd.f32 %v5475_v53, %v6878_v27 }
 0x2d9   : > { %v2673_v44 = vpop.f32.mrf.mxu1  ;;  %v7030_v2 = vpop.f32.mrf.mxu0 }
 0x2da   : > { %v7009_v3 = vadd.f32 %v5523_v32, %v2718_v58  ;;  %v2716_v51 = vadd.f32 %v2673_v44, %v6885_v7 }
 0x2db   : > { %v5476_v17 = vpop.f32.mrf.mxu1 }
 0x2dc   : > { %v7014_v49 = vadd.f32 %v3043_v29, %v2716_v51  ;;  %v7017_v33 = vadd.f32 %v5476_v17, %v6890_v9  ;;  %v7034_v9 = vpop.f32.mrf.mxu0 }
 0x2dd   : > { %v2676_v39 = vpop.f32.mrf.mxu1 }
 0x2de   : > { %7449 = vst [vmem:[#allocation27_spill] sm:$0xff] %v7017_v33  ;;  %v7020_v4 = vadd.f32 %v2676_v39, %v6892_v25 }
 0x2df   : > { %v5543_v14 = vpop.f32.mrf.mxu1 }
 0x2e0   : > { %7450 = vst [vmem:[#allocation28_spill] sm:$0xff] %v7020_v4  ;;  %v7025_v27 = vadd.f32 %v5543_v14, %v6895_v0  ;;  %v7042_v0 = vpop.f32.mrf.mxu0 }
 0x2e1   : > { %v3302_v32 = vpop.f32.mrf.mxu1 }
 0x2e2   : > { %v7028_v7 = vadd.f32 %v3302_v32, %v6902_v48  ;;  %v7048_v17 = vpop.f32.mrf.mxu0 }
 0x2e3   : > { %v5544_v29 = vpop.f32.mrf.mxu1 }
 0x2e5   : > { %v7032_v62 = vpop.f32.mrf.mxu1 }
 0x2e7   : > { %v5547_v53 = vpop.f32.mrf.mxu1 }
 0x2e8   : > { %v7037_v25 = vadd.f32 %v5547_v53, %v6912_v35  ;;  %v7056_v53 = vpop.f32.mrf.mxu0 }
 0x2e9   : > { %v3318_v58 = vpop.f32.mrf.mxu1 }
 0x2ea   : > { %v7040_v44 = vadd.f32 %v3318_v58, %v6919_v45  ;;  %v7062_v8 = vpop.f32.mrf.mxu0 }
 0x2eb   : > { %v7044_v51 = vpop.f32.mrf.mxu1 }
 0x2ed   : > { %v7046_v48 = vpop.f32.mrf.mxu1 }
 0x2ef   : > { %v5551_v39 = vpop.f32.mrf.mxu1 }
 0x2f0   : > { %v7051_v14 = vadd.f32 %v5551_v39, %v6929_v54  ;;  %v7070_v39 = vpop.f32.mrf.mxu0 }
 0x2f1   : > { %v3334_v32 = vpop.f32.mrf.mxu1 }
 0x2f2   : > { %v7054_v35 = vadd.f32 %v3334_v32, %v6936_v30  ;;  %v7076_v21 = vpop.f32.mrf.mxu0 }
 0x2f3   : > { %v7058_v45 = vpop.f32.mrf.mxu1 }
 0x2f5   : > { %v7060_v58 = vpop.f32.mrf.mxu1 }
 0x2f7   : > { %v5555_v4 = vpop.f32.mrf.mxu1 }
 0x2f8   : > { %v7065_v18 = vadd.f32 %v5555_v4, %v6946_v47  ;;  %v7084_v4 = vpop.f32.mrf.mxu0 }
 0x2f9   : > { %v3350_v33 = vpop.f32.mrf.mxu1 }
 0x2fa   : > { %v7068_v54 = vadd.f32 %v3350_v33, %v6953_v5  ;;  %v7090_v16 = vpop.f32.mrf.mxu0 }
 0x2fb   : > { %v7072_v30 = vpop.f32.mrf.mxu1 }
 0x2fd   : > { %v7074_v32 = vpop.f32.mrf.mxu1 }
 0x2ff   : > { %v5559_v56 = vpop.f32.mrf.mxu1 }
 0x300   : > { %v7079_v46 = vadd.f32 %v5559_v56, %v6963_v13  ;;  %v7098_v56 = vpop.f32.mrf.mxu0 }
 0x301   : > { %v3366_v6 = vpop.f32.mrf.mxu1 }
 0x302   : > { %7451 = vst [vmem:[#allocation29_spill] sm:$0xff] %v7079_v46  ;;  %v7082_v47 = vadd.f32 %v3366_v6, %v6968_v36 }
 0x303   : > { %v7086_v5 = vpop.f32.mrf.mxu1 }
 0x304   : > { %7452 = vst [vmem:[#allocation30_spill] sm:$0xff] %v7082_v47  ;;  %7453 = vst [vmem:[#allocation31_spill] sm:$0xff] %v7086_v5  ;;  %v7104_v47 = vpop.f32.mrf.mxu0 }
 0x305   : > { %v7088_v33 = vpop.f32.mrf.mxu1 }
 0x306   : > { %7454 = vst [vmem:[#allocation32_spill] sm:$0xff] %v7088_v33 }
 0x307   : > { %v5563_v12 = vpop.f32.mrf.mxu1 }
 0x308   : > { %v7093_v59 = vadd.f32 %v5563_v12, %v6979_v19  ;;  %v7112_v12 = vpop.f32.mrf.mxu0 }
 0x309   : > { %v3382_v50 = vpop.f32.mrf.mxu1 }
 0x30a   : > { %7455 = vst [vmem:[#allocation33_spill] sm:$0xff] %v7093_v59  ;;  %v7096_v13 = vadd.f32 %v3382_v50, %v6984_v20 }
 0x30b   : > { %v7100_v36 = vpop.f32.mrf.mxu1 }
 0x30c   : > { %7456 = vst [vmem:[#allocation34_spill] sm:$0xff] %v7096_v13  ;;  %7457 = vst [vmem:[#allocation35_spill] sm:$0xff] %v7100_v36  ;;  %v7118_v13 = vpop.f32.mrf.mxu0 }
 0x30d   : > { %v7102_v6 = vpop.f32.mrf.mxu1 }
 0x30e   : > { %7458 = vst [vmem:[#allocation36_spill] sm:$0xff] %v7102_v6 }
 0x30f   : > { %v5567_v46 = vpop.f32.mrf.mxu1 }
 0x310   : > { %v7107_v33 = vadd.f32 %v5567_v46, %v6995_v24  ;;  %v7126_v24 = vpop.f32.mrf.mxu0 }
 0x311   : > { %v3398_v5 = vpop.f32.mrf.mxu1 }
 0x312   : > { %v7110_v19 = vadd.f32 %v3398_v5, %v6998_v63  ;;  %v3061_v5 = vadd.f32 %v6881_v26, %v6905_v41  ;;  %v7146_v26 = vld [vmem:[%s7411_s4] ss:$0 sm:$0xff] }
 0x313   : > { %v7114_v20 = vpop.f32.mrf.mxu1 }
 0x314   : > { %7459 = vst [vmem:[#allocation37_spill] sm:$0xff] %v7110_v19 }
 0x315   : > { %v7116_v50 = vpop.f32.mrf.mxu1 }
 0x316   : > { %7460 = vst [vmem:[#allocation38_spill] sm:$0xff] %v7116_v50  ;;  %v3059_v50 = vadd.f32 %v6888_v60, %v6909_v37 }
 0x317   : > { %v5571_v59 = vpop.f32.mrf.mxu1 }
 0x318   : > { %v7121_v6 = vadd.f32 %v5571_v59, %v7009_v3  ;;  %v3801_v59 = vadd.f32 %v7022_v22, %v7025_v27  ;;  %v3432_v3 = vadd.f32 %v5544_v29, %v3061_v5  ;;  %v3065_v22 = vadd.f32 %v6898_v55, %v6922_v57 }
 0x319   : > { %v3414_v36 = vpop.f32.mrf.mxu1 }
 0x31a   : > { %7461 = vst [vmem:[#allocation39_spill] sm:$0xff] %v7121_v6  ;;  %v7124_v46 = vadd.f32 %v3414_v36, %v7014_v49  ;;  %v7138_v6 = vpop.f32.mrf.mxu0  ;;  %v3799_v36 = vadd.f32 %v7030_v2, %v7028_v7  ;;  %v3802_v60 = vadd.f32 %v7034_v9, %v3432_v3  ;;  %v3436_v5 = vadd.f32 %v7044_v51, %v3065_v22 }
 0x31b   : > { %v7128_v63 = vpop.f32.mrf.mxu1  ;;  %v3805_v9 = vadd.f32 %v7048_v17, %v7037_v25 }
 0x31c   : > { %7462 = vst [vmem:[#allocation40_spill] sm:$0xff] %v7124_v46  ;;  %7463 = vst [vmem:[#allocation41_spill] sm:$0xff] %v7128_v63  ;;  %v3430_v46 = vadd.f32 %v7032_v62, %v3059_v50  ;;  %v7151_v27 = vpop.f32.mrf.mxu0  ;;  %v3063_v50 = vadd.f32 %v6907_v31, %v6926_v42  ;;  %v3806_v25 = vadd.f32 %v7062_v8, %v3436_v5 }
 0x31d   : > { %v7132_v19 = vpop.f32.mrf.mxu1  ;;  %v3067_v8 = vadd.f32 %v6924_v52, %v6943_v11 }
 0x31e   : > { %v3800_v7 = vadd.f32 %v7042_v0, %v3430_v46  ;;  %v3803_v0 = vadd.f32 %v7056_v53, %v7040_v44  ;;  %v3434_v46 = vadd.f32 %v7046_v48, %v3063_v50  ;;  %v3069_v44 = vadd.f32 %v6915_v43, %v6939_v38 }
 0x31f   : > { %v5639_v49 = vpop.f32.mrf.mxu1 }
 0x320   : > { %v4171_v63 = vadd.f32 %v5639_v49, %v3801_v59  ;;  %v3440_v50 = vadd.f32 %v7058_v45, %v3069_v44 }
 0x321   : > { %v4042_v41 = vpop.f32.mrf.mxu1 }
 0x322   : > { %v4169_v37 = vadd.f32 %v4042_v41, %v3799_v36  ;;  %v4274_v2 = vadd.f32 %v7146_v26, %v4171_v63  ;;  %v7165_v63 = vpop.f32.mrf.mxu0 }
 0x323   : > { %v5640_v29 = vpop.f32.mrf.mxu1 }
 0x324   : > { %v4172_v62 = vadd.f32 %v5640_v29, %v3802_v60  ;;  %v4272_v3 = vadd.f32 %v7146_v26, %v4169_v37  ;;  %v4306_v31 = vmax.f32 %v4274_v2, 0.0  ;;  %v7171_v53 = vpop.f32.mrf.mxu0  ;;  %v3804_v29 = vadd.f32 %v7070_v39, %v3434_v46 }
 0x325   : > { %v4045_v59 = vpop.f32.mrf.mxu1  ;;  %v3807_v39 = vadd.f32 %v7084_v4, %v7054_v35  ;;  %v3073_v35 = vadd.f32 %v6932_v15, %v6956_v10 }
 0x326   : > { %v4275_v55 = vadd.f32 %v7146_v26, %v4172_v62  ;;  %v4170_v57 = vadd.f32 %v4045_v59, %v3800_v7  ;;  %v4304_v41 = vmax.f32 %v4272_v3, 0.0  ;;  %v3809_v59 = vadd.f32 %v7076_v21, %v7051_v14 }
 0x327   : > { %v5643_v49 = vpop.f32.mrf.mxu1  ;;  %v3438_v3 = vadd.f32 %v7060_v58, %v3067_v8  ;;  %v3810_v14 = vadd.f32 %v7090_v16, %v3440_v50  ;;  %v3071_v16 = vadd.f32 %v6941_v23, %v6960_v28 }
 0x328   : > { %v4307_v42 = vmax.f32 %v4275_v55, 0.0  ;;  %v4273_v51 = vadd.f32 %v7146_v26, %v4170_v57  ;;  %v4175_v36 = vadd.f32 %v5643_v49, %v3805_v9  ;;  %v7185_v55 = vpop.f32.mrf.mxu0 }
 0x329   : > { %v4058_v17 = vpop.f32.mrf.mxu1  ;;  %v3442_v44 = vadd.f32 %v7074_v32, %v3071_v16 }
 0x32a   : > { %v4337_v60 = vpack.c.bf16 %v4307_v42, %v4306_v31  ;;  %v4305_v37 = vmax.f32 %v4273_v51, 0.0  ;;  %v4173_v22 = vadd.f32 %v4058_v17, %v3803_v0  ;;  %v4278_v7 = vadd.f32 %v7146_v26, %v4175_v36  ;;  %v7191_v58 = vpop.f32.mrf.mxu0 }
 0x32b   : > { %v5644_v48 = vpop.f32.mrf.mxu1  ;;  %v3808_v51 = vadd.f32 %v7098_v56, %v3438_v3  ;;  %v3811_v56 = vadd.f32 %v7112_v12, %v7068_v54  ;;  %v3077_v54 = vadd.f32 %v6949_v40, %v6971_v61 }
 0x32c   : > { %v4176_v2 = vadd.f32 %v5644_v48, %v3806_v25  ;;  %v4336_v62 = vpack.c.bf16 %v4305_v37, %v4304_v41  ;;  %v4276_v43 = vadd.f32 %v7146_v26, %v4173_v22  ;;  %v4310_v11 = vmax.f32 %v4278_v7, 0.0  ;;  %v7205_v48 = vpop.f32.mrf.mxu0 }
 0x32d   : > { %v4061_v5 = vpop.f32.mrf.mxu1  ;;  %v3444_v41 = vadd.f32 %v7072_v30, %v3073_v35  ;;  %v3813_v37 = vadd.f32 %v7104_v47, %v7065_v18 }
 0x32e   : > { %v4279_v38 = vadd.f32 %v7146_v26, %v4176_v2  ;;  %v4174_v9 = vadd.f32 %v4061_v5, %v3804_v29  ;;  %5685 = vmatprep.mubr.bf16.mxu0 %v4336_v62  ;;  %v4308_v46 = vmax.f32 %v4276_v43, 0.0  ;;  %v3755_v32 = vpop.f32.mrf.mxu0  ;;  %v3812_v5 = vadd.f32 %v7126_v24, %v3442_v44  ;;  %v7466_v24 = vld [vmem:[#allocation30_spill] sm:$0xff] }
 0x32f   : > { %v5647_v52 = vpop.f32.mrf.mxu1  ;;  %5686 = vmatmul.mubr.bf16.vlgmr.msra.gmra.mxu0 %v4337_v60  ;;  %v3814_v47 = vadd.f32 %v7118_v13, %v3444_v41  ;;  %v7464_v13 = vld [vmem:[#allocation31_spill] sm:$0xff] }
 0x330   : > { %v4311_v45 = vmax.f32 %v4279_v38, 0.0  ;;  %v4277_v57 = vadd.f32 %v7146_v26, %v4174_v9  ;;  %v4179_v21 = vadd.f32 %v5647_v52, %v3809_v59  ;;  %v3075_v9 = vadd.f32 %v6958_v34, %v6976_v1  ;;  %v7465_v52 = vld [vmem:[#allocation29_spill] sm:$0xff] }
 0x331   : > { %v4074_v0 = vpop.f32.mrf.mxu1 }
 0x332   : > { %v4339_v49 = vpack.c.bf16 %v4311_v45, %v4310_v11  ;;  %v4309_v31 = vmax.f32 %v4277_v57, 0.0  ;;  %v4177_v42 = vadd.f32 %v4074_v0, %v3807_v39  ;;  %v4282_v36 = vadd.f32 %v7146_v26, %v4179_v21  ;;  %v7467_v21 = vld [vmem:[#allocation32_spill] sm:$0xff]  ;;  %v5615_v0 = vpop.f32.mrf.mxu0 }
 0x333   : > { %v5648_v4 = vpop.f32.mrf.mxu1  ;;  %v3448_v39 = vadd.f32 %v7464_v13, %v3077_v54  ;;  %v3817_v11 = vadd.f32 %v7138_v6, %v7465_v52  ;;  %v3815_v57 = vadd.f32 %v7151_v27, %v7466_v24  ;;  %v7476_v52 = vld [vmem:[#allocation23_spill] sm:$0xff] }
 0x334   : > { %v4180_v25 = vadd.f32 %v5648_v4, %v3810_v14  ;;  %v4338_v17 = vpack.c.bf16 %v4309_v31, %v4308_v46  ;;  %v4280_v15 = vadd.f32 %v7146_v26, %v4177_v42  ;;  %v4314_v28 = vmax.f32 %v4282_v36, 0.0  ;;  %v3768_v16 = vpop.f32.mrf.mxu0 }
 0x335   : > { %v4077_v60 = vpop.f32.mrf.mxu1  ;;  %v3446_v14 = vadd.f32 %v7467_v21, %v3075_v9  ;;  %v3818_v6 = vadd.f32 %v7165_v63, %v3448_v39  ;;  %v7472_v63 = vld [vmem:[#allocation35_spill] sm:$0xff] }
 0x336   : > { %v4283_v10 = vadd.f32 %v7146_v26, %v4180_v25  ;;  %v4178_v22 = vadd.f32 %v4077_v60, %v3808_v51  ;;  %5689 = vmatprep.mubr.bf16.mxu0 %v4338_v17  ;;  %v4312_v2 = vmax.f32 %v4280_v15, 0.0  ;;  %v7468_v25 = vld [vmem:[#allocation20_spill] sm:$0xff]  ;;  %v7469_v17 = vld [vmem:[#allocation17_spill] sm:$0xff] }
 0x337   : > { %v5651_v23 = vpop.f32.mrf.mxu1  ;;  %5690 = vmatmul.mubr.bf16.gmra.mxu0 %v4339_v49  ;;  %v3081_v27 = vadd.f32 %v7469_v17, %v7468_v25  ;;  %v3816_v60 = vadd.f32 %v7171_v53, %v3446_v14  ;;  %v7474_v53 = vld [vmem:[#allocation34_spill] sm:$0xff]  ;;  %v7478_v14 = vld [vmem:[#allocation24_spill] sm:$0xff] }
 0x338   : > { %v4315_v30 = vmax.f32 %v4283_v10, 0.0  ;;  %v4281_v29 = vadd.f32 %v7146_v26, %v4178_v22  ;;  %v4183_v18 = vadd.f32 %v5651_v23, %v3813_v37  ;;  %v7470_v22 = vld [vmem:[#allocation22_spill] sm:$0xff] }
 0x339   : > { %v4090_v7 = vpop.f32.mrf.mxu1  ;;  %v3452_v23 = vadd.f32 %v7472_v63, %v3081_v27 }
 0x33a   : > { %v4341_v62 = vpack.c.bf16 %v4315_v30, %v4314_v28  ;;  %v4313_v8 = vmax.f32 %v4281_v29, 0.0  ;;  %v4181_v50 = vadd.f32 %v4090_v7, %v3811_v56  ;;  %v4286_v59 = vadd.f32 %v7146_v26, %v4183_v18  ;;  %v7471_v56 = vld [vmem:[#allocation18_spill] sm:$0xff]  ;;  %v7473_v30 = vld [vmem:[#allocation33_spill] sm:$0xff] }
 0x33b   : > { %v5652_v12 = vpop.f32.mrf.mxu1  ;;  %v3079_v44 = vadd.f32 %v7471_v56, %v7470_v22  ;;  %v3821_v29 = vadd.f32 %v7185_v55, %v7473_v30  ;;  %v3822_v55 = vadd.f32 %v7205_v48, %v3452_v23  ;;  %v7482_v56 = vld [vmem:[#allocation27_spill] sm:$0xff] }
 0x33c   : > { %v4184_v43 = vadd.f32 %v5652_v12, %v3814_v47  ;;  %v4340_v38 = vpack.c.bf16 %v4313_v8, %v4312_v2  ;;  %v4284_v45 = vadd.f32 %v7146_v26, %v4181_v50  ;;  %v4318_v34 = vmax.f32 %v4286_v59, 0.0  ;;  %v5616_v50 = vpop.f32.mrf.mxu0 }
 0x33d   : > { %v4093_v3 = vpop.f32.mrf.mxu1  ;;  %v3819_v2 = vadd.f32 %v7191_v58, %v7474_v53  ;;  %v7486_v53 = vld [vmem:[#allocation41_spill] sm:$0xff] }
 0x33e   : > { %v4287_v40 = vadd.f32 %v7146_v26, %v4184_v43  ;;  %v4182_v61 = vadd.f32 %v4093_v3, %v3812_v5  ;;  %5693 = vmatprep.mubr.bf16.mxu0 %v4340_v38  ;;  %v4316_v35 = vmax.f32 %v4284_v45, 0.0  ;;  %v3771_v45 = vpop.f32.mrf.mxu0 }
 0x33f   : > { %v5655_v46 = vpop.f32.mrf.mxu1  ;;  %5694 = vmatmul.mubr.bf16.gmra.mxu0 %v4341_v62  ;;  %v7475_v62 = vld [vmem:[#allocation36_spill] sm:$0xff] }
 0x340   : > { %v4319_v1 = vmax.f32 %v4287_v40, 0.0  ;;  %v4285_v49 = vadd.f32 %v7146_v26, %v4182_v61  ;;  %v4187_v31 = vadd.f32 %v5655_v46, %v3817_v11  ;;  %v3450_v8 = vadd.f32 %v7475_v62, %v3079_v44  ;;  %v7477_v11 = vld [vmem:[#allocation19_spill] sm:$0xff]  ;;  %v7479_v46 = vld [vmem:[#allocation21_spill] sm:$0xff] }
 0x341   : > { %v4106_v42 = vpop.f32.mrf.mxu1  ;;  %v3085_v58 = vadd.f32 %v7477_v11, %v7476_v52  ;;  %v7483_v44 = vld [vmem:[#allocation25_spill] sm:$0xff] }
 0x342   : > { %v4343_v4 = vpack.c.bf16 %v4319_v1, %v4318_v34  ;;  %v4317_v51 = vmax.f32 %v4285_v49, 0.0  ;;  %v4185_v36 = vadd.f32 %v4106_v42, %v3815_v57  ;;  %v4290_v37 = vadd.f32 %v7146_v26, %v4187_v31  ;;  %v5619_v1 = vpop.f32.mrf.mxu0 }
 0x343   : > { %v5656_v41 = vpop.f32.mrf.mxu1  ;;  %v3820_v61 = vadd.f32 %v3755_v32, %v3450_v8  ;;  %v3083_v34 = vadd.f32 %v7479_v46, %v7478_v14  ;;  %v3456_v48 = vadd.f32 %v7114_v20, %v3085_v58  ;;  %v3825_v31 = vadd.f32 %v5615_v0, %v7107_v33  ;;  %v7480_v32 = vld [vmem:[#allocation37_spill] sm:$0xff] }
 0x344   : > { %v4188_v15 = vadd.f32 %v5656_v41, %v3818_v6  ;;  %v4342_v10 = vpack.c.bf16 %v4317_v51, %v4316_v35  ;;  %v4288_v18 = vadd.f32 %v7146_v26, %v4185_v36  ;;  %v4322_v12 = vmax.f32 %v4290_v37, 0.0  ;;  %v7481_v51 = vld [vmem:[#allocation38_spill] sm:$0xff]  ;;  %v3784_v37 = vpop.f32.mrf.mxu0 }
 0x345   : > { %v4109_v28 = vpop.f32.mrf.mxu1  ;;  %v3454_v36 = vadd.f32 %v7481_v51, %v3083_v34  ;;  %v3089_v63 = vadd.f32 %v7483_v44, %v7482_v56 }
 0x346   : > { %v4291_v47 = vadd.f32 %v7146_v26, %v4188_v15  ;;  %v4186_v7 = vadd.f32 %v4109_v28, %v3816_v60  ;;  %5697 = vmatprep.mubr.bf16.mxu0 %v4342_v10  ;;  %v4320_v9 = vmax.f32 %v4288_v18, 0.0  ;;  %v3826_v60 = vadd.f32 %v5616_v50, %v3456_v48  ;;  %v7484_v18 = vld [vmem:[#allocation28_spill] sm:$0xff]  ;;  %v5620_v62 = vpop.f32.mrf.mxu0  ;;  %v7487_v50 = vld [vmem:[#allocation39_spill] sm:$0xff] }
 0x347   : > { %v5659_v54 = vpop.f32.mrf.mxu1  ;;  %5698 = vmatmul.mubr.bf16.gmra.mxu0 %v4343_v4  ;;  %v3823_v4 = vadd.f32 %v3768_v16, %v7480_v32  ;;  %v3824_v23 = vadd.f32 %v3771_v45, %v3454_v36 }
 0x348   : > { %v4323_v5 = vmax.f32 %v4291_v47, 0.0  ;;  %v4289_v59 = vadd.f32 %v7146_v26, %v4186_v7  ;;  %v4191_v43 = vadd.f32 %v5659_v54, %v3821_v29  ;;  %v7485_v47 = vld [vmem:[#allocation26_spill] sm:$0xff]  ;;  %v3829_v54 = vadd.f32 %v5619_v1, %v7487_v50  ;;  %v3787_v58 = vpop.f32.mrf.mxu0 }
 0x349   : > { %v4122_v38 = vpop.f32.mrf.mxu1  ;;  %v3087_v7 = vadd.f32 %v7485_v47, %v7484_v18 }
 0x34a   : > { %v4345_v13 = vpack.c.bf16 %v4323_v5, %v4322_v12  ;;  %v4321_v39 = vmax.f32 %v4289_v59, 0.0  ;;  %v4189_v3 = vadd.f32 %v4122_v38, %v3819_v2  ;;  %v4294_v24 = vadd.f32 %v7146_v26, %v4191_v43  ;;  %v7488_v43 = vld [vmem:[#allocation40_spill] sm:$0xff] }
 0x34b   : > { %v5660_v40 = vpop.f32.mrf.mxu1  ;;  %v3460_v2 = vadd.f32 %v7486_v53, %v3089_v63  ;;  %v3458_v38 = vadd.f32 %v7132_v19, %v3087_v7 }
 0x34c   : > { %v4192_v57 = vadd.f32 %v5660_v40, %v3822_v55  ;;  %v4344_v21 = vpack.c.bf16 %v4321_v39, %v4320_v9  ;;  %v4292_v6 = vadd.f32 %v7146_v26, %v4189_v3  ;;  %v4326_v17 = vmax.f32 %v4294_v24, 0.0 }
 0x34d   : > { %v4125_v49 = vpop.f32.mrf.mxu1  ;;  %v3827_v55 = vadd.f32 %v3784_v37, %v7488_v43  ;;  %v3830_v11 = vadd.f32 %v5620_v62, %v3460_v2  ;;  %v3828_v14 = vadd.f32 %v3787_v58, %v3458_v38  ;;  %v5939_v62 = vld [vmem:[%s6334_s29 + $0x10] sm:$0xff]   ;;  %v5940_v58 = vld [vmem:[%s6334_s29 + $0x28] sm:$0xff]  }
 0x34e   : > { %v4295_v42 = vadd.f32 %v7146_v26, %v4192_v57  ;;  %v4190_v35 = vadd.f32 %v4125_v49, %v3820_v61  ;;  %5701 = vmatprep.mubr.bf16.mxu0 %v4344_v21  ;;  %v4324_v0 = vmax.f32 %v4292_v6, 0.0 }
 0x34f   : > { %v5663_v25 = vpop.f32.mrf.mxu1  ;;  %5702 = vmatmul.mubr.bf16.gmra.mxu0 %v4345_v13 }
 0x350   : > { %v4327_v27 = vmax.f32 %v4295_v42, 0.0  ;;  %v4293_v20 = vadd.f32 %v7146_v26, %v4190_v35  ;;  %v4195_v41 = vadd.f32 %v5663_v25, %v3825_v31  ;;  %v7272_v25 = vld [vmem:[%s7413_s6] ss:$0 sm:$0xff] }
 0x351   : > { %v4138_v33 = vpop.f32.mrf.mxu1 }
 0x352   : > { %v4347_v15 = vpack.c.bf16 %v4327_v27, %v4326_v17  ;;  %v4325_v10 = vmax.f32 %v4293_v20, 0.0  ;;  %v4193_v22 = vadd.f32 %v4138_v33, %v3823_v4  ;;  %v4298_v28 = vadd.f32 %v7146_v26, %v4195_v41  ;;  %v5936_v17 = vld [vmem:[%s6334_s29 + $0x8] sm:$0xff]   ;;  %v5937_v41 = vld [vmem:[%s6334_s29] sm:$0xff]  }
 0x353   : > { %v5664_v16 = vpop.f32.mrf.mxu1  ;;  %v736_v27 = vunpack.c.l.bf16 %v5936_v17 }
 0x354   : > { %v4196_v30 = vadd.f32 %v5664_v16, %v3826_v60  ;;  %v4346_v29 = vpack.c.bf16 %v4325_v10, %v4324_v0  ;;  %v4296_v12 = vadd.f32 %v7146_v26, %v4193_v22  ;;  %v4330_v13 = vmax.f32 %v4298_v28, 0.0 }
 0x355   : > { %v4141_v8 = vpop.f32.mrf.mxu1  ;;  %v734_v60 = vunpack.c.l.bf16 %v5937_v41  ;;  %v735_v22 = vunpack.c.h.bf16 %v5937_v41 }
 0x356   : > { %v4299_v5 = vadd.f32 %v7146_v26, %v4196_v30  ;;  %v4194_v59 = vadd.f32 %v4141_v8, %v3824_v23  ;;  %5705 = vmatprep.mubr.bf16.mxu0 %v4346_v29  ;;  %v4328_v40 = vmax.f32 %v4296_v12, 0.0  ;;  %v5938_v29 = vld [vmem:[%s6334_s29 + $0x18] sm:$0xff]   ;;  %v738_v8 = vunpack.c.l.bf16 %v5939_v62 }
 0x357   : > { %v5667_v9 = vpop.f32.mrf.mxu1  ;;  %5706 = vmatmul.mubr.bf16.gmra.mxu0 %v4347_v15  ;;  %v737_v15 = vunpack.c.h.bf16 %v5936_v17  ;;  %v740_v18 = vunpack.c.l.bf16 %v5938_v29  ;;  %v5942_v17 = vld [vmem:[%s6334_s29 + $0x38] sm:$0xff]  }
 0x358   : > { %v4331_v39 = vmax.f32 %v4299_v5, 0.0  ;;  %v4297_v3 = vadd.f32 %v7146_v26, %v4194_v59  ;;  %v4199_v52 = vadd.f32 %v5667_v9, %v3829_v54  ;;  %v741_v59 = vunpack.c.h.bf16 %v5938_v29 }
 0x359   : > { %v4154_v45 = vpop.f32.mrf.mxu1 }
 0x35a   : > { %v4349_v61 = vpack.c.bf16 %v4331_v39, %v4330_v13  ;;  %v4329_v24 = vmax.f32 %v4297_v3, 0.0  ;;  %v4197_v57 = vadd.f32 %v4154_v45, %v3827_v55  ;;  %v4302_v46 = vadd.f32 %v7146_v26, %v4199_v52 }
 0x35b   : > { %v5668_v21 = vpop.f32.mrf.mxu1  ;;  %v739_v13 = vunpack.c.h.bf16 %v5939_v62  ;;  %v744_v45 = vunpack.c.l.bf16 %v5940_v58  ;;  %v5945_v62 = vld [vmem:[%s6334_s29 + $0x40] sm:$0xff]  }
 0x35c   : > { %v4200_v34 = vadd.f32 %v5668_v21, %v3830_v11  ;;  %v4348_v19 = vpack.c.bf16 %v4329_v24, %v4328_v40  ;;  %v4300_v1 = vadd.f32 %v7146_v26, %v4197_v57  ;;  %v4334_v6 = vmax.f32 %v4302_v46, 0.0  ;;  %v5941_v21 = vld [vmem:[%s6334_s29 + $0x20] sm:$0xff]  }
 0x35d   : > { %v4157_v48 = vpop.f32.mrf.mxu1 }
 0x35e   : > { %v4303_v49 = vadd.f32 %v7146_v26, %v4200_v34  ;;  %v4198_v31 = vadd.f32 %v4157_v48, %v3828_v14  ;;  %5709 = vmatprep.mubr.bf16.mxu0 %v4348_v19  ;;  %v4332_v32 = vmax.f32 %v4300_v1, 0.0  ;;  %v742_v14 = vunpack.c.l.bf16 %v5941_v21 }
 0x35f   : > { %5710 = vmatmul.mubr.bf16.gmra.mxu0 %v4349_v61  ;;  %v745_v1 = vunpack.c.h.bf16 %v5940_v58 }
 0x360   : > { %v4335_v42 = vmax.f32 %v4303_v49, 0.0  ;;  %v4301_v35 = vadd.f32 %v7146_v26, %v4198_v31 }
 0x362   : > { %v4351_v4 = vpack.c.bf16 %v4335_v42, %v4334_v6  ;;  %v4333_v51 = vmax.f32 %v4301_v35, 0.0  ;;  %v743_v35 = vunpack.c.h.bf16 %v5941_v21 }
 0x364   : > { %v4350_v36 = vpack.c.bf16 %v4333_v51, %v4332_v32 }
 0x366   : > { %5713 = vmatprep.mubr.bf16.mxu0 %v4350_v36 }
 0x367   : > { %5714 = vmatmul.mubr.bf16.gmra.mxu0 %v4351_v4 }
 0x3ef   : > { %v5687_v20 = vpop.f32.mrf.mxu0 }
 0x3f0   : > { %v4466_v37 = vadd.f32 %v5687_v20, %v7272_v25 }
 0x3f1   : > { %v4457_v26 = vpop.f32.mrf.mxu0 }
 0x3f2   : > { %v4586_v33 = vadd.f32 %v4466_v37, %v736_v27  ;;  %v4458_v0 = vadd.f32 %v7272_v25, %v4457_v26  ;;  %v748_v27 = vunpack.c.l.bf16 %v5942_v17  ;;  %v5943_v26 = vld [vmem:[%s6334_s29 + $0x30] sm:$0xff]  }
 0x3f3   : > { %v5688_v10 = vpop.f32.mrf.mxu0 }
 0x3f4   : > { %v4618_v56 = vmax.f32 %v4586_v33, 0.0  ;;  %v4584_v44 = vadd.f32 %v4458_v0, %v734_v60  ;;  %v4469_v63 = vadd.f32 %v5688_v10, %v7272_v25  ;;  %v746_v33 = vunpack.c.l.bf16 %v5943_v26 }
 0x3f5   : > { %v4460_v16 = vpop.f32.mrf.mxu0 }
 0x3f6   : > { %4650 = vst [vmem:[%s7280_s21 + $0x10] sm:$0xff] %v4618_v56  ;;  %v4616_v23 = vmax.f32 %v4584_v44, 0.0  ;;  %v4587_v28 = vadd.f32 %v4469_v63, %v737_v15  ;;  %v4461_v30 = vadd.f32 %v7272_v25, %v4460_v16  ;;  %v749_v56 = vunpack.c.h.bf16 %v5942_v17 }
 0x3f7   : > { %v5691_v47 = vpop.f32.mrf.mxu0 }
 0x3f8   : > { %4648 = vst [vmem:[%s7280_s21] sm:$0xff] %v4616_v23  ;;  %v4619_v7 = vmax.f32 %v4587_v28, 0.0  ;;  %v4585_v53 = vadd.f32 %v4461_v30, %v735_v22  ;;  %v4482_v2 = vadd.f32 %v5691_v47, %v7272_v25  ;;  %v747_v28 = vunpack.c.h.bf16 %v5943_v26 }
 0x3f9   : > { %v4473_v50 = vpop.f32.mrf.mxu0 }
 0x3fa   : > { %4651 = vst [vmem:[%s7280_s21 + $0x18] sm:$0xff] %v4619_v7  ;;  %v4617_v54 = vmax.f32 %v4585_v53, 0.0  ;;  %v4590_v12 = vadd.f32 %v4482_v2, %v740_v18  ;;  %v4474_v5 = vadd.f32 %v7272_v25, %v4473_v50  ;;  %v5944_v7 = vld [vmem:[%s6334_s29 + $0x48] sm:$0xff]  }
 0x3fb   : > { %v5692_v43 = vpop.f32.mrf.mxu0  ;;  %v752_v53 = vunpack.c.l.bf16 %v5944_v7 }
 0x3fc   : > { %4649 = vst [vmem:[%s7280_s21 + $0x8] sm:$0xff] %v4617_v54  ;;  %v4622_v55 = vmax.f32 %v4590_v12, 0.0  ;;  %v4588_v38 = vadd.f32 %v4474_v5, %v738_v8  ;;  %v4485_v9 = vadd.f32 %v5692_v43, %v7272_v25  ;;  %v750_v8 = vunpack.c.l.bf16 %v5945_v62 }
 0x3fd   : > { %v4476_v39 = vpop.f32.mrf.mxu0 }
 0x3fe   : > { %4654 = vst [vmem:[%s7280_s21 + $0x30] sm:$0xff] %v4622_v55  ;;  %v4620_v3 = vmax.f32 %v4588_v38, 0.0  ;;  %v4591_v52 = vadd.f32 %v4485_v9, %v741_v59  ;;  %v4477_v11 = vadd.f32 %v7272_v25, %v4476_v39  ;;  %v753_v38 = vunpack.c.h.bf16 %v5944_v7 }
 0x3ff   : > { %v5695_v40 = vpop.f32.mrf.mxu0 }
 0x400   : > { %4652 = vst [vmem:[%s7280_s21 + $0x20] sm:$0xff] %v4620_v3  ;;  %v4623_v61 = vmax.f32 %v4591_v52, 0.0  ;;  %v4589_v24 = vadd.f32 %v4477_v11, %v739_v13  ;;  %v4498_v57 = vadd.f32 %v5695_v40, %v7272_v25  ;;  %v751_v13 = vunpack.c.h.bf16 %v5945_v62  ;;  %v5950_v62 = vld [vmem:[%s6334_s29 + $0x78] sm:$0xff]  }
 0x401   : > { %v4489_v46 = vpop.f32.mrf.mxu0 }
 0x402   : > { %4655 = vst [vmem:[%s7280_s21 + $0x38] sm:$0xff] %v4623_v61  ;;  %v4621_v34 = vmax.f32 %v4589_v24, 0.0  ;;  %v4594_v19 = vadd.f32 %v4498_v57, %v744_v45  ;;  %v4490_v48 = vadd.f32 %v7272_v25, %v4489_v46  ;;  %v5946_v61 = vld [vmem:[%s6334_s29 + $0x58] sm:$0xff]  }
 0x403   : > { %v5696_v49 = vpop.f32.mrf.mxu0  ;;  %v756_v24 = vunpack.c.l.bf16 %v5946_v61 }
 0x404   : > { %4653 = vst [vmem:[%s7280_s21 + $0x28] sm:$0xff] %v4621_v34  ;;  %v4626_v31 = vmax.f32 %v4594_v19, 0.0  ;;  %v4592_v6 = vadd.f32 %v4490_v48, %v742_v14  ;;  %v4501_v42 = vadd.f32 %v5696_v49, %v7272_v25  ;;  %v5947_v34 = vld [vmem:[%s6334_s29 + $0x50] sm:$0xff]  }
 0x405   : > { %v4492_v32 = vpop.f32.mrf.mxu0  ;;  %v754_v19 = vunpack.c.l.bf16 %v5947_v34 }
 0x406   : > { %4658 = vst [vmem:[%s7280_s21 + $0x50] sm:$0xff] %v4626_v31  ;;  %v4624_v4 = vmax.f32 %v4592_v6, 0.0  ;;  %v4595_v51 = vadd.f32 %v4501_v42, %v745_v1  ;;  %v4493_v36 = vadd.f32 %v7272_v25, %v4492_v32  ;;  %v757_v6 = vunpack.c.h.bf16 %v5946_v61 }
 0x407   : > { %v5699_v20 = vpop.f32.mrf.mxu0 }
 0x408   : > { %4656 = vst [vmem:[%s7280_s21 + $0x40] sm:$0xff] %v4624_v4  ;;  %v4627_v41 = vmax.f32 %v4595_v51, 0.0  ;;  %v4593_v60 = vadd.f32 %v4493_v36, %v743_v35  ;;  %v4514_v37 = vadd.f32 %v5699_v20, %v7272_v25  ;;  %v755_v51 = vunpack.c.h.bf16 %v5947_v34 }
 0x409   : > { %v4505_v0 = vpop.f32.mrf.mxu0 }
 0x40a   : > { %4659 = vst [vmem:[%s7280_s21 + $0x58] sm:$0xff] %v4627_v41  ;;  %v4625_v15 = vmax.f32 %v4593_v60, 0.0  ;;  %v4598_v10 = vadd.f32 %v4514_v37, %v748_v27  ;;  %v4506_v22 = vadd.f32 %v7272_v25, %v4505_v0  ;;  %v5948_v41 = vld [vmem:[%s6334_s29 + $0x68] sm:$0xff]  }
 0x40b   : > { %v5700_v44 = vpop.f32.mrf.mxu0  ;;  %v760_v60 = vunpack.c.l.bf16 %v5948_v41 }
 0x40c   : > { %4657 = vst [vmem:[%s7280_s21 + $0x48] sm:$0xff] %v4625_v15  ;;  %v4630_v63 = vmax.f32 %v4598_v10, 0.0  ;;  %v4596_v16 = vadd.f32 %v4506_v22, %v746_v33  ;;  %v4517_v23 = vadd.f32 %v5700_v44, %v7272_v25  ;;  %v5949_v15 = vld [vmem:[%s6334_s29 + $0x60] sm:$0xff]  }
 0x40d   : > { %v4508_v30 = vpop.f32.mrf.mxu0  ;;  %v758_v10 = vunpack.c.l.bf16 %v5949_v15 }
 0x40e   : > { %4662 = vst [vmem:[%s7280_s21 + $0x70] sm:$0xff] %v4630_v63  ;;  %v4628_v29 = vmax.f32 %v4596_v16, 0.0  ;;  %v4599_v18 = vadd.f32 %v4517_v23, %v749_v56  ;;  %v4509_v47 = vadd.f32 %v7272_v25, %v4508_v30  ;;  %v761_v16 = vunpack.c.h.bf16 %v5948_v41 }
 0x40f   : > { %v5703_v2 = vpop.f32.mrf.mxu0 }
 0x410   : > { %4660 = vst [vmem:[%s7280_s21 + $0x60] sm:$0xff] %v4628_v29  ;;  %v4631_v50 = vmax.f32 %v4599_v18, 0.0  ;;  %v4597_v54 = vadd.f32 %v4509_v47, %v747_v28  ;;  %v4530_v12 = vadd.f32 %v5703_v2, %v7272_v25  ;;  %v759_v18 = vunpack.c.h.bf16 %v5949_v15 }
 0x411   : > { %v4521_v5 = vpop.f32.mrf.mxu0 }
 0x412   : > { %4663 = vst [vmem:[%s7280_s21 + $0x78] sm:$0xff] %v4631_v50  ;;  %v4629_v59 = vmax.f32 %v4597_v54, 0.0  ;;  %v4602_v43 = vadd.f32 %v4530_v12, %v752_v53  ;;  %v4522_v55 = vadd.f32 %v7272_v25, %v4521_v5 }
 0x413   : > { %v5704_v9 = vpop.f32.mrf.mxu0 }
 0x414   : > { %4661 = vst [vmem:[%s7280_s21 + $0x68] sm:$0xff] %v4629_v59  ;;  %v4634_v39 = vmax.f32 %v4602_v43, 0.0  ;;  %v4600_v3 = vadd.f32 %v4522_v55, %v750_v8  ;;  %v4533_v52 = vadd.f32 %v5704_v9, %v7272_v25  ;;  %v764_v8 = vunpack.c.l.bf16 %v5950_v62  ;;  %v5951_v59 = vld [vmem:[%s6334_s29 + $0x70] sm:$0xff]   ;;  %s4681_s29 = scalar_lea.sflag [#allocation6], %s6330_s19 }
 0x415   : > { %v4524_v11 = vpop.f32.mrf.mxu0  ;;  %v762_v43 = vunpack.c.l.bf16 %v5951_v59 }
 0x416   : > { %4666 = vst [vmem:[%s7280_s21 + $0x90] sm:$0xff] %v4634_v39  ;;  %v4632_v58 = vmax.f32 %v4600_v3, 0.0  ;;  %v4603_v45 = vadd.f32 %v4533_v52, %v753_v38  ;;  %v4525_v40 = vadd.f32 %v7272_v25, %v4524_v11  ;;  %v765_v39 = vunpack.c.h.bf16 %v5950_v62 }
 0x417   : > { %v5707_v57 = vpop.f32.mrf.mxu0 }
 0x418   : > { %4664 = vst [vmem:[%s7280_s21 + $0x80] sm:$0xff] %v4632_v58  ;;  %v4635_v21 = vmax.f32 %v4603_v45, 0.0  ;;  %v4601_v14 = vadd.f32 %v4525_v40, %v751_v13  ;;  %v4546_v46 = vadd.f32 %v5707_v57, %v7272_v25  ;;  %v763_v45 = vunpack.c.h.bf16 %v5951_v59 }
 0x419   : > { %v4537_v48 = vpop.f32.mrf.mxu0 }
 0x41a   : > { %4667 = vst [vmem:[%s7280_s21 + $0x98] sm:$0xff] %v4635_v21  ;;  %v4633_v1 = vmax.f32 %v4601_v14, 0.0  ;;  %v4606_v49 = vadd.f32 %v4546_v46, %v756_v24  ;;  %v4538_v31 = vadd.f32 %v7272_v25, %v4537_v48 }
 0x41b   : > { %v5708_v42 = vpop.f32.mrf.mxu0 }
 0x41c   : > { %4665 = vst [vmem:[%s7280_s21 + $0x88] sm:$0xff] %v4633_v1  ;;  %v4638_v35 = vmax.f32 %v4606_v49, 0.0  ;;  %v4604_v32 = vadd.f32 %v4538_v31, %v754_v19  ;;  %v4549_v4 = vadd.f32 %v5708_v42, %v7272_v25 }
 0x41d   : > { %v4540_v36 = vpop.f32.mrf.mxu0 }
 0x41e   : > { %4670 = vst [vmem:[%s7280_s21 + $0xb0] sm:$0xff] %v4638_v35  ;;  %v4636_v17 = vmax.f32 %v4604_v32, 0.0  ;;  %v4607_v27 = vadd.f32 %v4549_v4, %v757_v6  ;;  %v4541_v20 = vadd.f32 %v7272_v25, %v4540_v36 }
 0x41f   : > { %v5711_v37 = vpop.f32.mrf.mxu0 }
 0x420   : > { %4668 = vst [vmem:[%s7280_s21 + $0xa0] sm:$0xff] %v4636_v17  ;;  %v4639_v26 = vmax.f32 %v4607_v27, 0.0  ;;  %v4605_v33 = vadd.f32 %v4541_v20, %v755_v51  ;;  %v4562_v0 = vadd.f32 %v5711_v37, %v7272_v25 }
 0x421   : > { %v4553_v22 = vpop.f32.mrf.mxu0 }
 0x422   : > { %4671 = vst [vmem:[%s7280_s21 + $0xb8] sm:$0xff] %v4639_v26  ;;  %v4637_v56 = vmax.f32 %v4605_v33, 0.0  ;;  %v4610_v44 = vadd.f32 %v4562_v0, %v760_v60  ;;  %v4554_v63 = vadd.f32 %v7272_v25, %v4553_v22 }
 0x423   : > { %v5712_v23 = vpop.f32.mrf.mxu0 }
 0x424   : > { %4669 = vst [vmem:[%s7280_s21 + $0xa8] sm:$0xff] %v4637_v56  ;;  %v4642_v28 = vmax.f32 %v4610_v44, 0.0  ;;  %v4608_v30 = vadd.f32 %v4554_v63, %v758_v10  ;;  %v4565_v29 = vadd.f32 %v5712_v23, %v7272_v25 }
 0x425   : > { %v4556_v47 = vpop.f32.mrf.mxu0 }
 0x426   : > { %4674 = vst [vmem:[%s7280_s21 + $0xd0] sm:$0xff] %v4642_v28  ;;  %v4640_v7 = vmax.f32 %v4608_v30, 0.0  ;;  %v4611_v53 = vadd.f32 %v4565_v29, %v761_v16  ;;  %v4557_v2 = vadd.f32 %v7272_v25, %v4556_v47 }
 0x427   : > { %v5715_v50 = vpop.f32.mrf.mxu0 }
 0x428   : > { %4672 = vst [vmem:[%s7280_s21 + $0xc0] sm:$0xff] %v4640_v7  ;;  %v4643_v54 = vmax.f32 %v4611_v53, 0.0  ;;  %v4609_v12 = vadd.f32 %v4557_v2, %v759_v18  ;;  %v4578_v5 = vadd.f32 %v5715_v50, %v7272_v25 }
 0x429   : > { %v4569_v55 = vpop.f32.mrf.mxu0 }
 0x42a   : > { %4675 = vst [vmem:[%s7280_s21 + $0xd8] sm:$0xff] %v4643_v54  ;;  %v4641_v38 = vmax.f32 %v4609_v12, 0.0  ;;  %v4614_v9 = vadd.f32 %v4578_v5, %v764_v8  ;;  %v4570_v13 = vadd.f32 %v7272_v25, %v4569_v55 }
 0x42b   : > { %v5716_v3 = vpop.f32.mrf.mxu0 }
 0x42c   : > { %4673 = vst [vmem:[%s7280_s21 + $0xc8] sm:$0xff] %v4641_v38  ;;  %v4646_v52 = vmax.f32 %v4614_v9, 0.0  ;;  %v4612_v11 = vadd.f32 %v4570_v13, %v762_v43  ;;  %v4581_v58 = vadd.f32 %v5716_v3, %v7272_v25 }
 0x42d   : > { %v4572_v40 = vpop.f32.mrf.mxu0 }
 0x42e   : > { %4678 = vst [vmem:[%s7280_s21 + $0xf0] sm:$0xff] %v4646_v52  ;;  %v4644_v61 = vmax.f32 %v4612_v11, 0.0  ;;  %v4615_v24 = vadd.f32 %v4581_v58, %v765_v39  ;;  %v4573_v57 = vadd.f32 %v7272_v25, %v4572_v40 }
 0x430   : > { %4676 = vst [vmem:[%s7280_s21 + $0xe0] sm:$0xff] %v4644_v61  ;;  %v4647_v21 = vmax.f32 %v4615_v24, 0.0  ;;  %v4613_v14 = vadd.f32 %v4573_v57, %v763_v45 }
 0x432   : > { %4679 = vst [vmem:[%s7280_s21 + $0xf8] sm:$0xff] %v4647_v21  ;;  %v4645_v46 = vmax.f32 %v4613_v14, 0.0 }
 0x434   : > { %4677 = vst [vmem:[%s7280_s21 + $0xe8] sm:$0xff] %v4645_v46 }
 0x435   : > { %6071 = shalt.err (!%p6068_p10)
}
 0x436   : > { %s6072_s13 = scalar_lea.hbm %s7360_s16, 4096  ;;  %s6076_s11 = scalar_lea.hbm %s7414_s7, 8192 }
 0x437   : > { %p6073_p6 = scmp.ne.s32.totalorder %s7360_s16, %s6072_s13  ;;  %p6077_p3 = scmp.lt.s32.totalorder %s7360_s16, %s7414_s7 }
 0x438   : > { %p6078_p11 = scmp.lt.s32.totalorder %s6076_s11, %s6072_s13 }
 0x439   : > { %p6074_p4 = pnand %p6073_p6, %p7489_p1 }
 0x43a   : > { %p6079_p5 = por %p6078_p11, %p6077_p3 }
 0x43b   : > { %p6075_p8 = pneg %p6074_p4 }
 0x43d   : > { %p6080_p7 = pnand %p6079_p5, %p6075_p8 }
 0x43f   : > { %6083 = shalt.err (!%p6080_p7)
}
 0x440   : > { %s6141_s23 = smov 128   ;;  %s6142_s1 = smov 8  }
 0x441   : > { %5747 = dma.vmem_to_hbm [thread:$0]  (%p7489_p1), %s7362_s18, 4096, %s7360_s16, %s4681_s29, %s6141_s23, %s6141_s23, %s6142_s1  }
 0x442 PF: > { %s4709_s30 = sand.u32 1, %s6118_s24   ;;  %p7490_p12 = scmp.ne.s32.totalorder %s7423_s8, 0 }
 0x443   : > { %p7491_p9 = scmp.ge.s32.totalorder %s6130_s27, 2  ;;  %s4710_s28 = scalar_lea.sflag [#allocation6], %s4709_s30 }
 0x445   : > { %p5764_p13 = pnand %p7491_p9, %p7490_p12 }
 0x447   : > { %p5765_p0 = pneg %p5764_p13 }
 0x449   : > { %6113 = dma.done.wait (%p5765_p0), %s4710_s28, 4096  }
 0x44a   : > { %6115 = vsyncadd (%p5765_p0), %s4710_s28, 4294963200  ;;  %p22_p2 = scmp.ge.s32.totalorder %s6272_s14, 4   ;;  %s7492_s24 = smov %s6122_s25 }
 0x44b   : > { %s7493_s25 = smov %s6126_s26  ;;  %s7494_s26 = smov %s6282_s17 }
 0x44c   : > { %s7495_s27 = smov %s6272_s14  ;;  %24 = sbr.rel (!%p22_p2) target bundleno = 9 (0x9), region = 115 }
 0x451   :  { %4715 = vsyncpa [#allocation5], 1 }
 0x452   :  { %4717 = vsyncpa [#allocation5 + $0x1], 1 }
 0x453   :  { %4718 = vsyncpa [#allocation8], 1 }
 0x454   :  { %4719 = vsyncpa [#allocation11], 1 }
 0x455   :  { %4720 = vsyncpa [#allocation6], 1 }
 0x456   :  { %4722 = vsyncpa [#allocation6 + $0x1], 1 }

</bundles_post_ra>
